<compile_context>
chip_gen: v5e
topology: v5e:2x2
jax: 0.10.0
libtpu: 0.0.40
codegen_flags: <defaults>
</compile_context>

<pallas_src>
import jax
import jax.numpy as jnp
from jax import lax
from jax.experimental import pallas as pl
from jax.experimental.pallas import tpu as pltpu


def _structured_attn_kernel(x_ref, w_ih_ref, w_hh_ref, bg_ref,
                            w1_ref, b1_ref, w2_ref, b2_ref,
                            wf_ref, bf_ref,
                            out_ref, attn_ref,
                            gx_ref, hs_ref):
    """One batch tile per grid step.  x_ref is time-major: (T, Bb, Din)."""
    T, Bb, Din = x_ref.shape
    H = w_hh_ref.shape[0]
    r = w2_ref.shape[1]
    TC = gx_ref.shape[0]            # time-chunk length for the staged projection
    n_chunks = T // TC
    mm = w_hh_ref.dtype             # MXU operand dtype (bf16 by default)

    w_ih = w_ih_ref[...]            # already cast to `mm` in the wrapper
    w_hh = w_hh_ref[...]
    bg = bg_ref[...]                # f32

    # ---- LSTM recurrence, processed in time chunks -----------------------------
    # Per chunk: one fused (TC*Bb, Din) @ (Din, 4H) MXU matmul staged in VMEM,
    # then TC serial steps of a dense (Bb, H) @ (H, 4H) matmul.
    # TODO(synk): at production T, double-buffer the chunk projection
    # (pltpu.emit_pipeline) to overlap it with the previous chunk's recurrence.
    def chunk_body(ci, carry):
        t0 = ci * TC
        xc = x_ref[pl.ds(t0, TC)].reshape(TC * Bb, Din).astype(mm)
        gx = jnp.dot(xc, w_ih, preferred_element_type=jnp.float32) + bg
        gx_ref[...] = gx.reshape(TC, Bb, 4 * H).astype(gx_ref.dtype)

        def step(tl, hc):
            h, c = hc
            g = gx_ref[tl].astype(jnp.float32) + jnp.dot(
                h.astype(mm), w_hh, preferred_element_type=jnp.float32)  # (Bb,4H)
            # PyTorch gate order: i, f, g, o.  No sigmoid on the g chunk.
            if_g = jax.nn.sigmoid(g[:, :2 * H])
            o_g = jax.nn.sigmoid(g[:, 3 * H:])
            g_g = jnp.tanh(g[:, 2 * H:3 * H])
            c_new = if_g[:, H:] * c + if_g[:, :H] * g_g
            h_new = o_g * jnp.tanh(c_new)
            hs_ref[t0 + tl] = h_new.astype(hs_ref.dtype)
            return h_new, c_new

        return lax.fori_loop(0, TC, step, carry,
                             unroll=True if TC <= 32 else 8)

    h0 = jnp.zeros((Bb, H), jnp.float32)
    c0 = jnp.zeros((Bb, H), jnp.float32)
    lax.fori_loop(0, n_chunks, chunk_body, (h0, c0))

    # ---- structured self-attention ---------------------------------------------
    hs = hs_ref[...]                                              # (T, Bb, H)
    hs2d = hs.reshape(T * Bb, H).astype(mm)
    a1 = jnp.tanh(jnp.dot(hs2d, w1_ref[...],
                          preferred_element_type=jnp.float32) + b1_ref[...])
    scores = (jnp.dot(a1.astype(mm), w2_ref[...],
                      preferred_element_type=jnp.float32)
              + b2_ref[...]).reshape(T, Bb, r)                    # (T, Bb, r)

    # softmax over time (== dim=1 of PyTorch's (B, T, r) tensor)
    m = jnp.max(scores, axis=0, keepdims=True)
    e = jnp.exp(scores - m)
    denom = jnp.sum(e, axis=0, keepdims=True)
    attn = e * pl.reciprocal(denom, approx=True)                  # (T, Bb, r)

    # Lane-dense flat attention output (Bb, r*T): per head one small XLU 2-D
    # transpose, then a single dense store (no masked partial stores).
    slabs = [jnp.transpose(attn[:, :, h]) for h in range(r)]      # each (Bb, T)
    attn_ref[...] = jnp.concatenate(slabs, axis=1)                # (Bb, r*T)

    # Averaged multi-head context; the 1/r head average is folded into wf.
    w_t = jnp.sum(attn, axis=2)                                   # (T, Bb)
    ctx = jnp.sum(w_t[:, :, None] * hs.astype(jnp.float32), axis=0)   # (Bb, H)
    out_ref[...] = (jnp.dot(ctx.astype(mm), wf_ref[...],
                            preferred_element_type=jnp.float32) + bf_ref[...])


def structured_self_attention(x, params, *, b_block=None, mxu_dtype=jnp.bfloat16):
    """Forward pass. Returns (output (B, out_dim), attention (B, r, T))."""
    B, T, Din = x.shape
    H = params["w_hh"].shape[0]
    d_a = params["w1"].shape[1]
    r = params["w2"].shape[1]
    out_dim = params["wf"].shape[1]

    # ---- batch-tile heuristic: big tiles, but >= 2 tiles when B allows (v7x) ----
    if b_block is None:
        if B <= 8:
            b_block = B
        else:
            half = -(-B // 2)                                    # ceil(B/2)
            b_block = min(256, ((half + 7) // 8) * 8, ((B + 7) // 8) * 8)
    n_blocks = pl.cdiv(B, b_block)

    # time-chunk for the gx staging scratch (keeps VMEM T-independent at big T)
    t_chunk = T
    for c in (128, 64, 32):
        if T > c and T % c == 0:
            t_chunk = c
            break

    # Layout plumbing kept outside the kernel (cheap XLA copies on small data):
    #   * time-major x so each recurrence step touches one dense (b_block, .) tile
    #   * fold the 1/r head average into the final projection weight
    #   * pre-cast MXU weight operands (also halves their per-step DMA)
    x_tbd = jnp.transpose(x, (1, 0, 2))                           # (T, B, Din)
    w_ih = params["w_ih"].astype(mxu_dtype)
    w_hh = params["w_hh"].astype(mxu_dtype)
    w1 = params["w1"].astype(mxu_dtype)
    w2 = params["w2"].astype(mxu_dtype)
    wf = (params["wf"] / float(r)).astype(mxu_dtype)

    # ---- VMEM budget (raise scoped limit with headroom) -------------------------
    wb = jnp.dtype(mxu_dtype).itemsize
    est = (T * b_block * Din * x.dtype.itemsize * 2              # x tile (2 bufs)
           + t_chunk * b_block * 4 * H * wb                      # gx scratch
           + T * b_block * H * wb                                # hs scratch
           + (b_block * out_dim + b_block * r * T) * 4 * 2       # outputs (2 bufs)
           + (Din * 4 * H + H * 4 * H + H * d_a + d_a * r + H * out_dim) * wb * 2
           + (4 * H + d_a + r + out_dim) * 4 * 2)                # biases
    vmem_limit = int(min(100 * 2**20, max(32 * 2**20, 2 * est)))

    rep = lambda i: (0, 0)
    in_specs = [
        pl.BlockSpec((T, b_block, Din), lambda i: (0, i, 0)),     # x (time-major)
        pl.BlockSpec((Din, 4 * H), rep),                          # W_ih^T
        pl.BlockSpec((H, 4 * H), rep),                            # W_hh^T
        pl.BlockSpec((1, 4 * H), rep),                            # b_ih + b_hh
        pl.BlockSpec((H, d_a), rep),                              # linear_first.W^T
        pl.BlockSpec((1, d_a), rep),                              # linear_first.b
        pl.BlockSpec((d_a, r), rep),                              # linear_second.W^T
        pl.BlockSpec((1, r), rep),                                # linear_second.b
        pl.BlockSpec((H, out_dim), rep),                          # linear_final.W^T / r
        pl.BlockSpec((1, out_dim), rep),                          # linear_final.b
    ]
    out_specs = [
        pl.BlockSpec((b_block, out_dim), lambda i: (i, 0)),       # output
        pl.BlockSpec((b_block, r * T), lambda i: (i, 0)),         # attention (flat, lane-dense)
    ]
    out_shape = (
        jax.ShapeDtypeStruct((B, out_dim), jnp.float32),
        jax.ShapeDtypeStruct((B, r * T), jnp.float32),
    )

    out, attn_flat = pl.pallas_call(
        _structured_attn_kernel,
        grid=(n_blocks,),
        in_specs=in_specs,
        out_specs=out_specs,
        out_shape=out_shape,
        scratch_shapes=[
            pltpu.VMEM((t_chunk, b_block, 4 * H), mxu_dtype),     # staged input projection
            pltpu.VMEM((T, b_block, H), mxu_dtype),               # LSTM hidden states
        ],
        compiler_params=pltpu.CompilerParams(
            dimension_semantics=("parallel",),                    # batch tiles independent
            vmem_limit_bytes=vmem_limit),
    )(x_tbd, w_ih, w_hh, params["b_gates"],
      w1, params["b1"], w2, params["b2"],
      wf, params["bf"])

    # (B, r*T) -> (B, r, T) is layout-identical: zero-cost reshape.
    return out, attn_flat.reshape(B, r, T)


def reference(x, params):
    """Plain-JAX f32 replica of the PyTorch forward for verification."""
    B, T, Din = x.shape
    H = params["w_hh"].shape[0]
    r = params["w2"].shape[1]

    def step(carry, xt):
        h, c = carry
        gates = xt @ params["w_ih"] + params["b_gates"][0] + h @ params["w_hh"]
        i = jax.nn.sigmoid(gates[:, :H])
        f = jax.nn.sigmoid(gates[:, H:2 * H])
        g = jnp.tanh(gates[:, 2 * H:3 * H])
        o = jax.nn.sigmoid(gates[:, 3 * H:])
        c = f * c + i * g
        h = o * jnp.tanh(c)
        return (h, c), h

    h0 = jnp.zeros((B, H), jnp.float32)
    c0 = jnp.zeros((B, H), jnp.float32)
    (_, _), hs = lax.scan(step, (h0, c0), jnp.transpose(x, (1, 0, 2)))
    hs = jnp.transpose(hs, (1, 0, 2))                              # (B, T, H)

    a1 = jnp.tanh(hs @ params["w1"] + params["b1"][0])
    scores = a1 @ params["w2"] + params["b2"][0]                   # (B, T, r)
    attn = jax.nn.softmax(scores, axis=1)                          # over time
    attention = jnp.transpose(attn, (0, 2, 1))                     # (B, r, T)
    context = attention @ hs                                       # (B, r, H)
    avg = jnp.sum(context, axis=1) / r
    out = avg @ params["wf"] + params["bf"][0]
    return out, attention


def init_params(key, input_dim, lstm_hid_dim, output_dim, d_a, r):
    H = lstm_hid_dim
    ks = jax.random.split(key, 8)
    bound = 1.0 / jnp.sqrt(H)
    u = lambda k, shape, b: jax.random.uniform(k, shape, jnp.float32, -b, b)
    # PyTorch stores W_ih (4H, Din), W_hh (4H, H); we keep transposed copies.
    params = {
        "w_ih": u(ks[0], (input_dim, 4 * H), bound),
        "w_hh": u(ks[1], (H, 4 * H), bound),
        "b_gates": (u(ks[2], (4 * H,), bound) + u(ks[3], (4 * H,), bound))[None, :],
        "w1": u(ks[4], (H, d_a), bound),
        "b1": jnp.zeros((1, d_a), jnp.float32),          # bias.data.fill_(0)
        "w2": u(ks[5], (d_a, r), bound),
        "b2": jnp.zeros((1, r), jnp.float32),            # bias.data.fill_(0)
        "wf": u(ks[6], (H, output_dim), bound),
        "bf": u(ks[7], (1, output_dim), bound),
    }
    return params


if __name__ == "__main__":
    # TODO(synk): dropout > 0, n_layers > 1 and bidirectional=True variants are not
    # implemented; the module defaults (p=0 dropout == identity, single forward
    # LSTM) are what the kernel computes.
    B, T, input_dim = 16, 16, 16
    lstm_hid_dim, d_a, r, output_dim = 32, 16, 4, 8

    key = jax.random.PRNGKey(0)
    kx, kp = jax.random.split(key)
    x = jax.random.normal(kx, (B, T, input_dim), jnp.float32)
    params = init_params(kp, input_dim, lstm_hid_dim, output_dim, d_a, r)

    out_ref, attn_ref = reference(x, params)

    # Exact-path check (f32 MXU operands): tight tolerance.
    out32, att32 = structured_self_attention(x, params, mxu_dtype=jnp.float32)
    out32 = jax.block_until_ready(out32)
    att32 = jax.block_until_ready(att32)
    assert out32.shape == (B, output_dim) and att32.shape == (B, r, T)
    assert jnp.allclose(out32, out_ref, atol=2e-3, rtol=2e-3), (
        float(jnp.max(jnp.abs(out32 - out_ref))))
    assert jnp.allclose(att32, attn_ref, atol=2e-3, rtol=2e-3), (
        float(jnp.max(jnp.abs(att32 - attn_ref))))

    # Default fast path (bf16 MXU operands, f32 accumulation): looser tolerance.
    out, attention = structured_self_attention(x, params)
    out = jax.block_until_ready(out)
    attention = jax.block_until_ready(attention)
    assert out.shape == (B, output_dim) and attention.shape == (B, r, T)
    assert jnp.allclose(out, out_ref, atol=5e-2, rtol=5e-2), (
        float(jnp.max(jnp.abs(out - out_ref))))
    assert jnp.allclose(attention, attn_ref, atol=1e-2, rtol=5e-2), (
        float(jnp.max(jnp.abs(attention - attn_ref))))

    print("KERNEL_OK")
</pallas_src>

<mosaic_0001>
module attributes {stable_mosaic.version = 11 : i64} {
  func.func @_structured_attn_kernel(%arg0: i32, %arg1: memref<16x8x16xf32, #tpu.memory_space<vmem>>, %arg2: memref<16x128xf32, #tpu.memory_space<vmem>>, %arg3: memref<32x128xf32, #tpu.memory_space<vmem>>, %arg4: memref<1x128xf32, #tpu.memory_space<vmem>>, %arg5: memref<32x16xf32, #tpu.memory_space<vmem>>, %arg6: memref<1x16xf32, #tpu.memory_space<vmem>>, %arg7: memref<16x4xf32, #tpu.memory_space<vmem>>, %arg8: memref<1x4xf32, #tpu.memory_space<vmem>>, %arg9: memref<32x8xf32, #tpu.memory_space<vmem>>, %arg10: memref<1x8xf32, #tpu.memory_space<vmem>>, %arg11: memref<8x8xf32, #tpu.memory_space<vmem>>, %arg12: memref<8x64xf32, #tpu.memory_space<vmem>>, %arg13: memref<16x8x128xf32, #tpu.memory_space<vmem>>, %arg14: memref<16x8x32xf32, #tpu.memory_space<vmem>>) attributes {dimension_semantics = [#tpu.dimension_semantics<parallel>], iteration_bounds = array<i64: 2>, scalar_prefetch = 0 : i64, scratch_operands = 2 : i64, tpu.core_type = #tpu.core_type<tc>, window_params = [{transform_indices = @transform_0, window_bounds = array<i64: 16, 8, 16>}, {pipeline_mode = #tpu.pipeline_mode<synchronous>, transform_indices = @transform_1, window_bounds = array<i64: 16, 128>}, {pipeline_mode = #tpu.pipeline_mode<synchronous>, transform_indices = @transform_2, window_bounds = array<i64: 32, 128>}, {pipeline_mode = #tpu.pipeline_mode<synchronous>, transform_indices = @transform_3, window_bounds = array<i64: 1, 128>}, {pipeline_mode = #tpu.pipeline_mode<synchronous>, transform_indices = @transform_4, window_bounds = array<i64: 32, 16>}, {pipeline_mode = #tpu.pipeline_mode<synchronous>, transform_indices = @transform_5, window_bounds = array<i64: 1, 16>}, {pipeline_mode = #tpu.pipeline_mode<synchronous>, transform_indices = @transform_6, window_bounds = array<i64: 16, 4>}, {pipeline_mode = #tpu.pipeline_mode<synchronous>, transform_indices = @transform_7, window_bounds = array<i64: 1, 4>}, {pipeline_mode = #tpu.pipeline_mode<synchronous>, transform_indices = @transform_8, window_bounds = array<i64: 32, 8>}, {pipeline_mode = #tpu.pipeline_mode<synchronous>, transform_indices = @transform_9, window_bounds = array<i64: 1, 8>}, {transform_indices = @transform_10, window_bounds = array<i64: 8, 8>}, {transform_indices = @transform_11, window_bounds = array<i64: 8, 64>}]} {
    %c0 = arith.constant 0 : index
    %c0_0 = arith.constant 0 : index
    %0 = vector.load %arg2[%c0, %c0_0] : memref<16x128xf32, #tpu.memory_space<vmem>>, vector<16x128xf32>
    %c0_1 = arith.constant 0 : index
    %c0_2 = arith.constant 0 : index
    %1 = vector.load %arg3[%c0_1, %c0_2] : memref<32x128xf32, #tpu.memory_space<vmem>>, vector<32x128xf32>
    %c0_3 = arith.constant 0 : index
    %c0_4 = arith.constant 0 : index
    %2 = vector.load %arg4[%c0_3, %c0_4] : memref<1x128xf32, #tpu.memory_space<vmem>>, vector<1x128xf32>
    %cst = arith.constant 0.000000e+00 : f32
    %3 = vector.broadcast %cst : f32 to vector<8x32xf32>
    %cst_5 = arith.constant 0.000000e+00 : f32
    %4 = vector.broadcast %cst_5 : f32 to vector<8x32xf32>
    %c0_i32 = arith.constant 0 : i32
    %c16_i32 = arith.constant 16 : i32
    %5 = arith.muli %c0_i32, %c16_i32 : i32
    %6 = arith.index_cast %5 : i32 to index
    %c0_6 = arith.constant 0 : index
    %c0_7 = arith.constant 0 : index
    %7 = vector.load %arg1[%6, %c0_6, %c0_7] : memref<16x8x16xf32, #tpu.memory_space<vmem>>, vector<16x8x16xf32>
    %8 = vector.shape_cast %7 : vector<16x8x16xf32> to vector<128x16xf32>
    %cst_8 = arith.constant dense<0.000000e+00> : vector<128x128xf32>
    %9 = tpu.matmul %8, %0, %cst_8 {dimension_numbers = #tpu.dot_dimension_numbers<[1], [0], [0], [1], [0, 0, 1, 1], [], []>} : vector<128x16xf32>, vector<16x128xf32>, vector<128x128xf32> -> vector<128x128xf32>
    %10 = vector.broadcast %2 : vector<1x128xf32> to vector<128x128xf32>
    %11 = arith.addf %9, %10 : vector<128x128xf32>
    %12 = vector.shape_cast %11 : vector<128x128xf32> to vector<16x8x128xf32>
    %c0_9 = arith.constant 0 : index
    %c0_10 = arith.constant 0 : index
    %c0_11 = arith.constant 0 : index
    %13 = vector.load %arg13[%c0_9, %c0_10, %c0_11] : memref<16x8x128xf32, #tpu.memory_space<vmem>>, vector<16x8x128xf32>
    tpu.vector_store %arg13[%c0_9, %c0_10, %c0_11], %12 {strides = array<i32>} : memref<16x8x128xf32, #tpu.memory_space<vmem>>, vector<16x8x128xf32>,
    %c0_i32_12 = arith.constant 0 : i32
    %14 = arith.index_cast %c0_i32_12 : i32 to index
    %c0_13 = arith.constant 0 : index
    %c0_14 = arith.constant 0 : index
    %15 = vector.load %arg13[%14, %c0_13, %c0_14] : memref<16x8x128xf32, #tpu.memory_space<vmem>>, vector<1x8x128xf32>
    %16 = vector.shape_cast %15 : vector<1x8x128xf32> to vector<8x128xf32>
    %cst_15 = arith.constant dense<0.000000e+00> : vector<8x128xf32>
    %17 = tpu.matmul %3, %1, %cst_15 {dimension_numbers = #tpu.dot_dimension_numbers<[1], [0], [0], [1], [0, 0, 1, 1], [], []>} : vector<8x32xf32>, vector<32x128xf32>, vector<8x128xf32> -> vector<8x128xf32>
    %18 = arith.addf %16, %17 : vector<8x128xf32>
    %19 = vector.extract_strided_slice %18 {offsets = [0, 0], sizes = [8, 64], strides = [1, 1]} : vector<8x128xf32> to vector<8x64xf32>
    %20 = arith.negf %19 : vector<8x64xf32>
    %21 = math.exp %20 : vector<8x64xf32>
    %cst_16 = arith.constant 1.000000e+00 : f32
    %22 = vector.broadcast %cst_16 : f32 to vector<8x64xf32>
    %23 = arith.addf %22, %21 : vector<8x64xf32>
    %24 = arith.divf %22, %23 : vector<8x64xf32>
    %25 = vector.extract_strided_slice %18 {offsets = [0, 96], sizes = [8, 32], strides = [1, 1]} : vector<8x128xf32> to vector<8x32xf32>
    %26 = arith.negf %25 : vector<8x32xf32>
    %27 = math.exp %26 : vector<8x32xf32>
    %cst_17 = arith.constant 1.000000e+00 : f32
    %28 = vector.broadcast %cst_17 : f32 to vector<8x32xf32>
    %29 = arith.addf %28, %27 : vector<8x32xf32>
    %30 = arith.divf %28, %29 : vector<8x32xf32>
    %31 = vector.extract_strided_slice %18 {offsets = [0, 64], sizes = [8, 32], strides = [1, 1]} : vector<8x128xf32> to vector<8x32xf32>
    %32 = math.tanh %31 : vector<8x32xf32>
    %33 = vector.extract_strided_slice %24 {offsets = [0, 32], sizes = [8, 32], strides = [1, 1]} : vector<8x64xf32> to vector<8x32xf32>
    %34 = arith.mulf %33, %4 : vector<8x32xf32>
    %35 = vector.extract_strided_slice %24 {offsets = [0, 0], sizes = [8, 32], strides = [1, 1]} : vector<8x64xf32> to vector<8x32xf32>
    %36 = arith.mulf %35, %32 : vector<8x32xf32>
    %37 = arith.addf %34, %36 : vector<8x32xf32>
    %38 = math.tanh %37 : vector<8x32xf32>
    %39 = arith.mulf %30, %38 : vector<8x32xf32>
    %40 = arith.addi %5, %c0_i32_12 : i32
    %41 = arith.index_cast %40 : i32 to index
    %c0_18 = arith.constant 0 : index
    %c0_19 = arith.constant 0 : index
    %42 = vector.load %arg14[%41, %c0_18, %c0_19] : memref<16x8x32xf32, #tpu.memory_space<vmem>>, vector<1x8x32xf32>
    %43 = vector.shape_cast %42 : vector<1x8x32xf32> to vector<8x32xf32>
    %44 = vector.shape_cast %39 : vector<8x32xf32> to vector<1x8x32xf32>
    tpu.vector_store %arg14[%41, %c0_18, %c0_19], %44 {strides = array<i32>} : memref<16x8x32xf32, #tpu.memory_space<vmem>>, vector<1x8x32xf32>,
    %c1_i32 = arith.constant 1 : i32
    %45 = arith.index_cast %c1_i32 : i32 to index
    %c0_20 = arith.constant 0 : index
    %c0_21 = arith.constant 0 : index
    %46 = vector.load %arg13[%45, %c0_20, %c0_21] : memref<16x8x128xf32, #tpu.memory_space<vmem>>, vector<1x8x128xf32>
    %47 = vector.shape_cast %46 : vector<1x8x128xf32> to vector<8x128xf32>
    %cst_22 = arith.constant dense<0.000000e+00> : vector<8x128xf32>
    %48 = tpu.matmul %39, %1, %cst_22 {dimension_numbers = #tpu.dot_dimension_numbers<[1], [0], [0], [1], [0, 0, 1, 1], [], []>} : vector<8x32xf32>, vector<32x128xf32>, vector<8x128xf32> -> vector<8x128xf32>
    %49 = arith.addf %47, %48 : vector<8x128xf32>
    %50 = vector.extract_strided_slice %49 {offsets = [0, 0], sizes = [8, 64], strides = [1, 1]} : vector<8x128xf32> to vector<8x64xf32>
    %51 = arith.negf %50 : vector<8x64xf32>
    %52 = math.exp %51 : vector<8x64xf32>
    %cst_23 = arith.constant 1.000000e+00 : f32
    %53 = vector.broadcast %cst_23 : f32 to vector<8x64xf32>
    %54 = arith.addf %53, %52 : vector<8x64xf32>
    %55 = arith.divf %53, %54 : vector<8x64xf32>
    %56 = vector.extract_strided_slice %49 {offsets = [0, 96], sizes = [8, 32], strides = [1, 1]} : vector<8x128xf32> to vector<8x32xf32>
    %57 = arith.negf %56 : vector<8x32xf32>
    %58 = math.exp %57 : vector<8x32xf32>
    %cst_24 = arith.constant 1.000000e+00 : f32
    %59 = vector.broadcast %cst_24 : f32 to vector<8x32xf32>
    %60 = arith.addf %59, %58 : vector<8x32xf32>
    %61 = arith.divf %59, %60 : vector<8x32xf32>
    %62 = vector.extract_strided_slice %49 {offsets = [0, 64], sizes = [8, 32], strides = [1, 1]} : vector<8x128xf32> to vector<8x32xf32>
    %63 = math.tanh %62 : vector<8x32xf32>
    %64 = vector.extract_strided_slice %55 {offsets = [0, 32], sizes = [8, 32], strides = [1, 1]} : vector<8x64xf32> to vector<8x32xf32>
    %65 = arith.mulf %64, %37 : vector<8x32xf32>
    %66 = vector.extract_strided_slice %55 {offsets = [0, 0], sizes = [8, 32], strides = [1, 1]} : vector<8x64xf32> to vector<8x32xf32>
    %67 = arith.mulf %66, %63 : vector<8x32xf32>
    %68 = arith.addf %65, %67 : vector<8x32xf32>
    %69 = math.tanh %68 : vector<8x32xf32>
    %70 = arith.mulf %61, %69 : vector<8x32xf32>
    %71 = arith.addi %5, %c1_i32 : i32
    %72 = arith.index_cast %71 : i32 to index
    %c0_25 = arith.constant 0 : index
    %c0_26 = arith.constant 0 : index
    %73 = vector.load %arg14[%72, %c0_25, %c0_26] : memref<16x8x32xf32, #tpu.memory_space<vmem>>, vector<1x8x32xf32>
    %74 = vector.shape_cast %73 : vector<1x8x32xf32> to vector<8x32xf32>
    %75 = vector.shape_cast %70 : vector<8x32xf32> to vector<1x8x32xf32>
    tpu.vector_store %arg14[%72, %c0_25, %c0_26], %75 {strides = array<i32>} : memref<16x8x32xf32, #tpu.memory_space<vmem>>, vector<1x8x32xf32>,
    %c2_i32 = arith.constant 2 : i32
    %76 = arith.index_cast %c2_i32 : i32 to index
    %c0_27 = arith.constant 0 : index
    %c0_28 = arith.constant 0 : index
    %77 = vector.load %arg13[%76, %c0_27, %c0_28] : memref<16x8x128xf32, #tpu.memory_space<vmem>>, vector<1x8x128xf32>
    %78 = vector.shape_cast %77 : vector<1x8x128xf32> to vector<8x128xf32>
    %cst_29 = arith.constant dense<0.000000e+00> : vector<8x128xf32>
    %79 = tpu.matmul %70, %1, %cst_29 {dimension_numbers = #tpu.dot_dimension_numbers<[1], [0], [0], [1], [0, 0, 1, 1], [], []>} : vector<8x32xf32>, vector<32x128xf32>, vector<8x128xf32> -> vector<8x128xf32>
    %80 = arith.addf %78, %79 : vector<8x128xf32>
    %81 = vector.extract_strided_slice %80 {offsets = [0, 0], sizes = [8, 64], strides = [1, 1]} : vector<8x128xf32> to vector<8x64xf32>
    %82 = arith.negf %81 : vector<8x64xf32>
    %83 = math.exp %82 : vector<8x64xf32>
    %cst_30 = arith.constant 1.000000e+00 : f32
    %84 = vector.broadcast %cst_30 : f32 to vector<8x64xf32>
    %85 = arith.addf %84, %83 : vector<8x64xf32>
    %86 = arith.divf %84, %85 : vector<8x64xf32>
    %87 = vector.extract_strided_slice %80 {offsets = [0, 96], sizes = [8, 32], strides = [1, 1]} : vector<8x128xf32> to vector<8x32xf32>
    %88 = arith.negf %87 : vector<8x32xf32>
    %89 = math.exp %88 : vector<8x32xf32>
    %cst_31 = arith.constant 1.000000e+00 : f32
    %90 = vector.broadcast %cst_31 : f32 to vector<8x32xf32>
    %91 = arith.addf %90, %89 : vector<8x32xf32>
    %92 = arith.divf %90, %91 : vector<8x32xf32>
    %93 = vector.extract_strided_slice %80 {offsets = [0, 64], sizes = [8, 32], strides = [1, 1]} : vector<8x128xf32> to vector<8x32xf32>
    %94 = math.tanh %93 : vector<8x32xf32>
    %95 = vector.extract_strided_slice %86 {offsets = [0, 32], sizes = [8, 32], strides = [1, 1]} : vector<8x64xf32> to vector<8x32xf32>
    %96 = arith.mulf %95, %68 : vector<8x32xf32>
    %97 = vector.extract_strided_slice %86 {offsets = [0, 0], sizes = [8, 32], strides = [1, 1]} : vector<8x64xf32> to vector<8x32xf32>
    %98 = arith.mulf %97, %94 : vector<8x32xf32>
    %99 = arith.addf %96, %98 : vector<8x32xf32>
    %100 = math.tanh %99 : vector<8x32xf32>
    %101 = arith.mulf %92, %100 : vector<8x32xf32>
    %102 = arith.addi %5, %c2_i32 : i32
    %103 = arith.index_cast %102 : i32 to index
    %c0_32 = arith.constant 0 : index
    %c0_33 = arith.constant 0 : index
    %104 = vector.load %arg14[%103, %c0_32, %c0_33] : memref<16x8x32xf32, #tpu.memory_space<vmem>>, vector<1x8x32xf32>
    %105 = vector.shape_cast %104 : vector<1x8x32xf32> to vector<8x32xf32>
    %106 = vector.shape_cast %101 : vector<8x32xf32> to vector<1x8x32xf32>
    tpu.vector_store %arg14[%103, %c0_32, %c0_33], %106 {strides = array<i32>} : memref<16x8x32xf32, #tpu.memory_space<vmem>>, vector<1x8x32xf32>,
    %c3_i32 = arith.constant 3 : i32
    %107 = arith.index_cast %c3_i32 : i32 to index
    %c0_34 = arith.constant 0 : index
    %c0_35 = arith.constant 0 : index
    %108 = vector.load %arg13[%107, %c0_34, %c0_35] : memref<16x8x128xf32, #tpu.memory_space<vmem>>, vector<1x8x128xf32>
    %109 = vector.shape_cast %108 : vector<1x8x128xf32> to vector<8x128xf32>
    %cst_36 = arith.constant dense<0.000000e+00> : vector<8x128xf32>
    %110 = tpu.matmul %101, %1, %cst_36 {dimension_numbers = #tpu.dot_dimension_numbers<[1], [0], [0], [1], [0, 0, 1, 1], [], []>} : vector<8x32xf32>, vector<32x128xf32>, vector<8x128xf32> -> vector<8x128xf32>
    %111 = arith.addf %109, %110 : vector<8x128xf32>
    %112 = vector.extract_strided_slice %111 {offsets = [0, 0], sizes = [8, 64], strides = [1, 1]} : vector<8x128xf32> to vector<8x64xf32>
    %113 = arith.negf %112 : vector<8x64xf32>
    %114 = math.exp %113 : vector<8x64xf32>
    %cst_37 = arith.constant 1.000000e+00 : f32
    %115 = vector.broadcast %cst_37 : f32 to vector<8x64xf32>
    %116 = arith.addf %115, %114 : vector<8x64xf32>
    %117 = arith.divf %115, %116 : vector<8x64xf32>
    %118 = vector.extract_strided_slice %111 {offsets = [0, 96], sizes = [8, 32], strides = [1, 1]} : vector<8x128xf32> to vector<8x32xf32>
    %119 = arith.negf %118 : vector<8x32xf32>
    %120 = math.exp %119 : vector<8x32xf32>
    %cst_38 = arith.constant 1.000000e+00 : f32
    %121 = vector.broadcast %cst_38 : f32 to vector<8x32xf32>
    %122 = arith.addf %121, %120 : vector<8x32xf32>
    %123 = arith.divf %121, %122 : vector<8x32xf32>
    %124 = vector.extract_strided_slice %111 {offsets = [0, 64], sizes = [8, 32], strides = [1, 1]} : vector<8x128xf32> to vector<8x32xf32>
    %125 = math.tanh %124 : vector<8x32xf32>
    %126 = vector.extract_strided_slice %117 {offsets = [0, 32], sizes = [8, 32], strides = [1, 1]} : vector<8x64xf32> to vector<8x32xf32>
    %127 = arith.mulf %126, %99 : vector<8x32xf32>
    %128 = vector.extract_strided_slice %117 {offsets = [0, 0], sizes = [8, 32], strides = [1, 1]} : vector<8x64xf32> to vector<8x32xf32>
    %129 = arith.mulf %128, %125 : vector<8x32xf32>
    %130 = arith.addf %127, %129 : vector<8x32xf32>
    %131 = math.tanh %130 : vector<8x32xf32>
    %132 = arith.mulf %123, %131 : vector<8x32xf32>
    %133 = arith.addi %5, %c3_i32 : i32
    %134 = arith.index_cast %133 : i32 to index
    %c0_39 = arith.constant 0 : index
    %c0_40 = arith.constant 0 : index
    %135 = vector.load %arg14[%134, %c0_39, %c0_40] : memref<16x8x32xf32, #tpu.memory_space<vmem>>, vector<1x8x32xf32>
    %136 = vector.shape_cast %135 : vector<1x8x32xf32> to vector<8x32xf32>
    %137 = vector.shape_cast %132 : vector<8x32xf32> to vector<1x8x32xf32>
    tpu.vector_store %arg14[%134, %c0_39, %c0_40], %137 {strides = array<i32>} : memref<16x8x32xf32, #tpu.memory_space<vmem>>, vector<1x8x32xf32>,
    %c4_i32 = arith.constant 4 : i32
    %138 = arith.index_cast %c4_i32 : i32 to index
    %c0_41 = arith.constant 0 : index
    %c0_42 = arith.constant 0 : index
    %139 = vector.load %arg13[%138, %c0_41, %c0_42] : memref<16x8x128xf32, #tpu.memory_space<vmem>>, vector<1x8x128xf32>
    %140 = vector.shape_cast %139 : vector<1x8x128xf32> to vector<8x128xf32>
    %cst_43 = arith.constant dense<0.000000e+00> : vector<8x128xf32>
    %141 = tpu.matmul %132, %1, %cst_43 {dimension_numbers = #tpu.dot_dimension_numbers<[1], [0], [0], [1], [0, 0, 1, 1], [], []>} : vector<8x32xf32>, vector<32x128xf32>, vector<8x128xf32> -> vector<8x128xf32>
    %142 = arith.addf %140, %141 : vector<8x128xf32>
    %143 = vector.extract_strided_slice %142 {offsets = [0, 0], sizes = [8, 64], strides = [1, 1]} : vector<8x128xf32> to vector<8x64xf32>
    %144 = arith.negf %143 : vector<8x64xf32>
    %145 = math.exp %144 : vector<8x64xf32>
    %cst_44 = arith.constant 1.000000e+00 : f32
    %146 = vector.broadcast %cst_44 : f32 to vector<8x64xf32>
    %147 = arith.addf %146, %145 : vector<8x64xf32>
    %148 = arith.divf %146, %147 : vector<8x64xf32>
    %149 = vector.extract_strided_slice %142 {offsets = [0, 96], sizes = [8, 32], strides = [1, 1]} : vector<8x128xf32> to vector<8x32xf32>
    %150 = arith.negf %149 : vector<8x32xf32>
    %151 = math.exp %150 : vector<8x32xf32>
    %cst_45 = arith.constant 1.000000e+00 : f32
    %152 = vector.broadcast %cst_45 : f32 to vector<8x32xf32>
    %153 = arith.addf %152, %151 : vector<8x32xf32>
    %154 = arith.divf %152, %153 : vector<8x32xf32>
    %155 = vector.extract_strided_slice %142 {offsets = [0, 64], sizes = [8, 32], strides = [1, 1]} : vector<8x128xf32> to vector<8x32xf32>
    %156 = math.tanh %155 : vector<8x32xf32>
    %157 = vector.extract_strided_slice %148 {offsets = [0, 32], sizes = [8, 32], strides = [1, 1]} : vector<8x64xf32> to vector<8x32xf32>
    %158 = arith.mulf %157, %130 : vector<8x32xf32>
    %159 = vector.extract_strided_slice %148 {offsets = [0, 0], sizes = [8, 32], strides = [1, 1]} : vector<8x64xf32> to vector<8x32xf32>
    %160 = arith.mulf %159, %156 : vector<8x32xf32>
    %161 = arith.addf %158, %160 : vector<8x32xf32>
    %162 = math.tanh %161 : vector<8x32xf32>
    %163 = arith.mulf %154, %162 : vector<8x32xf32>
    %164 = arith.addi %5, %c4_i32 : i32
    %165 = arith.index_cast %164 : i32 to index
    %c0_46 = arith.constant 0 : index
    %c0_47 = arith.constant 0 : index
    %166 = vector.load %arg14[%165, %c0_46, %c0_47] : memref<16x8x32xf32, #tpu.memory_space<vmem>>, vector<1x8x32xf32>
    %167 = vector.shape_cast %166 : vector<1x8x32xf32> to vector<8x32xf32>
    %168 = vector.shape_cast %163 : vector<8x32xf32> to vector<1x8x32xf32>
    tpu.vector_store %arg14[%165, %c0_46, %c0_47], %168 {strides = array<i32>} : memref<16x8x32xf32, #tpu.memory_space<vmem>>, vector<1x8x32xf32>,
    %c5_i32 = arith.constant 5 : i32
    %169 = arith.index_cast %c5_i32 : i32 to index
    %c0_48 = arith.constant 0 : index
    %c0_49 = arith.constant 0 : index
    %170 = vector.load %arg13[%169, %c0_48, %c0_49] : memref<16x8x128xf32, #tpu.memory_space<vmem>>, vector<1x8x128xf32>
    %171 = vector.shape_cast %170 : vector<1x8x128xf32> to vector<8x128xf32>
    %cst_50 = arith.constant dense<0.000000e+00> : vector<8x128xf32>
    %172 = tpu.matmul %163, %1, %cst_50 {dimension_numbers = #tpu.dot_dimension_numbers<[1], [0], [0], [1], [0, 0, 1, 1], [], []>} : vector<8x32xf32>, vector<32x128xf32>, vector<8x128xf32> -> vector<8x128xf32>
    %173 = arith.addf %171, %172 : vector<8x128xf32>
    %174 = vector.extract_strided_slice %173 {offsets = [0, 0], sizes = [8, 64], strides = [1, 1]} : vector<8x128xf32> to vector<8x64xf32>
    %175 = arith.negf %174 : vector<8x64xf32>
    %176 = math.exp %175 : vector<8x64xf32>
    %cst_51 = arith.constant 1.000000e+00 : f32
    %177 = vector.broadcast %cst_51 : f32 to vector<8x64xf32>
    %178 = arith.addf %177, %176 : vector<8x64xf32>
    %179 = arith.divf %177, %178 : vector<8x64xf32>
    %180 = vector.extract_strided_slice %173 {offsets = [0, 96], sizes = [8, 32], strides = [1, 1]} : vector<8x128xf32> to vector<8x32xf32>
    %181 = arith.negf %180 : vector<8x32xf32>
    %182 = math.exp %181 : vector<8x32xf32>
    %cst_52 = arith.constant 1.000000e+00 : f32
    %183 = vector.broadcast %cst_52 : f32 to vector<8x32xf32>
    %184 = arith.addf %183, %182 : vector<8x32xf32>
    %185 = arith.divf %183, %184 : vector<8x32xf32>
    %186 = vector.extract_strided_slice %173 {offsets = [0, 64], sizes = [8, 32], strides = [1, 1]} : vector<8x128xf32> to vector<8x32xf32>
    %187 = math.tanh %186 : vector<8x32xf32>
    %188 = vector.extract_strided_slice %179 {offsets = [0, 32], sizes = [8, 32], strides = [1, 1]} : vector<8x64xf32> to vector<8x32xf32>
    %189 = arith.mulf %188, %161 : vector<8x32xf32>
    %190 = vector.extract_strided_slice %179 {offsets = [0, 0], sizes = [8, 32], strides = [1, 1]} : vector<8x64xf32> to vector<8x32xf32>
    %191 = arith.mulf %190, %187 : vector<8x32xf32>
    %192 = arith.addf %189, %191 : vector<8x32xf32>
    %193 = math.tanh %192 : vector<8x32xf32>
    %194 = arith.mulf %185, %193 : vector<8x32xf32>
    %195 = arith.addi %5, %c5_i32 : i32
    %196 = arith.index_cast %195 : i32 to index
    %c0_53 = arith.constant 0 : index
    %c0_54 = arith.constant 0 : index
    %197 = vector.load %arg14[%196, %c0_53, %c0_54] : memref<16x8x32xf32, #tpu.memory_space<vmem>>, vector<1x8x32xf32>
    %198 = vector.shape_cast %197 : vector<1x8x32xf32> to vector<8x32xf32>
    %199 = vector.shape_cast %194 : vector<8x32xf32> to vector<1x8x32xf32>
    tpu.vector_store %arg14[%196, %c0_53, %c0_54], %199 {strides = array<i32>} : memref<16x8x32xf32, #tpu.memory_space<vmem>>, vector<1x8x32xf32>,
    %c6_i32 = arith.constant 6 : i32
    %200 = arith.index_cast %c6_i32 : i32 to index
    %c0_55 = arith.constant 0 : index
    %c0_56 = arith.constant 0 : index
    %201 = vector.load %arg13[%200, %c0_55, %c0_56] : memref<16x8x128xf32, #tpu.memory_space<vmem>>, vector<1x8x128xf32>
    %202 = vector.shape_cast %201 : vector<1x8x128xf32> to vector<8x128xf32>
    %cst_57 = arith.constant dense<0.000000e+00> : vector<8x128xf32>
    %203 = tpu.matmul %194, %1, %cst_57 {dimension_numbers = #tpu.dot_dimension_numbers<[1], [0], [0], [1], [0, 0, 1, 1], [], []>} : vector<8x32xf32>, vector<32x128xf32>, vector<8x128xf32> -> vector<8x128xf32>
    %204 = arith.addf %202, %203 : vector<8x128xf32>
    %205 = vector.extract_strided_slice %204 {offsets = [0, 0], sizes = [8, 64], strides = [1, 1]} : vector<8x128xf32> to vector<8x64xf32>
    %206 = arith.negf %205 : vector<8x64xf32>
    %207 = math.exp %206 : vector<8x64xf32>
    %cst_58 = arith.constant 1.000000e+00 : f32
    %208 = vector.broadcast %cst_58 : f32 to vector<8x64xf32>
    %209 = arith.addf %208, %207 : vector<8x64xf32>
    %210 = arith.divf %208, %209 : vector<8x64xf32>
    %211 = vector.extract_strided_slice %204 {offsets = [0, 96], sizes = [8, 32], strides = [1, 1]} : vector<8x128xf32> to vector<8x32xf32>
    %212 = arith.negf %211 : vector<8x32xf32>
    %213 = math.exp %212 : vector<8x32xf32>
    %cst_59 = arith.constant 1.000000e+00 : f32
    %214 = vector.broadcast %cst_59 : f32 to vector<8x32xf32>
    %215 = arith.addf %214, %213 : vector<8x32xf32>
    %216 = arith.divf %214, %215 : vector<8x32xf32>
    %217 = vector.extract_strided_slice %204 {offsets = [0, 64], sizes = [8, 32], strides = [1, 1]} : vector<8x128xf32> to vector<8x32xf32>
    %218 = math.tanh %217 : vector<8x32xf32>
    %219 = vector.extract_strided_slice %210 {offsets = [0, 32], sizes = [8, 32], strides = [1, 1]} : vector<8x64xf32> to vector<8x32xf32>
    %220 = arith.mulf %219, %192 : vector<8x32xf32>
    %221 = vector.extract_strided_slice %210 {offsets = [0, 0], sizes = [8, 32], strides = [1, 1]} : vector<8x64xf32> to vector<8x32xf32>
    %222 = arith.mulf %221, %218 : vector<8x32xf32>
    %223 = arith.addf %220, %222 : vector<8x32xf32>
    %224 = math.tanh %223 : vector<8x32xf32>
    %225 = arith.mulf %216, %224 : vector<8x32xf32>
    %226 = arith.addi %5, %c6_i32 : i32
    %227 = arith.index_cast %226 : i32 to index
    %c0_60 = arith.constant 0 : index
    %c0_61 = arith.constant 0 : index
    %228 = vector.load %arg14[%227, %c0_60, %c0_61] : memref<16x8x32xf32, #tpu.memory_space<vmem>>, vector<1x8x32xf32>
    %229 = vector.shape_cast %228 : vector<1x8x32xf32> to vector<8x32xf32>
    %230 = vector.shape_cast %225 : vector<8x32xf32> to vector<1x8x32xf32>
    tpu.vector_store %arg14[%227, %c0_60, %c0_61], %230 {strides = array<i32>} : memref<16x8x32xf32, #tpu.memory_space<vmem>>, vector<1x8x32xf32>,
    %c7_i32 = arith.constant 7 : i32
    %231 = arith.index_cast %c7_i32 : i32 to index
    %c0_62 = arith.constant 0 : index
    %c0_63 = arith.constant 0 : index
    %232 = vector.load %arg13[%231, %c0_62, %c0_63] : memref<16x8x128xf32, #tpu.memory_space<vmem>>, vector<1x8x128xf32>
    %233 = vector.shape_cast %232 : vector<1x8x128xf32> to vector<8x128xf32>
    %cst_64 = arith.constant dense<0.000000e+00> : vector<8x128xf32>
    %234 = tpu.matmul %225, %1, %cst_64 {dimension_numbers = #tpu.dot_dimension_numbers<[1], [0], [0], [1], [0, 0, 1, 1], [], []>} : vector<8x32xf32>, vector<32x128xf32>, vector<8x128xf32> -> vector<8x128xf32>
    %235 = arith.addf %233, %234 : vector<8x128xf32>
    %236 = vector.extract_strided_slice %235 {offsets = [0, 0], sizes = [8, 64], strides = [1, 1]} : vector<8x128xf32> to vector<8x64xf32>
    %237 = arith.negf %236 : vector<8x64xf32>
    %238 = math.exp %237 : vector<8x64xf32>
    %cst_65 = arith.constant 1.000000e+00 : f32
    %239 = vector.broadcast %cst_65 : f32 to vector<8x64xf32>
    %240 = arith.addf %239, %238 : vector<8x64xf32>
    %241 = arith.divf %239, %240 : vector<8x64xf32>
    %242 = vector.extract_strided_slice %235 {offsets = [0, 96], sizes = [8, 32], strides = [1, 1]} : vector<8x128xf32> to vector<8x32xf32>
    %243 = arith.negf %242 : vector<8x32xf32>
    %244 = math.exp %243 : vector<8x32xf32>
    %cst_66 = arith.constant 1.000000e+00 : f32
    %245 = vector.broadcast %cst_66 : f32 to vector<8x32xf32>
    %246 = arith.addf %245, %244 : vector<8x32xf32>
    %247 = arith.divf %245, %246 : vector<8x32xf32>
    %248 = vector.extract_strided_slice %235 {offsets = [0, 64], sizes = [8, 32], strides = [1, 1]} : vector<8x128xf32> to vector<8x32xf32>
    %249 = math.tanh %248 : vector<8x32xf32>
    %250 = vector.extract_strided_slice %241 {offsets = [0, 32], sizes = [8, 32], strides = [1, 1]} : vector<8x64xf32> to vector<8x32xf32>
    %251 = arith.mulf %250, %223 : vector<8x32xf32>
    %252 = vector.extract_strided_slice %241 {offsets = [0, 0], sizes = [8, 32], strides = [1, 1]} : vector<8x64xf32> to vector<8x32xf32>
    %253 = arith.mulf %252, %249 : vector<8x32xf32>
    %254 = arith.addf %251, %253 : vector<8x32xf32>
    %255 = math.tanh %254 : vector<8x32xf32>
    %256 = arith.mulf %247, %255 : vector<8x32xf32>
    %257 = arith.addi %5, %c7_i32 : i32
    %258 = arith.index_cast %257 : i32 to index
    %c0_67 = arith.constant 0 : index
    %c0_68 = arith.constant 0 : index
    %259 = vector.load %arg14[%258, %c0_67, %c0_68] : memref<16x8x32xf32, #tpu.memory_space<vmem>>, vector<1x8x32xf32>
    %260 = vector.shape_cast %259 : vector<1x8x32xf32> to vector<8x32xf32>
    %261 = vector.shape_cast %256 : vector<8x32xf32> to vector<1x8x32xf32>
    tpu.vector_store %arg14[%258, %c0_67, %c0_68], %261 {strides = array<i32>} : memref<16x8x32xf32, #tpu.memory_space<vmem>>, vector<1x8x32xf32>,
    %c8_i32 = arith.constant 8 : i32
    %262 = arith.index_cast %c8_i32 : i32 to index
    %c0_69 = arith.constant 0 : index
    %c0_70 = arith.constant 0 : index
    %263 = vector.load %arg13[%262, %c0_69, %c0_70] : memref<16x8x128xf32, #tpu.memory_space<vmem>>, vector<1x8x128xf32>
    %264 = vector.shape_cast %263 : vector<1x8x128xf32> to vector<8x128xf32>
    %cst_71 = arith.constant dense<0.000000e+00> : vector<8x128xf32>
    %265 = tpu.matmul %256, %1, %cst_71 {dimension_numbers = #tpu.dot_dimension_numbers<[1], [0], [0], [1], [0, 0, 1, 1], [], []>} : vector<8x32xf32>, vector<32x128xf32>, vector<8x128xf32> -> vector<8x128xf32>
    %266 = arith.addf %264, %265 : vector<8x128xf32>
    %267 = vector.extract_strided_slice %266 {offsets = [0, 0], sizes = [8, 64], strides = [1, 1]} : vector<8x128xf32> to vector<8x64xf32>
    %268 = arith.negf %267 : vector<8x64xf32>
    %269 = math.exp %268 : vector<8x64xf32>
    %cst_72 = arith.constant 1.000000e+00 : f32
    %270 = vector.broadcast %cst_72 : f32 to vector<8x64xf32>
    %271 = arith.addf %270, %269 : vector<8x64xf32>
    %272 = arith.divf %270, %271 : vector<8x64xf32>
    %273 = vector.extract_strided_slice %266 {offsets = [0, 96], sizes = [8, 32], strides = [1, 1]} : vector<8x128xf32> to vector<8x32xf32>
    %274 = arith.negf %273 : vector<8x32xf32>
    %275 = math.exp %274 : vector<8x32xf32>
    %cst_73 = arith.constant 1.000000e+00 : f32
    %276 = vector.broadcast %cst_73 : f32 to vector<8x32xf32>
    %277 = arith.addf %276, %275 : vector<8x32xf32>
    %278 = arith.divf %276, %277 : vector<8x32xf32>
    %279 = vector.extract_strided_slice %266 {offsets = [0, 64], sizes = [8, 32], strides = [1, 1]} : vector<8x128xf32> to vector<8x32xf32>
    %280 = math.tanh %279 : vector<8x32xf32>
    %281 = vector.extract_strided_slice %272 {offsets = [0, 32], sizes = [8, 32], strides = [1, 1]} : vector<8x64xf32> to vector<8x32xf32>
    %282 = arith.mulf %281, %254 : vector<8x32xf32>
    %283 = vector.extract_strided_slice %272 {offsets = [0, 0], sizes = [8, 32], strides = [1, 1]} : vector<8x64xf32> to vector<8x32xf32>
    %284 = arith.mulf %283, %280 : vector<8x32xf32>
    %285 = arith.addf %282, %284 : vector<8x32xf32>
    %286 = math.tanh %285 : vector<8x32xf32>
    %287 = arith.mulf %278, %286 : vector<8x32xf32>
    %288 = arith.addi %5, %c8_i32 : i32
    %289 = arith.index_cast %288 : i32 to index
    %c0_74 = arith.constant 0 : index
    %c0_75 = arith.constant 0 : index
    %290 = vector.load %arg14[%289, %c0_74, %c0_75] : memref<16x8x32xf32, #tpu.memory_space<vmem>>, vector<1x8x32xf32>
    %291 = vector.shape_cast %290 : vector<1x8x32xf32> to vector<8x32xf32>
    %292 = vector.shape_cast %287 : vector<8x32xf32> to vector<1x8x32xf32>
    tpu.vector_store %arg14[%289, %c0_74, %c0_75], %292 {strides = array<i32>} : memref<16x8x32xf32, #tpu.memory_space<vmem>>, vector<1x8x32xf32>,
    %c9_i32 = arith.constant 9 : i32
    %293 = arith.index_cast %c9_i32 : i32 to index
    %c0_76 = arith.constant 0 : index
    %c0_77 = arith.constant 0 : index
    %294 = vector.load %arg13[%293, %c0_76, %c0_77] : memref<16x8x128xf32, #tpu.memory_space<vmem>>, vector<1x8x128xf32>
    %295 = vector.shape_cast %294 : vector<1x8x128xf32> to vector<8x128xf32>
    %cst_78 = arith.constant dense<0.000000e+00> : vector<8x128xf32>
    %296 = tpu.matmul %287, %1, %cst_78 {dimension_numbers = #tpu.dot_dimension_numbers<[1], [0], [0], [1], [0, 0, 1, 1], [], []>} : vector<8x32xf32>, vector<32x128xf32>, vector<8x128xf32> -> vector<8x128xf32>
    %297 = arith.addf %295, %296 : vector<8x128xf32>
    %298 = vector.extract_strided_slice %297 {offsets = [0, 0], sizes = [8, 64], strides = [1, 1]} : vector<8x128xf32> to vector<8x64xf32>
    %299 = arith.negf %298 : vector<8x64xf32>
    %300 = math.exp %299 : vector<8x64xf32>
    %cst_79 = arith.constant 1.000000e+00 : f32
    %301 = vector.broadcast %cst_79 : f32 to vector<8x64xf32>
    %302 = arith.addf %301, %300 : vector<8x64xf32>
    %303 = arith.divf %301, %302 : vector<8x64xf32>
    %304 = vector.extract_strided_slice %297 {offsets = [0, 96], sizes = [8, 32], strides = [1, 1]} : vector<8x128xf32> to vector<8x32xf32>
    %305 = arith.negf %304 : vector<8x32xf32>
    %306 = math.exp %305 : vector<8x32xf32>
    %cst_80 = arith.constant 1.000000e+00 : f32
    %307 = vector.broadcast %cst_80 : f32 to vector<8x32xf32>
    %308 = arith.addf %307, %306 : vector<8x32xf32>
    %309 = arith.divf %307, %308 : vector<8x32xf32>
    %310 = vector.extract_strided_slice %297 {offsets = [0, 64], sizes = [8, 32], strides = [1, 1]} : vector<8x128xf32> to vector<8x32xf32>
    %311 = math.tanh %310 : vector<8x32xf32>
    %312 = vector.extract_strided_slice %303 {offsets = [0, 32], sizes = [8, 32], strides = [1, 1]} : vector<8x64xf32> to vector<8x32xf32>
    %313 = arith.mulf %312, %285 : vector<8x32xf32>
    %314 = vector.extract_strided_slice %303 {offsets = [0, 0], sizes = [8, 32], strides = [1, 1]} : vector<8x64xf32> to vector<8x32xf32>
    %315 = arith.mulf %314, %311 : vector<8x32xf32>
    %316 = arith.addf %313, %315 : vector<8x32xf32>
    %317 = math.tanh %316 : vector<8x32xf32>
    %318 = arith.mulf %309, %317 : vector<8x32xf32>
    %319 = arith.addi %5, %c9_i32 : i32
    %320 = arith.index_cast %319 : i32 to index
    %c0_81 = arith.constant 0 : index
    %c0_82 = arith.constant 0 : index
    %321 = vector.load %arg14[%320, %c0_81, %c0_82] : memref<16x8x32xf32, #tpu.memory_space<vmem>>, vector<1x8x32xf32>
    %322 = vector.shape_cast %321 : vector<1x8x32xf32> to vector<8x32xf32>
    %323 = vector.shape_cast %318 : vector<8x32xf32> to vector<1x8x32xf32>
    tpu.vector_store %arg14[%320, %c0_81, %c0_82], %323 {strides = array<i32>} : memref<16x8x32xf32, #tpu.memory_space<vmem>>, vector<1x8x32xf32>,
    %c10_i32 = arith.constant 10 : i32
    %324 = arith.index_cast %c10_i32 : i32 to index
    %c0_83 = arith.constant 0 : index
    %c0_84 = arith.constant 0 : index
    %325 = vector.load %arg13[%324, %c0_83, %c0_84] : memref<16x8x128xf32, #tpu.memory_space<vmem>>, vector<1x8x128xf32>
    %326 = vector.shape_cast %325 : vector<1x8x128xf32> to vector<8x128xf32>
    %cst_85 = arith.constant dense<0.000000e+00> : vector<8x128xf32>
    %327 = tpu.matmul %318, %1, %cst_85 {dimension_numbers = #tpu.dot_dimension_numbers<[1], [0], [0], [1], [0, 0, 1, 1], [], []>} : vector<8x32xf32>, vector<32x128xf32>, vector<8x128xf32> -> vector<8x128xf32>
    %328 = arith.addf %326, %327 : vector<8x128xf32>
    %329 = vector.extract_strided_slice %328 {offsets = [0, 0], sizes = [8, 64], strides = [1, 1]} : vector<8x128xf32> to vector<8x64xf32>
    %330 = arith.negf %329 : vector<8x64xf32>
    %331 = math.exp %330 : vector<8x64xf32>
    %cst_86 = arith.constant 1.000000e+00 : f32
    %332 = vector.broadcast %cst_86 : f32 to vector<8x64xf32>
    %333 = arith.addf %332, %331 : vector<8x64xf32>
    %334 = arith.divf %332, %333 : vector<8x64xf32>
    %335 = vector.extract_strided_slice %328 {offsets = [0, 96], sizes = [8, 32], strides = [1, 1]} : vector<8x128xf32> to vector<8x32xf32>
    %336 = arith.negf %335 : vector<8x32xf32>
    %337 = math.exp %336 : vector<8x32xf32>
    %cst_87 = arith.constant 1.000000e+00 : f32
    %338 = vector.broadcast %cst_87 : f32 to vector<8x32xf32>
    %339 = arith.addf %338, %337 : vector<8x32xf32>
    %340 = arith.divf %338, %339 : vector<8x32xf32>
    %341 = vector.extract_strided_slice %328 {offsets = [0, 64], sizes = [8, 32], strides = [1, 1]} : vector<8x128xf32> to vector<8x32xf32>
    %342 = math.tanh %341 : vector<8x32xf32>
    %343 = vector.extract_strided_slice %334 {offsets = [0, 32], sizes = [8, 32], strides = [1, 1]} : vector<8x64xf32> to vector<8x32xf32>
    %344 = arith.mulf %343, %316 : vector<8x32xf32>
    %345 = vector.extract_strided_slice %334 {offsets = [0, 0], sizes = [8, 32], strides = [1, 1]} : vector<8x64xf32> to vector<8x32xf32>
    %346 = arith.mulf %345, %342 : vector<8x32xf32>
    %347 = arith.addf %344, %346 : vector<8x32xf32>
    %348 = math.tanh %347 : vector<8x32xf32>
    %349 = arith.mulf %340, %348 : vector<8x32xf32>
    %350 = arith.addi %5, %c10_i32 : i32
    %351 = arith.index_cast %350 : i32 to index
    %c0_88 = arith.constant 0 : index
    %c0_89 = arith.constant 0 : index
    %352 = vector.load %arg14[%351, %c0_88, %c0_89] : memref<16x8x32xf32, #tpu.memory_space<vmem>>, vector<1x8x32xf32>
    %353 = vector.shape_cast %352 : vector<1x8x32xf32> to vector<8x32xf32>
    %354 = vector.shape_cast %349 : vector<8x32xf32> to vector<1x8x32xf32>
    tpu.vector_store %arg14[%351, %c0_88, %c0_89], %354 {strides = array<i32>} : memref<16x8x32xf32, #tpu.memory_space<vmem>>, vector<1x8x32xf32>,
    %c11_i32 = arith.constant 11 : i32
    %355 = arith.index_cast %c11_i32 : i32 to index
    %c0_90 = arith.constant 0 : index
    %c0_91 = arith.constant 0 : index
    %356 = vector.load %arg13[%355, %c0_90, %c0_91] : memref<16x8x128xf32, #tpu.memory_space<vmem>>, vector<1x8x128xf32>
    %357 = vector.shape_cast %356 : vector<1x8x128xf32> to vector<8x128xf32>
    %cst_92 = arith.constant dense<0.000000e+00> : vector<8x128xf32>
    %358 = tpu.matmul %349, %1, %cst_92 {dimension_numbers = #tpu.dot_dimension_numbers<[1], [0], [0], [1], [0, 0, 1, 1], [], []>} : vector<8x32xf32>, vector<32x128xf32>, vector<8x128xf32> -> vector<8x128xf32>
    %359 = arith.addf %357, %358 : vector<8x128xf32>
    %360 = vector.extract_strided_slice %359 {offsets = [0, 0], sizes = [8, 64], strides = [1, 1]} : vector<8x128xf32> to vector<8x64xf32>
    %361 = arith.negf %360 : vector<8x64xf32>
    %362 = math.exp %361 : vector<8x64xf32>
    %cst_93 = arith.constant 1.000000e+00 : f32
    %363 = vector.broadcast %cst_93 : f32 to vector<8x64xf32>
    %364 = arith.addf %363, %362 : vector<8x64xf32>
    %365 = arith.divf %363, %364 : vector<8x64xf32>
    %366 = vector.extract_strided_slice %359 {offsets = [0, 96], sizes = [8, 32], strides = [1, 1]} : vector<8x128xf32> to vector<8x32xf32>
    %367 = arith.negf %366 : vector<8x32xf32>
    %368 = math.exp %367 : vector<8x32xf32>
    %cst_94 = arith.constant 1.000000e+00 : f32
    %369 = vector.broadcast %cst_94 : f32 to vector<8x32xf32>
    %370 = arith.addf %369, %368 : vector<8x32xf32>
    %371 = arith.divf %369, %370 : vector<8x32xf32>
    %372 = vector.extract_strided_slice %359 {offsets = [0, 64], sizes = [8, 32], strides = [1, 1]} : vector<8x128xf32> to vector<8x32xf32>
    %373 = math.tanh %372 : vector<8x32xf32>
    %374 = vector.extract_strided_slice %365 {offsets = [0, 32], sizes = [8, 32], strides = [1, 1]} : vector<8x64xf32> to vector<8x32xf32>
    %375 = arith.mulf %374, %347 : vector<8x32xf32>
    %376 = vector.extract_strided_slice %365 {offsets = [0, 0], sizes = [8, 32], strides = [1, 1]} : vector<8x64xf32> to vector<8x32xf32>
    %377 = arith.mulf %376, %373 : vector<8x32xf32>
    %378 = arith.addf %375, %377 : vector<8x32xf32>
    %379 = math.tanh %378 : vector<8x32xf32>
    %380 = arith.mulf %371, %379 : vector<8x32xf32>
    %381 = arith.addi %5, %c11_i32 : i32
    %382 = arith.index_cast %381 : i32 to index
    %c0_95 = arith.constant 0 : index
    %c0_96 = arith.constant 0 : index
    %383 = vector.load %arg14[%382, %c0_95, %c0_96] : memref<16x8x32xf32, #tpu.memory_space<vmem>>, vector<1x8x32xf32>
    %384 = vector.shape_cast %383 : vector<1x8x32xf32> to vector<8x32xf32>
    %385 = vector.shape_cast %380 : vector<8x32xf32> to vector<1x8x32xf32>
    tpu.vector_store %arg14[%382, %c0_95, %c0_96], %385 {strides = array<i32>} : memref<16x8x32xf32, #tpu.memory_space<vmem>>, vector<1x8x32xf32>,
    %c12_i32 = arith.constant 12 : i32
    %386 = arith.index_cast %c12_i32 : i32 to index
    %c0_97 = arith.constant 0 : index
    %c0_98 = arith.constant 0 : index
    %387 = vector.load %arg13[%386, %c0_97, %c0_98] : memref<16x8x128xf32, #tpu.memory_space<vmem>>, vector<1x8x128xf32>
    %388 = vector.shape_cast %387 : vector<1x8x128xf32> to vector<8x128xf32>
    %cst_99 = arith.constant dense<0.000000e+00> : vector<8x128xf32>
    %389 = tpu.matmul %380, %1, %cst_99 {dimension_numbers = #tpu.dot_dimension_numbers<[1], [0], [0], [1], [0, 0, 1, 1], [], []>} : vector<8x32xf32>, vector<32x128xf32>, vector<8x128xf32> -> vector<8x128xf32>
    %390 = arith.addf %388, %389 : vector<8x128xf32>
    %391 = vector.extract_strided_slice %390 {offsets = [0, 0], sizes = [8, 64], strides = [1, 1]} : vector<8x128xf32> to vector<8x64xf32>
    %392 = arith.negf %391 : vector<8x64xf32>
    %393 = math.exp %392 : vector<8x64xf32>
    %cst_100 = arith.constant 1.000000e+00 : f32
    %394 = vector.broadcast %cst_100 : f32 to vector<8x64xf32>
    %395 = arith.addf %394, %393 : vector<8x64xf32>
    %396 = arith.divf %394, %395 : vector<8x64xf32>
    %397 = vector.extract_strided_slice %390 {offsets = [0, 96], sizes = [8, 32], strides = [1, 1]} : vector<8x128xf32> to vector<8x32xf32>
    %398 = arith.negf %397 : vector<8x32xf32>
    %399 = math.exp %398 : vector<8x32xf32>
    %cst_101 = arith.constant 1.000000e+00 : f32
    %400 = vector.broadcast %cst_101 : f32 to vector<8x32xf32>
    %401 = arith.addf %400, %399 : vector<8x32xf32>
    %402 = arith.divf %400, %401 : vector<8x32xf32>
    %403 = vector.extract_strided_slice %390 {offsets = [0, 64], sizes = [8, 32], strides = [1, 1]} : vector<8x128xf32> to vector<8x32xf32>
    %404 = math.tanh %403 : vector<8x32xf32>
    %405 = vector.extract_strided_slice %396 {offsets = [0, 32], sizes = [8, 32], strides = [1, 1]} : vector<8x64xf32> to vector<8x32xf32>
    %406 = arith.mulf %405, %378 : vector<8x32xf32>
    %407 = vector.extract_strided_slice %396 {offsets = [0, 0], sizes = [8, 32], strides = [1, 1]} : vector<8x64xf32> to vector<8x32xf32>
    %408 = arith.mulf %407, %404 : vector<8x32xf32>
    %409 = arith.addf %406, %408 : vector<8x32xf32>
    %410 = math.tanh %409 : vector<8x32xf32>
    %411 = arith.mulf %402, %410 : vector<8x32xf32>
    %412 = arith.addi %5, %c12_i32 : i32
    %413 = arith.index_cast %412 : i32 to index
    %c0_102 = arith.constant 0 : index
    %c0_103 = arith.constant 0 : index
    %414 = vector.load %arg14[%413, %c0_102, %c0_103] : memref<16x8x32xf32, #tpu.memory_space<vmem>>, vector<1x8x32xf32>
    %415 = vector.shape_cast %414 : vector<1x8x32xf32> to vector<8x32xf32>
    %416 = vector.shape_cast %411 : vector<8x32xf32> to vector<1x8x32xf32>
    tpu.vector_store %arg14[%413, %c0_102, %c0_103], %416 {strides = array<i32>} : memref<16x8x32xf32, #tpu.memory_space<vmem>>, vector<1x8x32xf32>,
    %c13_i32 = arith.constant 13 : i32
    %417 = arith.index_cast %c13_i32 : i32 to index
    %c0_104 = arith.constant 0 : index
    %c0_105 = arith.constant 0 : index
    %418 = vector.load %arg13[%417, %c0_104, %c0_105] : memref<16x8x128xf32, #tpu.memory_space<vmem>>, vector<1x8x128xf32>
    %419 = vector.shape_cast %418 : vector<1x8x128xf32> to vector<8x128xf32>
    %cst_106 = arith.constant dense<0.000000e+00> : vector<8x128xf32>
    %420 = tpu.matmul %411, %1, %cst_106 {dimension_numbers = #tpu.dot_dimension_numbers<[1], [0], [0], [1], [0, 0, 1, 1], [], []>} : vector<8x32xf32>, vector<32x128xf32>, vector<8x128xf32> -> vector<8x128xf32>
    %421 = arith.addf %419, %420 : vector<8x128xf32>
    %422 = vector.extract_strided_slice %421 {offsets = [0, 0], sizes = [8, 64], strides = [1, 1]} : vector<8x128xf32> to vector<8x64xf32>
    %423 = arith.negf %422 : vector<8x64xf32>
    %424 = math.exp %423 : vector<8x64xf32>
    %cst_107 = arith.constant 1.000000e+00 : f32
    %425 = vector.broadcast %cst_107 : f32 to vector<8x64xf32>
    %426 = arith.addf %425, %424 : vector<8x64xf32>
    %427 = arith.divf %425, %426 : vector<8x64xf32>
    %428 = vector.extract_strided_slice %421 {offsets = [0, 96], sizes = [8, 32], strides = [1, 1]} : vector<8x128xf32> to vector<8x32xf32>
    %429 = arith.negf %428 : vector<8x32xf32>
    %430 = math.exp %429 : vector<8x32xf32>
    %cst_108 = arith.constant 1.000000e+00 : f32
    %431 = vector.broadcast %cst_108 : f32 to vector<8x32xf32>
    %432 = arith.addf %431, %430 : vector<8x32xf32>
    %433 = arith.divf %431, %432 : vector<8x32xf32>
    %434 = vector.extract_strided_slice %421 {offsets = [0, 64], sizes = [8, 32], strides = [1, 1]} : vector<8x128xf32> to vector<8x32xf32>
    %435 = math.tanh %434 : vector<8x32xf32>
    %436 = vector.extract_strided_slice %427 {offsets = [0, 32], sizes = [8, 32], strides = [1, 1]} : vector<8x64xf32> to vector<8x32xf32>
    %437 = arith.mulf %436, %409 : vector<8x32xf32>
    %438 = vector.extract_strided_slice %427 {offsets = [0, 0], sizes = [8, 32], strides = [1, 1]} : vector<8x64xf32> to vector<8x32xf32>
    %439 = arith.mulf %438, %435 : vector<8x32xf32>
    %440 = arith.addf %437, %439 : vector<8x32xf32>
    %441 = math.tanh %440 : vector<8x32xf32>
    %442 = arith.mulf %433, %441 : vector<8x32xf32>
    %443 = arith.addi %5, %c13_i32 : i32
    %444 = arith.index_cast %443 : i32 to index
    %c0_109 = arith.constant 0 : index
    %c0_110 = arith.constant 0 : index
    %445 = vector.load %arg14[%444, %c0_109, %c0_110] : memref<16x8x32xf32, #tpu.memory_space<vmem>>, vector<1x8x32xf32>
    %446 = vector.shape_cast %445 : vector<1x8x32xf32> to vector<8x32xf32>
    %447 = vector.shape_cast %442 : vector<8x32xf32> to vector<1x8x32xf32>
    tpu.vector_store %arg14[%444, %c0_109, %c0_110], %447 {strides = array<i32>} : memref<16x8x32xf32, #tpu.memory_space<vmem>>, vector<1x8x32xf32>,
    %c14_i32 = arith.constant 14 : i32
    %448 = arith.index_cast %c14_i32 : i32 to index
    %c0_111 = arith.constant 0 : index
    %c0_112 = arith.constant 0 : index
    %449 = vector.load %arg13[%448, %c0_111, %c0_112] : memref<16x8x128xf32, #tpu.memory_space<vmem>>, vector<1x8x128xf32>
    %450 = vector.shape_cast %449 : vector<1x8x128xf32> to vector<8x128xf32>
    %cst_113 = arith.constant dense<0.000000e+00> : vector<8x128xf32>
    %451 = tpu.matmul %442, %1, %cst_113 {dimension_numbers = #tpu.dot_dimension_numbers<[1], [0], [0], [1], [0, 0, 1, 1], [], []>} : vector<8x32xf32>, vector<32x128xf32>, vector<8x128xf32> -> vector<8x128xf32>
    %452 = arith.addf %450, %451 : vector<8x128xf32>
    %453 = vector.extract_strided_slice %452 {offsets = [0, 0], sizes = [8, 64], strides = [1, 1]} : vector<8x128xf32> to vector<8x64xf32>
    %454 = arith.negf %453 : vector<8x64xf32>
    %455 = math.exp %454 : vector<8x64xf32>
    %cst_114 = arith.constant 1.000000e+00 : f32
    %456 = vector.broadcast %cst_114 : f32 to vector<8x64xf32>
    %457 = arith.addf %456, %455 : vector<8x64xf32>
    %458 = arith.divf %456, %457 : vector<8x64xf32>
    %459 = vector.extract_strided_slice %452 {offsets = [0, 96], sizes = [8, 32], strides = [1, 1]} : vector<8x128xf32> to vector<8x32xf32>
    %460 = arith.negf %459 : vector<8x32xf32>
    %461 = math.exp %460 : vector<8x32xf32>
    %cst_115 = arith.constant 1.000000e+00 : f32
    %462 = vector.broadcast %cst_115 : f32 to vector<8x32xf32>
    %463 = arith.addf %462, %461 : vector<8x32xf32>
    %464 = arith.divf %462, %463 : vector<8x32xf32>
    %465 = vector.extract_strided_slice %452 {offsets = [0, 64], sizes = [8, 32], strides = [1, 1]} : vector<8x128xf32> to vector<8x32xf32>
    %466 = math.tanh %465 : vector<8x32xf32>
    %467 = vector.extract_strided_slice %458 {offsets = [0, 32], sizes = [8, 32], strides = [1, 1]} : vector<8x64xf32> to vector<8x32xf32>
    %468 = arith.mulf %467, %440 : vector<8x32xf32>
    %469 = vector.extract_strided_slice %458 {offsets = [0, 0], sizes = [8, 32], strides = [1, 1]} : vector<8x64xf32> to vector<8x32xf32>
    %470 = arith.mulf %469, %466 : vector<8x32xf32>
    %471 = arith.addf %468, %470 : vector<8x32xf32>
    %472 = math.tanh %471 : vector<8x32xf32>
    %473 = arith.mulf %464, %472 : vector<8x32xf32>
    %474 = arith.addi %5, %c14_i32 : i32
    %475 = arith.index_cast %474 : i32 to index
    %c0_116 = arith.constant 0 : index
    %c0_117 = arith.constant 0 : index
    %476 = vector.load %arg14[%475, %c0_116, %c0_117] : memref<16x8x32xf32, #tpu.memory_space<vmem>>, vector<1x8x32xf32>
    %477 = vector.shape_cast %476 : vector<1x8x32xf32> to vector<8x32xf32>
    %478 = vector.shape_cast %473 : vector<8x32xf32> to vector<1x8x32xf32>
    tpu.vector_store %arg14[%475, %c0_116, %c0_117], %478 {strides = array<i32>} : memref<16x8x32xf32, #tpu.memory_space<vmem>>, vector<1x8x32xf32>,
    %c15_i32 = arith.constant 15 : i32
    %479 = arith.index_cast %c15_i32 : i32 to index
    %c0_118 = arith.constant 0 : index
    %c0_119 = arith.constant 0 : index
    %480 = vector.load %arg13[%479, %c0_118, %c0_119] : memref<16x8x128xf32, #tpu.memory_space<vmem>>, vector<1x8x128xf32>
    %481 = vector.shape_cast %480 : vector<1x8x128xf32> to vector<8x128xf32>
    %cst_120 = arith.constant dense<0.000000e+00> : vector<8x128xf32>
    %482 = tpu.matmul %473, %1, %cst_120 {dimension_numbers = #tpu.dot_dimension_numbers<[1], [0], [0], [1], [0, 0, 1, 1], [], []>} : vector<8x32xf32>, vector<32x128xf32>, vector<8x128xf32> -> vector<8x128xf32>
    %483 = arith.addf %481, %482 : vector<8x128xf32>
    %484 = vector.extract_strided_slice %483 {offsets = [0, 0], sizes = [8, 64], strides = [1, 1]} : vector<8x128xf32> to vector<8x64xf32>
    %485 = arith.negf %484 : vector<8x64xf32>
    %486 = math.exp %485 : vector<8x64xf32>
    %cst_121 = arith.constant 1.000000e+00 : f32
    %487 = vector.broadcast %cst_121 : f32 to vector<8x64xf32>
    %488 = arith.addf %487, %486 : vector<8x64xf32>
    %489 = arith.divf %487, %488 : vector<8x64xf32>
    %490 = vector.extract_strided_slice %483 {offsets = [0, 96], sizes = [8, 32], strides = [1, 1]} : vector<8x128xf32> to vector<8x32xf32>
    %491 = arith.negf %490 : vector<8x32xf32>
    %492 = math.exp %491 : vector<8x32xf32>
    %cst_122 = arith.constant 1.000000e+00 : f32
    %493 = vector.broadcast %cst_122 : f32 to vector<8x32xf32>
    %494 = arith.addf %493, %492 : vector<8x32xf32>
    %495 = arith.divf %493, %494 : vector<8x32xf32>
    %496 = vector.extract_strided_slice %483 {offsets = [0, 64], sizes = [8, 32], strides = [1, 1]} : vector<8x128xf32> to vector<8x32xf32>
    %497 = math.tanh %496 : vector<8x32xf32>
    %498 = vector.extract_strided_slice %489 {offsets = [0, 32], sizes = [8, 32], strides = [1, 1]} : vector<8x64xf32> to vector<8x32xf32>
    %499 = arith.mulf %498, %471 : vector<8x32xf32>
    %500 = vector.extract_strided_slice %489 {offsets = [0, 0], sizes = [8, 32], strides = [1, 1]} : vector<8x64xf32> to vector<8x32xf32>
    %501 = arith.mulf %500, %497 : vector<8x32xf32>
    %502 = arith.addf %499, %501 : vector<8x32xf32>
    %503 = math.tanh %502 : vector<8x32xf32>
    %504 = arith.mulf %495, %503 : vector<8x32xf32>
    %505 = arith.addi %5, %c15_i32 : i32
    %506 = arith.index_cast %505 : i32 to index
    %c0_123 = arith.constant 0 : index
    %c0_124 = arith.constant 0 : index
    %507 = vector.load %arg14[%506, %c0_123, %c0_124] : memref<16x8x32xf32, #tpu.memory_space<vmem>>, vector<1x8x32xf32>
    %508 = vector.shape_cast %507 : vector<1x8x32xf32> to vector<8x32xf32>
    %509 = vector.shape_cast %504 : vector<8x32xf32> to vector<1x8x32xf32>
    tpu.vector_store %arg14[%506, %c0_123, %c0_124], %509 {strides = array<i32>} : memref<16x8x32xf32, #tpu.memory_space<vmem>>, vector<1x8x32xf32>,
    %c16_i32_125 = arith.constant 16 : i32
    %c1_i32_126 = arith.constant 1 : i32
    %c0_127 = arith.constant 0 : index
    %c0_128 = arith.constant 0 : index
    %c0_129 = arith.constant 0 : index
    %510 = vector.load %arg14[%c0_127, %c0_128, %c0_129] : memref<16x8x32xf32, #tpu.memory_space<vmem>>, vector<16x8x32xf32>
    %511 = vector.shape_cast %510 : vector<16x8x32xf32> to vector<128x32xf32>
    %c0_130 = arith.constant 0 : index
    %c0_131 = arith.constant 0 : index
    %512 = vector.load %arg5[%c0_130, %c0_131] : memref<32x16xf32, #tpu.memory_space<vmem>>, vector<32x16xf32>
    %cst_132 = arith.constant dense<0.000000e+00> : vector<128x16xf32>
    %513 = tpu.matmul %511, %512, %cst_132 {dimension_numbers = #tpu.dot_dimension_numbers<[1], [0], [0], [1], [0, 0, 1, 1], [], []>} : vector<128x32xf32>, vector<32x16xf32>, vector<128x16xf32> -> vector<128x16xf32>
    %c0_133 = arith.constant 0 : index
    %c0_134 = arith.constant 0 : index
    %514 = vector.load %arg6[%c0_133, %c0_134] : memref<1x16xf32, #tpu.memory_space<vmem>>, vector<1x16xf32>
    %515 = vector.broadcast %514 : vector<1x16xf32> to vector<128x16xf32>
    %516 = arith.addf %513, %515 : vector<128x16xf32>
    %517 = math.tanh %516 : vector<128x16xf32>
    %c0_135 = arith.constant 0 : index
    %c0_136 = arith.constant 0 : index
    %518 = vector.load %arg7[%c0_135, %c0_136] : memref<16x4xf32, #tpu.memory_space<vmem>>, vector<16x4xf32>
    %cst_137 = arith.constant dense<0.000000e+00> : vector<128x4xf32>
    %519 = tpu.matmul %517, %518, %cst_137 {dimension_numbers = #tpu.dot_dimension_numbers<[1], [0], [0], [1], [0, 0, 1, 1], [], []>} : vector<128x16xf32>, vector<16x4xf32>, vector<128x4xf32> -> vector<128x4xf32>
    %c0_138 = arith.constant 0 : index
    %c0_139 = arith.constant 0 : index
    %520 = vector.load %arg8[%c0_138, %c0_139] : memref<1x4xf32, #tpu.memory_space<vmem>>, vector<1x4xf32>
    %521 = vector.broadcast %520 : vector<1x4xf32> to vector<128x4xf32>
    %522 = arith.addf %519, %521 : vector<128x4xf32>
    %523 = vector.shape_cast %522 : vector<128x4xf32> to vector<16x8x4xf32>
    %cst_140 = arith.constant dense<0xFF800000> : vector<8x4xf32>
    %524 = vector.multi_reduction <maximumf>, %523, %cst_140 [0] : vector<16x8x4xf32> to vector<8x4xf32>
    %525 = vector.shape_cast %524 : vector<8x4xf32> to vector<1x8x4xf32>
    %526 = vector.broadcast %525 : vector<1x8x4xf32> to vector<16x8x4xf32>
    %527 = arith.subf %523, %526 : vector<16x8x4xf32>
    %528 = math.exp %527 : vector<16x8x4xf32>
    %cst_141 = arith.constant dense<0.000000e+00> : vector<8x4xf32>
    %529 = vector.multi_reduction <add>, %528, %cst_141 [0] : vector<16x8x4xf32> to vector<8x4xf32>
    %530 = vector.shape_cast %529 : vector<8x4xf32> to vector<1x8x4xf32>
    %531 = tpu.reciprocal %530 {approx = true} : vector<1x8x4xf32> -> vector<1x8x4xf32>
    %532 = vector.broadcast %531 : vector<1x8x4xf32> to vector<16x8x4xf32>
    %533 = arith.mulf %528, %532 : vector<16x8x4xf32>
    %534 = vector.extract_strided_slice %533 {offsets = [0, 0, 0], sizes = [16, 8, 1], strides = [1, 1, 1]} : vector<16x8x4xf32> to vector<16x8x1xf32>
    %535 = vector.shape_cast %534 : vector<16x8x1xf32> to vector<16x8xf32>
    %536 = tpu.transpose %535, [1, 0] : vector<16x8xf32> -> vector<8x16xf32>
    %537 = vector.extract_strided_slice %533 {offsets = [0, 0, 1], sizes = [16, 8, 1], strides = [1, 1, 1]} : vector<16x8x4xf32> to vector<16x8x1xf32>
    %538 = vector.shape_cast %537 : vector<16x8x1xf32> to vector<16x8xf32>
    %539 = tpu.transpose %538, [1, 0] : vector<16x8xf32> -> vector<8x16xf32>
    %540 = vector.extract_strided_slice %533 {offsets = [0, 0, 2], sizes = [16, 8, 1], strides = [1, 1, 1]} : vector<16x8x4xf32> to vector<16x8x1xf32>
    %541 = vector.shape_cast %540 : vector<16x8x1xf32> to vector<16x8xf32>
    %542 = tpu.transpose %541, [1, 0] : vector<16x8xf32> -> vector<8x16xf32>
    %543 = vector.extract_strided_slice %533 {offsets = [0, 0, 3], sizes = [16, 8, 1], strides = [1, 1, 1]} : vector<16x8x4xf32> to vector<16x8x1xf32>
    %544 = vector.shape_cast %543 : vector<16x8x1xf32> to vector<16x8xf32>
    %545 = tpu.transpose %544, [1, 0] : vector<16x8xf32> -> vector<8x16xf32>
    %546 = tpu.concatenate %536, %539, %542, %545 in 1 : vector<8x16xf32>, vector<8x16xf32>, vector<8x16xf32>, vector<8x16xf32> -> vector<8x64xf32>
    %c0_142 = arith.constant 0 : index
    %c0_143 = arith.constant 0 : index
    %547 = vector.load %arg12[%c0_142, %c0_143] : memref<8x64xf32, #tpu.memory_space<vmem>>, vector<8x64xf32>
    tpu.vector_store %arg12[%c0_142, %c0_143], %546 {strides = array<i32>} : memref<8x64xf32, #tpu.memory_space<vmem>>, vector<8x64xf32>,
    %cst_144 = arith.constant dense<0.000000e+00> : vector<16x8xf32>
    %548 = vector.multi_reduction <add>, %533, %cst_144 [2] : vector<16x8x4xf32> to vector<16x8xf32>
    %549 = vector.shape_cast %548 : vector<16x8xf32> to vector<16x8x1xf32>
    %550 = vector.broadcast %549 : vector<16x8x1xf32> to vector<16x8x32xf32>
    %551 = arith.mulf %550, %510 : vector<16x8x32xf32>
    %cst_145 = arith.constant dense<0.000000e+00> : vector<8x32xf32>
    %552 = vector.multi_reduction <add>, %551, %cst_145 [0] : vector<16x8x32xf32> to vector<8x32xf32>
    %c0_146 = arith.constant 0 : index
    %c0_147 = arith.constant 0 : index
    %553 = vector.load %arg9[%c0_146, %c0_147] : memref<32x8xf32, #tpu.memory_space<vmem>>, vector<32x8xf32>
    %cst_148 = arith.constant dense<0.000000e+00> : vector<8x8xf32>
    %554 = tpu.matmul %552, %553, %cst_148 {dimension_numbers = #tpu.dot_dimension_numbers<[1], [0], [0], [1], [0, 0, 1, 1], [], []>} : vector<8x32xf32>, vector<32x8xf32>, vector<8x8xf32> -> vector<8x8xf32>
    %c0_149 = arith.constant 0 : index
    %c0_150 = arith.constant 0 : index
    %555 = vector.load %arg10[%c0_149, %c0_150] : memref<1x8xf32, #tpu.memory_space<vmem>>, vector<1x8xf32>
    %556 = vector.broadcast %555 : vector<1x8xf32> to vector<8x8xf32>
    %557 = arith.addf %554, %556 : vector<8x8xf32>
    %c0_151 = arith.constant 0 : index
    %c0_152 = arith.constant 0 : index
    %558 = vector.load %arg11[%c0_151, %c0_152] : memref<8x8xf32, #tpu.memory_space<vmem>>, vector<8x8xf32>
    tpu.vector_store %arg11[%c0_151, %c0_152], %557 {strides = array<i32>} : memref<8x8xf32, #tpu.memory_space<vmem>>, vector<8x8xf32>,
    return
  }
  func.func @transform_0(%arg0: i32) -> (i32, i32, i32) {
    %c0_i32 = arith.constant 0 : i32
    %c0_i32_0 = arith.constant 0 : i32
    %c0_i32_1 = arith.constant 0 : i32
    return %c0_i32, %arg0, %c0_i32_0 : i32, i32, i32
  }
  func.func @transform_1(%arg0: i32) -> (i32, i32) {
    %c0_i32 = arith.constant 0 : i32
    %c0_i32_0 = arith.constant 0 : i32
    %c0_i32_1 = arith.constant 0 : i32
    return %c0_i32, %c0_i32_0 : i32, i32
  }
  func.func @transform_2(%arg0: i32) -> (i32, i32) {
    %c0_i32 = arith.constant 0 : i32
    %c0_i32_0 = arith.constant 0 : i32
    %c0_i32_1 = arith.constant 0 : i32
    return %c0_i32, %c0_i32_0 : i32, i32
  }
  func.func @transform_3(%arg0: i32) -> (i32, i32) {
    %c0_i32 = arith.constant 0 : i32
    %c0_i32_0 = arith.constant 0 : i32
    %c0_i32_1 = arith.constant 0 : i32
    return %c0_i32, %c0_i32_0 : i32, i32
  }
  func.func @transform_4(%arg0: i32) -> (i32, i32) {
    %c0_i32 = arith.constant 0 : i32
    %c0_i32_0 = arith.constant 0 : i32
    %c0_i32_1 = arith.constant 0 : i32
    return %c0_i32, %c0_i32_0 : i32, i32
  }
  func.func @transform_5(%arg0: i32) -> (i32, i32) {
    %c0_i32 = arith.constant 0 : i32
    %c0_i32_0 = arith.constant 0 : i32
    %c0_i32_1 = arith.constant 0 : i32
    return %c0_i32, %c0_i32_0 : i32, i32
  }
  func.func @transform_6(%arg0: i32) -> (i32, i32) {
    %c0_i32 = arith.constant 0 : i32
    %c0_i32_0 = arith.constant 0 : i32
    %c0_i32_1 = arith.constant 0 : i32
    return %c0_i32, %c0_i32_0 : i32, i32
  }
  func.func @transform_7(%arg0: i32) -> (i32, i32) {
    %c0_i32 = arith.constant 0 : i32
    %c0_i32_0 = arith.constant 0 : i32
    %c0_i32_1 = arith.constant 0 : i32
    return %c0_i32, %c0_i32_0 : i32, i32
  }
  func.func @transform_8(%arg0: i32) -> (i32, i32) {
    %c0_i32 = arith.constant 0 : i32
    %c0_i32_0 = arith.constant 0 : i32
    %c0_i32_1 = arith.constant 0 : i32
    return %c0_i32, %c0_i32_0 : i32, i32
  }
  func.func @transform_9(%arg0: i32) -> (i32, i32) {
    %c0_i32 = arith.constant 0 : i32
    %c0_i32_0 = arith.constant 0 : i32
    %c0_i32_1 = arith.constant 0 : i32
    return %c0_i32, %c0_i32_0 : i32, i32
  }
  func.func @transform_10(%arg0: i32) -> (i32, i32) {
    %c0_i32 = arith.constant 0 : i32
    %c0_i32_0 = arith.constant 0 : i32
    return %arg0, %c0_i32 : i32, i32
  }
  func.func @transform_11(%arg0: i32) -> (i32, i32) {
    %c0_i32 = arith.constant 0 : i32
    %c0_i32_0 = arith.constant 0 : i32
    return %arg0, %c0_i32 : i32, i32
  }
}

</mosaic_0001>

<bundles_post_ra>
// kernel: tpu_custom_call.1
= control target key start
LH: loop header
LB: loop body
LE: loop exit
PB: predicated region body
PF: predicated region fallthrough
CT: control target
= control target key end

     0   :  { %17 = vsyncpa [#allocation5], 0  ;;  %s4338_s0 = inlined_call_operand.hbm [shape: f32[16,16,16], index: 0, kind: input, shape index: {}]   ;;  %s4339_s1 = inlined_call_operand.vmem [shape: f32[16,128], index: 1, kind: input, shape index: {}]   ;;  %s4340_s2 = inlined_call_operand.vmem [shape: f32[32,128], index: 2, kind: input, shape index: {}]   ;;  %s4341_s3 = inlined_call_operand.vmem [shape: f32[1,128], index: 3, kind: input, shape index: {}]   ;;  %s4342_s4 = inlined_call_operand.vmem [shape: f32[32,16], index: 4, kind: input, shape index: {}]   ;;  %s4343_s5 = inlined_call_operand.vmem [shape: f32[1,16], index: 5, kind: input, shape index: {}]   ;;  %s4344_s6 = inlined_call_operand.vmem [shape: f32[16,4], index: 6, kind: input, shape index: {}]   ;;  %s4345_s7 = inlined_call_operand.vmem [shape: f32[1,4], index: 7, kind: input, shape index: {}]   ;;  %s4346_s8 = inlined_call_operand.vmem [shape: f32[32,8], index: 8, kind: input, shape index: {}]   ;;  %s4347_s9 = inlined_call_operand.vmem [shape: f32[1,8], index: 9, kind: input, shape index: {}]   ;;  %s4348_s10 = inlined_call_operand.vmem [shape: f32[16,8], index: 10, kind: output, shape index: {0}]   ;;  %s4349_s11 = inlined_call_operand.hbm [shape: f32[16,64], index: 11, kind: output, shape index: {1}]  }
   0x1   :  { %19 = vsyncpa [#allocation5 + $0x1], 0 }
   0x2   :  { %20 = vsyncpa [#allocation6], 0 }
   0x3   :  { %22 = vsyncpa [#allocation6 + $0x1], 0  ;;  %s3351_s17 = smov 0   ;;  %s3353_s18 = smov 0  }
   0x4   :  { %s3355_s19 = smov 0   ;;  %s3357_s20 = smov 0  }
   0x5 LB: > { %4355 = sst [smem:[#allocation10_spill]] %s3265_s17  ;;  %s3372_s21 = sadd.s32 4294967295, %s3277_s20   ;;  %s3277_s20 = sphi %s3357_s20, %s4367_s20   ;;  %s3273_s19 = sphi %s3355_s19, %s4369_s19   ;;  %s3269_s18 = sphi %s3353_s18, %s4371_s18   ;;  %s3265_s17 = sphi %s3351_s17, %s4370_s17  }
   0x6   : > { %4356 = sst [smem:[#allocation11_spill]] %s3273_s19  ;;  %s2797_s22 = sadd.s32 4294967294, %s3277_s20  }
   0x7   : > { %s3376_s23 = sadd.s32 1, %s3277_s20   ;;  %s35_s24 = sadd.s32 1, %s3273_s19 }
   0x8   : > { %4357 = sst [smem:[#allocation12_spill]] %s3376_s23  ;;  %s32_s25 = ssub.s32 %s3277_s20, %s3376_s23 }
   0x9   : > { %p42_p0 = scmp.ne.s32.totalorder %s3273_s19, %s3269_s18  ;;  %p33_p1 = scmp.eq.s32.totalorder %s32_s25, 0 }
   0xa   : > { %p43_p2 = scmp.eq.s32.totalorder %s3277_s20, 0  ;;  %p48_p3 = scmp.ne.s32.totalorder %s3269_s18, %s3265_s17 }
   0xb   : > { %p49_p4 = scmp.eq.s32.totalorder %s3372_s21, 0  ;;  %p287_p7 = scmp.eq.s32.totalorder %s3372_s21, 1 }
   0xc   : > { %s3388_s26 = scalar_select %p33_p1, %s3273_s19, %s35_s24  }
   0xd   : > { %p3390_p5 = por %p43_p2, %p42_p0  ;;  %p3394_p6 = por %p49_p4, %p48_p3 }
   0xe   : > { %4358 = sst [smem:[#allocation13_spill]] %s3388_s26  ;;  %p293_p8 = scmp.eq.s32.totalorder %s2797_s22, 1 }
   0xf   : > { %p2799_p9 = scmp.ge.s32.totalorder %s3277_s20, 2  ;;  %p2908_p10 = scmp.lt.s32.totalorder %s3277_s20, 2 }
  0x10   : > { %p3401_p11 = por %p287_p7, %p42_p0  ;;  %p3405_p12 = por %p293_p8, %p48_p3 }
  0x11   : > { %s340_s12 = sand.u32 1, %s3273_s19   ;;  %s2801_s13 = sshll.u32 %s3277_s20, 3 }
  0x12   : > { %s4362_s30 = scalar_select %p3405_p12, 1, 0 }
  0x13   : > { %s2800_s14 = sshll.u32 %s340_s12, 7  ;;  %s348_s24 = scalar_lea.hbm %s4338_s0, %s2801_s13 }
  0x14   : > { %4363 = sst [smem:[#allocation14_spill]] %s4362_s30  ;;  %s349_s25 = sshll.u32 %s348_s24, 4  ;;  %s350_s25 = int_to_ptr.hbm [resolvable:$true] %s349_s25 }
  0x15   : > { %s344_s26 = scalar_lea.vmem [#allocation4], %s2800_s14  ;;  %p3416_p13 = pnand %p2908_p10, %p3390_p5 }
  0x16   : > { %s351_s22 = sshll.u32 %s344_s26, 4  ;;  %p2802_p0 = scmp.ge.s32.totalorder %s3277_s20, 1  ;;  %s352_s22 = int_to_ptr.vmem [resolvable:$true] %s351_s22 }
  0x17   : > { %s341_s30 = scalar_lea.sflag [#allocation5], %s340_s12  ;;  %s3181_s19 = sshra.s32 %s350_s25, 4  ;;  %s3182_s19 = int_to_ptr.hbm [resolvable:$true] %s3181_s19 }
  0x18   : > { %s3183_s17 = scalar_lea.hbm %s3182_s19, 128  ;;  %p3185_p2 = pneg %p3416_p13 }
  0x19   : > { %p3184_p1 = scmp.ne.s32.totalorder %s3182_s19, %s3183_s17  ;;  %s3188_s14 = scalar_lea.hbm %s4338_s0, 256 }
  0x1a   : > { %p3189_p5 = scmp.lt.s32.totalorder %s3182_s19, %s4338_s0  ;;  %p3190_p7 = scmp.lt.s32.totalorder %s3188_s14, %s3183_s17 }
  0x1b   : > { %p3186_p3 = pnand %p3185_p2, %p3184_p1 }
  0x1c   : > { %p3191_p8 = por %p3190_p7, %p3189_p5 }
  0x1d   : > { %p3187_p4 = pneg %p3186_p3 }
  0x1f   : > { %p3192_p10 = pnand %p3191_p8, %p3187_p4 }
  0x21   : > { %3195 = shalt.err (!%p3192_p10)
}
  0x22   : > { %s3279_s12 = smov 256   ;;  %s3280_s16 = smov 128  }
  0x23   : > { %s3281_s24 = smov 8   ;;  %p359_p1 = scmp.lt.s32.totalorder %s3277_s20, 3 }
  0x24   : > { %2903 = dma.hbm_to_vmem [thread:$0]  (!%p3416_p13), %s350_s25, 2048, %s352_s22, %s341_s30, %s3279_s12, %s3280_s16, %s3281_s24  }
  0x25   : > { %p360_p2 = pnand %p2802_p0, %p359_p1 }
  0x26   : > { %s3435_s13 = sand.u32 (!%p360_p2), 1, %s3269_s18  }
  0x27   : > { %363 = sbr.rel (%p360_p2) target bundleno = 10345 (0x2869), region = 60  ;;  %s2803_s17 = sshll.u32 (!%p360_p2), %s3435_s13, 7 }
  0x28   : > { %s366_s19 = scalar_lea.sflag (!%p360_p2), [#allocation5], %s3435_s13  ;;  %s3439_s26 = scalar_lea.vmem (!%p360_p2), [#allocation4], %s2803_s17 }
  0x2c   : > { %3256 = dma.done.wait (%p3394_p6), %s366_s19, 2048  }
  0x2d   : > { %3258 = vsyncadd (%p3394_p6), %s366_s19, 4294965248  ;;  %v3448_v0 = vld [vmem:[%s4340_s2 + $0x18] sm:$0xff]  ;;  %v418_v1 = vld [vmem:[%s4339_s1 + $0x8] sm:$0xff]  ;;  %vm443_vm0 = vcmask 130048   ;;  %v3282_v7 = vmov 0.0   ;;  %s3283_s30 = smov 64  }
  0x2e   : > { %v3456_v2 = vld [vmem:[%s4340_s2 + $0x10] sm:$0xff]  ;;  %590 = vmatpush.msra.mxu1 %v3448_v0  ;;  %506 = vmatpush.msra.mxu0 %v418_v1  ;;  %v417_v3 = vld [vmem:[%s4339_s1] sm:$0xff]  ;;  %v3466_v5 = vld [vmem:[%s4340_s2 + $0x8] sm:$0xff]  ;;  %s3284_s25 = smov 32   ;;  %vm574_vm5 = vcmask 261120   ;;  %s3289_s22 = smov 16  }
  0x2f   : > { %v424_v4 = vld [vmem:[%s3439_s26] sm:$0xff]  ;;  %861 = vmatpush.msra.mxu2 %v3448_v0  ;;  %929 = vmatpush.msra.mxu3 %v3448_v0  ;;  %v425_v33 = vld [vmem:[%s3439_s26 + $0x8] sm:$0xff]  ;;  %v426_v61 = vld [vmem:[%s3439_s26 + $0x10] sm:$0xff]  ;;  %p413_p6 = scmp.lt.s32.totalorder %s3372_s21, 1  ;;  %s3290_s24 = smov 48  }
  0x30   : > { %591 = vmatpush.msra.mxu1 %v3456_v2  ;;  %507 = vmatpush.msra.mxu0 %v417_v3  ;;  %v3475_v6 = vld [vmem:[%s4340_s2] sm:$0xff]  ;;  %v427_v62 = vld [vmem:[%s3439_s26 + $0x18] sm:$0xff]  ;;  %v429_v1 = vld [vmem:[%s3439_s26 + $0x28] sm:$0xff]  ;;  %s2887_s17 = sshll.u32 %s3372_s21, 3 }
  0x31   : > { %2806 = vmatmul.msk.f32.vlgmr.msra.gmra.mxu0 %vm443_vm0, %v424_v4  ;;  %862 = vmatpush.msra.mxu2 %v3456_v2  ;;  %v3508_v8 = vld [vmem:[%s4341_s3] ss:$0 sm:$0xff]  ;;  %s414_s14 = scalar_select %p413_p6, %s3372_s21, 1 }
  0x32   : > { %592 = vmatpush.msra.mxu1 %v3466_v5  ;;  %725 = vmatpush.msrb.mxu0 %v3448_v0  ;;  %v428_v63 = vld [vmem:[%s3439_s26 + $0x20] sm:$0xff]  ;;  %s2685_s21 = scalar_lea.sflag [#allocation6], %s3435_s13 }
  0x33   : > { %863 = vmatpush.msra.mxu2 %v3466_v5  ;;  %930 = vmatpush.msra.mxu3 %v3456_v2  ;;  %s2805_s27 = sshll.u32 %s414_s14, 3 }
  0x34   : > { %593 = vmatpush.msra.mxu1 %v3475_v6  ;;  %726 = vmatpush.msrb.mxu0 %v3456_v2  ;;  %s416_s16 = scalar_lea.vmem %s4348_s10, %s2805_s27 }
  0x35   : > { %594 = vmatmul.f32.vlgmr.msra.gmra.mxu1 %v3282_v7  ;;  %864 = vmatpush.msra.mxu2 %v3475_v6  ;;  %v430_v7 = vld [vmem:[%s3439_s26 + $0x30] sm:$0xff] }
  0x36   : > { %657 = vmatpush.msrb.mxu1 %v3448_v0  ;;  %727 = vmatpush.msrb.mxu0 %v3466_v5 }
  0x37   : > { %931 = vmatpush.msra.mxu3 %v3466_v5  ;;  %1065 = vmatpush.msrb.mxu2 %v3448_v0 }
  0x38   : > { %658 = vmatpush.msrb.mxu1 %v3456_v2  ;;  %728 = vmatpush.msrb.mxu0 %v3475_v6 }
  0x39   : > { %932 = vmatpush.msra.mxu3 %v3475_v6  ;;  %1066 = vmatpush.msrb.mxu2 %v3456_v2 }
  0x3a   : > { %659 = vmatpush.msrb.mxu1 %v3466_v5  ;;  %2807 = vmatmul.msk.f32.gmra.mxu0 %vm443_vm0, %v425_v33 }
  0x3b   : > { %1133 = vmatpush.msrb.mxu3 %v3448_v0  ;;  %1067 = vmatpush.msrb.mxu2 %v3466_v5 }
  0x3c   : > { %660 = vmatpush.msrb.mxu1 %v3475_v6 }
  0x3d   : > { %1134 = vmatpush.msrb.mxu3 %v3456_v2  ;;  %1068 = vmatpush.msrb.mxu2 %v3475_v6 }
  0x3e   : > { %793 = vmatpush.msra.mxu1 %v3448_v0 }
  0x3f   : > { %1135 = vmatpush.msrb.mxu3 %v3466_v5 }
  0x40   : > { %794 = vmatpush.msra.mxu1 %v3456_v2 }
  0x41   : > { %1136 = vmatpush.msrb.mxu3 %v3475_v6 }
  0x42   : > { %795 = vmatpush.msra.mxu1 %v3466_v5  ;;  %2808 = vmatmul.msk.f32.gmra.mxu0 %vm443_vm0, %v426_v61 }
  0x44   : > { %796 = vmatpush.msra.mxu1 %v3475_v6 }
  0x4a   : > { %2809 = vmatmul.msk.f32.gmra.mxu0 %vm443_vm0, %v427_v62 }
  0x52   : > { %2810 = vmatmul.msk.f32.gmra.mxu0 %vm443_vm0, %v428_v63 }
  0x5a   : > { %2811 = vmatmul.msk.f32.gmra.mxu0 %vm443_vm0, %v429_v1 }
  0x62   : > { %2812 = vmatmul.msk.f32.gmra.mxu0 %vm443_vm0, %v430_v7 }
  0xae   : > { %v509_v9 = vpop.f32.mrf.mxu0 }
  0xaf   : > { %v510_v10 = vadd.f32 %v3508_v8, %v509_v9  ;;  %v431_v9 = vld [vmem:[%s3439_s26 + $0x38] sm:$0xff] }
  0xb0   : > { %2813 = vmatmul.msk.f32.gmra.mxu0 %vm443_vm0, %v431_v9 }
  0xb2   : > { %v595_v11 = vpop.f32.mrf.mxu1 }
  0xb3   : > { %v598_v12 = vadd.f32 %v595_v11, %v510_v10  ;;  %v432_v10 = vld [vmem:[%s3439_s26 + $0x40] sm:$0xff]  ;;  %v433_v11 = vld [vmem:[%s3439_s26 + $0x48] sm:$0xff] }
  0xb5   : > { %2970 = vtanh.f32 %v598_v12  ;;  %v2822_v14 = vmul.f32 -1.442695, %v598_v12  ;;  %v434_v12 = vld [vmem:[%s3439_s26 + $0x50] sm:$0xff] }
  0xb7   : > { %2972 = vpow2.f32 %v2822_v14  ;;  %v512_v37 = vpop.f32.mrf.mxu0  ;;  %v436_v14 = vld [vmem:[%s3439_s26 + $0x60] sm:$0xff] }
  0xb8   : > { %v513_v38 = vadd.f32 %v3508_v8, %v512_v37  ;;  %2814 = vmatmul.msk.f32.gmra.mxu0 %vm443_vm0, %v432_v10 }
  0xbb   : > { %v2971_v13 = vpop.eup %2970 }
  0xbc   : > { %621 = vrot.lane.b32.xlu0 %v2971_v13, %s3283_s30  ;;  %v435_v13 = vld [vmem:[%s3439_s26 + $0x58] sm:$0xff] }
  0xbd   : > { %v2973_v15 = vpop.eup %2972 }
  0xbe   : > { %v602_v16 = vadd.f32 1.0, %v2973_v15  ;;  %v437_v15 = vld [vmem:[%s3439_s26 + $0x68] sm:$0xff] }
  0xc0   : > { %2974 = vrcp.f32 %v602_v16  ;;  %v614_v22 = vand.u32 2147483648, %v602_v16  ;;  %vm608_vm2 = vweird.f32 %v602_v16  ;;  %v612_v23 = vand.u32 2147483647, %v602_v16  ;;  %2815 = vmatmul.msk.f32.gmra.mxu0 %vm443_vm0, %v433_v11 }
  0xc2   : > { %v615_v25 = vor.u32 1.1754944e-38, %v614_v22  ;;  %vm613_vm4 = vcmp.eq.f32.partialorder %v612_v23, 8.507059e+37 }
  0xc6   : > { %v2975_v17 = vpop.eup %2974 }
  0xc7   : > { %v604_v18 = vmul.f32 %v2975_v17, %v602_v16  ;;  %vm609_vm1 = vweird.f32 %v2975_v17  ;;  %v438_v16 = vld [vmem:[%s3439_s26 + $0x70] sm:$0xff] }
  0xc8   : > { %vm610_vm3 = vmor %vm608_vm2, %vm609_vm1  ;;  %2816 = vmatmul.msk.f32.gmra.mxu0 %vm443_vm0, %v434_v12 }
  0xc9   : > { %v605_v19 = vsub.f32 1.0, %v604_v18  ;;  %v515_v18 = vpop.f32.mrf.mxu0 }
  0xca   : > { %v516_v33 = vadd.f32 %v3508_v8, %v515_v18 }
  0xcb   : > { %v606_v20 = vmul.f32 %v2975_v17, %v605_v19 }
  0xcd   : > { %v607_v21 = vadd.f32 %v2975_v17, %v606_v20 }
  0xcf   : > { %v611_v24 = vsel %vm610_vm3, %v2975_v17, %v607_v21  ;;  %v439_v17 = vld [vmem:[%s3439_s26 + $0x78] sm:$0xff]  ;;  %s2698_s26 = scalar_lea.hbm %s4349_s11, %s2887_s17 }
  0xd0   : > { %v616_v27 = vsel %vm613_vm4, %v615_v25, %v611_v24  ;;  %2817 = vmatmul.msk.f32.gmra.mxu0 %vm443_vm0, %v435_v13  ;;  %s2702_s27 = sshll.u32 %s2698_s26, 4  ;;  %s2703_s27 = int_to_ptr.hbm [resolvable:$true] %s2702_s27 }
  0xd1   : > { %v619_v29 = vmul.f32 0.0, %v616_v27  ;;  %v518_v19 = vpop.f32.mrf.mxu0 }
  0xd8   : > { %2818 = vmatmul.msk.f32.gmra.mxu0 %vm443_vm0, %v436_v14 }
  0xd9   : > { %v3561_v21 = vpop.f32.mrf.mxu0 }
  0xe0   : > { %2819 = vmatmul.msk.f32.gmra.mxu0 %vm443_vm0, %v437_v15 }
  0xe1   : > { %v3563_v22 = vpop.f32.mrf.mxu0 }
  0xe8   : > { %2820 = vmatmul.msk.f32.gmra.mxu0 %vm443_vm0, %v438_v16 }
  0xe9   : > { %v3565_v23 = vpop.f32.mrf.mxu0 }
  0xf0   : > { %2821 = vmatmul.msk.f32.gmra.mxu0 %vm443_vm0, %v439_v17 }
 0x12d   : > { %v3567_v24 = vpop.f32.mrf.mxu0 }
 0x12e   : > { %v622_v26 = vpop.permute.xlu0 %621 }
 0x12f   : > { %v624_v28 = vmul.f32 %v622_v26, %v616_v27 }
 0x131   : > { %626 = vrot.lane.b32.xlu0 %v624_v28, %s3284_s25 }
 0x135   : > { %v3569_v25 = vpop.f32.mrf.mxu0 }
 0x13d   : > { %v3571_v26 = vpop.f32.mrf.mxu0 }
 0x1a3   : > { %v627_v30 = vpop.permute.xlu0 %626 }
 0x1a4   : > { %v629_v31 = vadd.f32 %v627_v30, %v619_v29 }
 0x1a6   : > { %2976 = vtanh.f32 %v629_v31 }
 0x1ac   : > { %v2977_v32 = vpop.eup %2976 }
 0x1ad   : > { %632 = vrot.lane.b32.xlu1 %v2977_v32, %s3283_s30 }
 0x21f   : > { %v633_v34 = vpop.permute.xlu1 %632 }
 0x220   : > { %v635_v35 = vmul.f32 %v633_v34, %v616_v27  ;;  %v3573_v27 = vpop.f32.mrf.mxu0 }
 0x222   : > { %637 = vrot.lane.b32.xlu1 %v635_v35, %s3284_s25 }
 0x228   : > { %v3575_v28 = vpop.f32.mrf.mxu0 }
 0x230   : > { %v3577_v29 = vpop.f32.mrf.mxu0 }
 0x238   : > { %v3579_v30 = vpop.f32.mrf.mxu0 }
 0x294   : > { %v638_v36 = vpop.permute.xlu1 %637 }
 0x295   : > { %640 = vst.msk [vmem:[#allocation3] sm:$0xff] %vm574_vm5, %v638_v36  ;;  %2823 = vmatmul.msk.f32.vlgmr.msrb.gmra.mxu1 %vm574_vm5, %v638_v36 }
 0x296   : > { %997 = vmatpush.msrb.mxu1 %v3448_v0 }
 0x298   : > { %998 = vmatpush.msrb.mxu1 %v3456_v2 }
 0x29a   : > { %999 = vmatpush.msrb.mxu1 %v3466_v5 }
 0x29c   : > { %1000 = vmatpush.msrb.mxu1 %v3475_v6 }
 0x312   : > { %v662_v39 = vpop.f32.mrf.mxu1 }
 0x313   : > { %v665_v40 = vadd.f32 %v662_v39, %v513_v38 }
 0x315   : > { %2978 = vtanh.f32 %v665_v40  ;;  %v2824_v42 = vmul.f32 -1.442695, %v665_v40 }
 0x317   : > { %2980 = vpow2.f32 %v2824_v42 }
 0x31b   : > { %v2979_v41 = vpop.eup %2978 }
 0x31c   : > { %688 = vrot.lane.b32.xlu2 %v2979_v41, %s3283_s30 }
 0x31d   : > { %v2981_v43 = vpop.eup %2980 }
 0x31e   : > { %v669_v44 = vadd.f32 1.0, %v2981_v43 }
 0x320   : > { %2982 = vrcp.f32 %v669_v44  ;;  %v681_v50 = vand.u32 2147483648, %v669_v44  ;;  %vm675_vm7 = vweird.f32 %v669_v44  ;;  %v679_v51 = vand.u32 2147483647, %v669_v44 }
 0x322   : > { %v682_v53 = vor.u32 1.1754944e-38, %v681_v50  ;;  %vm680_vm9 = vcmp.eq.f32.partialorder %v679_v51, 8.507059e+37 }
 0x326   : > { %v2983_v45 = vpop.eup %2982 }
 0x327   : > { %v671_v46 = vmul.f32 %v2983_v45, %v669_v44  ;;  %vm676_vm6 = vweird.f32 %v2983_v45 }
 0x328   : > { %vm677_vm8 = vmor %vm675_vm7, %vm676_vm6 }
 0x329   : > { %v672_v47 = vsub.f32 1.0, %v671_v46 }
 0x32b   : > { %v673_v48 = vmul.f32 %v2983_v45, %v672_v47 }
 0x32d   : > { %v674_v49 = vadd.f32 %v2983_v45, %v673_v48 }
 0x32f   : > { %v678_v52 = vsel %vm677_vm8, %v2983_v45, %v674_v49 }
 0x330   : > { %v683_v55 = vsel %vm680_vm9, %v682_v53, %v678_v52 }
 0x331   : > { %v686_v57 = vmul.f32 %v683_v55, %v629_v31  ;;  %v3581_v31 = vpop.f32.mrf.mxu0 }
 0x339   : > { %v3583_v32 = vpop.f32.mrf.mxu0 }
 0x376   : > { %v689_v54 = vpop.permute.xlu2 %688 }
 0x377   : > { %v691_v56 = vmul.f32 %v689_v54, %v683_v55 }
 0x379   : > { %693 = vrot.lane.b32.xlu2 %v691_v56, %s3284_s25 }
 0x3d3   : > { %v694_v58 = vpop.permute.xlu2 %693 }
 0x3d4   : > { %v3526_v59 = vadd.f32 %v694_v58, %v686_v57 }
 0x3d6   : > { %2984 = vtanh.f32 %v3526_v59 }
 0x3dc   : > { %v2985_v60 = vpop.eup %2984 }
 0x3dd   : > { %699 = vrot.lane.b32.xlu0 %v2985_v60, %s3283_s30 }
 0x44f   : > { %v700_v3 = vpop.permute.xlu0 %699 }
 0x450   : > { %v702_v4 = vmul.f32 %v700_v3, %v683_v55 }
 0x452   : > { %704 = vrot.lane.b32.xlu1 %v702_v4, %s3284_s25 }
 0x4c4   : > { %v705_v20 = vpop.permute.xlu1 %704 }
 0x4c5   : > { %708 = vst.msk [vmem:[#allocation3 + $0x8] sm:$0xff] %vm574_vm5, %v705_v20  ;;  %2825 = vmatmul.msk.f32.vlgmr.msrb.gmra.mxu0 %vm574_vm5, %v705_v20 }
 0x542   : > { %v730_v34 = vpop.f32.mrf.mxu0 }
 0x543   : > { %v733_v35 = vadd.f32 %v730_v34, %v516_v33 }
 0x545   : > { %2986 = vtanh.f32 %v733_v35  ;;  %v2826_v37 = vmul.f32 -1.442695, %v733_v35 }
 0x547   : > { %2988 = vpow2.f32 %v2826_v37 }
 0x54b   : > { %v2987_v36 = vpop.eup %2986 }
 0x54c   : > { %756 = vrot.lane.b32.xlu2 %v2987_v36, %s3283_s30 }
 0x54d   : > { %v2989_v38 = vpop.eup %2988 }
 0x54e   : > { %v737_v39 = vadd.f32 1.0, %v2989_v38  ;;  %v522_v38 = vadd.f32 %v3508_v8, %v3561_v21 }
 0x550   : > { %2990 = vrcp.f32 %v737_v39  ;;  %v749_v45 = vand.u32 2147483648, %v737_v39  ;;  %vm743_vm11 = vweird.f32 %v737_v39  ;;  %v747_v46 = vand.u32 2147483647, %v737_v39 }
 0x552   : > { %v750_v48 = vor.u32 1.1754944e-38, %v749_v45  ;;  %vm748_vm13 = vcmp.eq.f32.partialorder %v747_v46, 8.507059e+37 }
 0x556   : > { %v2991_v40 = vpop.eup %2990 }
 0x557   : > { %v739_v41 = vmul.f32 %v2991_v40, %v737_v39  ;;  %vm744_vm10 = vweird.f32 %v2991_v40 }
 0x558   : > { %vm745_vm12 = vmor %vm743_vm11, %vm744_vm10 }
 0x559   : > { %v740_v42 = vsub.f32 1.0, %v739_v41 }
 0x55b   : > { %v741_v43 = vmul.f32 %v2991_v40, %v740_v42 }
 0x55d   : > { %v742_v44 = vadd.f32 %v2991_v40, %v741_v43 }
 0x55f   : > { %v746_v47 = vsel %vm745_vm12, %v2991_v40, %v742_v44 }
 0x560   : > { %v751_v50 = vsel %vm748_vm13, %v750_v48, %v746_v47 }
 0x561   : > { %v754_v52 = vmul.f32 %v751_v50, %v3526_v59  ;;  %v519_v59 = vadd.f32 %v3508_v8, %v518_v19 }
 0x5a6   : > { %v757_v49 = vpop.permute.xlu2 %756 }
 0x5a7   : > { %v759_v51 = vmul.f32 %v757_v49, %v751_v50 }
 0x5a9   : > { %761 = vrot.lane.b32.xlu0 %v759_v51, %s3284_s25 }
 0x61b   : > { %v762_v53 = vpop.permute.xlu0 %761 }
 0x61c   : > { %v764_v54 = vadd.f32 %v762_v53, %v754_v52 }
 0x61e   : > { %2992 = vtanh.f32 %v764_v54 }
 0x624   : > { %v2993_v55 = vpop.eup %2992 }
 0x625   : > { %767 = vrot.lane.b32.xlu1 %v2993_v55, %s3283_s30 }
 0x697   : > { %v768_v56 = vpop.permute.xlu1 %767 }
 0x698   : > { %v770_v57 = vmul.f32 %v768_v56, %v751_v50 }
 0x69a   : > { %772 = vrot.lane.b32.xlu2 %v770_v57, %s3284_s25 }
 0x6f4   : > { %v773_v58 = vpop.permute.xlu2 %772 }
 0x6f5   : > { %776 = vst.msk [vmem:[#allocation3 + $0x10] sm:$0xff] %vm574_vm5, %v773_v58  ;;  %2827 = vmatmul.msk.f32.vlgmr.msra.gmra.mxu1 %vm574_vm5, %v773_v58 }
 0x6f6   : > { %1201 = vmatpush.msra.mxu1 %v3448_v0 }
 0x6f8   : > { %1202 = vmatpush.msra.mxu1 %v3456_v2 }
 0x6fa   : > { %1203 = vmatpush.msra.mxu1 %v3466_v5 }
 0x6fc   : > { %1204 = vmatpush.msra.mxu1 %v3475_v6 }
 0x772   : > { %v798_v60 = vpop.f32.mrf.mxu1 }
 0x773   : > { %v801_v61 = vadd.f32 %v798_v60, %v519_v59 }
 0x775   : > { %2994 = vtanh.f32 %v801_v61  ;;  %v2828_v63 = vmul.f32 -1.442695, %v801_v61 }
 0x777   : > { %2996 = vpow2.f32 %v2828_v63  ;;  %v525_v63 = vadd.f32 %v3508_v8, %v3563_v22 }
 0x77b   : > { %v2995_v62 = vpop.eup %2994 }
 0x77c   : > { %824 = vrot.lane.b32.xlu0 %v2995_v62, %s3283_s30 }
 0x77d   : > { %v2997_v1 = vpop.eup %2996 }
 0x77e   : > { %v805_v3 = vadd.f32 1.0, %v2997_v1 }
 0x780   : > { %2998 = vrcp.f32 %v805_v3  ;;  %v817_v12 = vand.u32 2147483648, %v805_v3  ;;  %vm811_vm15 = vweird.f32 %v805_v3  ;;  %v815_v13 = vand.u32 2147483647, %v805_v3 }
 0x782   : > { %v818_v15 = vor.u32 1.1754944e-38, %v817_v12  ;;  %vm816_vm2 = vcmp.eq.f32.partialorder %v815_v13, 8.507059e+37 }
 0x786   : > { %v2999_v4 = vpop.eup %2998 }
 0x787   : > { %v807_v7 = vmul.f32 %v2999_v4, %v805_v3  ;;  %vm812_vm14 = vweird.f32 %v2999_v4 }
 0x788   : > { %vm813_vm1 = vmor %vm811_vm15, %vm812_vm14 }
 0x789   : > { %v808_v9 = vsub.f32 1.0, %v807_v7 }
 0x78b   : > { %v809_v10 = vmul.f32 %v2999_v4, %v808_v9 }
 0x78d   : > { %v810_v11 = vadd.f32 %v2999_v4, %v809_v10 }
 0x78f   : > { %v814_v14 = vsel %vm813_vm1, %v2999_v4, %v810_v11 }
 0x790   : > { %v819_v17 = vsel %vm816_vm2, %v818_v15, %v814_v14 }
 0x791   : > { %v822_v19 = vmul.f32 %v819_v17, %v764_v54 }
 0x7ee   : > { %v825_v16 = vpop.permute.xlu0 %824 }
 0x7ef   : > { %v827_v18 = vmul.f32 %v825_v16, %v819_v17 }
 0x7f1   : > { %829 = vrot.lane.b32.xlu1 %v827_v18, %s3284_s25 }
 0x863   : > { %v830_v20 = vpop.permute.xlu1 %829 }
 0x864   : > { %v832_v33 = vadd.f32 %v830_v20, %v822_v19 }
 0x866   : > { %3000 = vtanh.f32 %v832_v33 }
 0x86c   : > { %v3001_v34 = vpop.eup %3000 }
 0x86d   : > { %835 = vrot.lane.b32.xlu2 %v3001_v34, %s3283_s30 }
 0x8c7   : > { %v836_v35 = vpop.permute.xlu2 %835 }
 0x8c8   : > { %v838_v36 = vmul.f32 %v836_v35, %v819_v17 }
 0x8ca   : > { %840 = vrot.lane.b32.xlu0 %v838_v36, %s3284_s25 }
 0x93c   : > { %v841_v37 = vpop.permute.xlu0 %840 }
 0x93d   : > { %844 = vst.msk [vmem:[#allocation3 + $0x18] sm:$0xff] %vm574_vm5, %v841_v37  ;;  %2829 = vmatmul.msk.f32.vlgmr.msra.gmra.mxu2 %vm574_vm5, %v841_v37 }
 0x93e   : > { %1269 = vmatpush.msra.mxu2 %v3448_v0 }
 0x940   : > { %1270 = vmatpush.msra.mxu2 %v3456_v2 }
 0x942   : > { %1271 = vmatpush.msra.mxu2 %v3466_v5 }
 0x944   : > { %1272 = vmatpush.msra.mxu2 %v3475_v6 }
 0x9c0   : > { %v866_v39 = vpop.f32.mrf.mxu2 }
 0x9c1   : > { %v869_v40 = vadd.f32 %v866_v39, %v522_v38 }
 0x9c3   : > { %3002 = vtanh.f32 %v869_v40  ;;  %v2830_v42 = vmul.f32 -1.442695, %v869_v40 }
 0x9c5   : > { %3004 = vpow2.f32 %v2830_v42 }
 0x9c9   : > { %v3003_v41 = vpop.eup %3002 }
 0x9ca   : > { %892 = vrot.lane.b32.xlu1 %v3003_v41, %s3283_s30  ;;  %v528_v41 = vadd.f32 %v3508_v8, %v3565_v23 }
 0x9cb   : > { %v3005_v43 = vpop.eup %3004 }
 0x9cc   : > { %v873_v44 = vadd.f32 1.0, %v3005_v43 }
 0x9ce   : > { %3006 = vrcp.f32 %v873_v44  ;;  %v885_v50 = vand.u32 2147483648, %v873_v44  ;;  %vm879_vm4 = vweird.f32 %v873_v44  ;;  %v883_v21 = vand.u32 2147483647, %v873_v44 }
 0x9d0   : > { %v886_v52 = vor.u32 1.1754944e-38, %v885_v50  ;;  %vm884_vm7 = vcmp.eq.f32.partialorder %v883_v21, 8.507059e+37 }
 0x9d4   : > { %v3007_v45 = vpop.eup %3006 }
 0x9d5   : > { %v875_v46 = vmul.f32 %v3007_v45, %v873_v44  ;;  %vm880_vm3 = vweird.f32 %v3007_v45 }
 0x9d6   : > { %vm881_vm6 = vmor %vm879_vm4, %vm880_vm3 }
 0x9d7   : > { %v876_v47 = vsub.f32 1.0, %v875_v46 }
 0x9d9   : > { %v877_v48 = vmul.f32 %v3007_v45, %v876_v47 }
 0x9db   : > { %v878_v49 = vadd.f32 %v3007_v45, %v877_v48 }
 0x9dd   : > { %v882_v51 = vsel %vm881_vm6, %v3007_v45, %v878_v49 }
 0x9de   : > { %v887_v54 = vsel %vm884_vm7, %v886_v52, %v882_v51 }
 0x9df   : > { %v890_v56 = vmul.f32 %v887_v54, %v832_v33 }
 0xa3c   : > { %v893_v53 = vpop.permute.xlu1 %892 }
 0xa3d   : > { %v895_v55 = vmul.f32 %v893_v53, %v887_v54 }
 0xa3f   : > { %897 = vrot.lane.b32.xlu2 %v895_v55, %s3284_s25 }
 0xa99   : > { %v898_v57 = vpop.permute.xlu2 %897 }
 0xa9a   : > { %v900_v58 = vadd.f32 %v898_v57, %v890_v56 }
 0xa9c   : > { %3008 = vtanh.f32 %v900_v58 }
 0xaa2   : > { %v3009_v59 = vpop.eup %3008 }
 0xaa3   : > { %903 = vrot.lane.b32.xlu0 %v3009_v59, %s3283_s30 }
 0xb15   : > { %v904_v60 = vpop.permute.xlu0 %903 }
 0xb16   : > { %v906_v61 = vmul.f32 %v904_v60, %v887_v54 }
 0xb18   : > { %908 = vrot.lane.b32.xlu1 %v906_v61, %s3284_s25 }
 0xb8a   : > { %v909_v62 = vpop.permute.xlu1 %908 }
 0xb8b   : > { %912 = vst.msk [vmem:[#allocation3 + $0x20] sm:$0xff] %vm574_vm5, %v909_v62  ;;  %2831 = vmatmul.msk.f32.vlgmr.msra.gmra.mxu3 %vm574_vm5, %v909_v62 }
 0xb8c   : > { %1337 = vmatpush.msra.mxu3 %v3448_v0 }
 0xb8e   : > { %1338 = vmatpush.msra.mxu3 %v3456_v2 }
 0xb90   : > { %1339 = vmatpush.msra.mxu3 %v3466_v5 }
 0xb92   : > { %1340 = vmatpush.msra.mxu3 %v3475_v6 }
 0xc0e   : > { %v934_v1 = vpop.f32.mrf.mxu3 }
 0xc0f   : > { %v937_v3 = vadd.f32 %v934_v1, %v525_v63 }
 0xc11   : > { %3010 = vtanh.f32 %v937_v3  ;;  %v2832_v7 = vmul.f32 -1.442695, %v937_v3  ;;  %v531_v3 = vadd.f32 %v3508_v8, %v3567_v24 }
 0xc13   : > { %3012 = vpow2.f32 %v2832_v7 }
 0xc17   : > { %v3011_v4 = vpop.eup %3010 }
 0xc18   : > { %960 = vrot.lane.b32.xlu2 %v3011_v4, %s3283_s30 }
 0xc19   : > { %v3013_v9 = vpop.eup %3012 }
 0xc1a   : > { %v941_v10 = vadd.f32 1.0, %v3013_v9 }
 0xc1c   : > { %3014 = vrcp.f32 %v941_v10  ;;  %v953_v16 = vand.u32 2147483648, %v941_v10  ;;  %vm947_vm9 = vweird.f32 %v941_v10  ;;  %v951_v22 = vand.u32 2147483647, %v941_v10 }
 0xc1e   : > { %v954_v18 = vor.u32 1.1754944e-38, %v953_v16  ;;  %vm952_vm11 = vcmp.eq.f32.partialorder %v951_v22, 8.507059e+37 }
 0xc22   : > { %v3015_v11 = vpop.eup %3014 }
 0xc23   : > { %v943_v12 = vmul.f32 %v3015_v11, %v941_v10  ;;  %vm948_vm8 = vweird.f32 %v3015_v11 }
 0xc24   : > { %vm949_vm10 = vmor %vm947_vm9, %vm948_vm8 }
 0xc25   : > { %v944_v13 = vsub.f32 1.0, %v943_v12 }
 0xc27   : > { %v945_v14 = vmul.f32 %v3015_v11, %v944_v13 }
 0xc29   : > { %v946_v15 = vadd.f32 %v3015_v11, %v945_v14 }
 0xc2b   : > { %v950_v17 = vsel %vm949_vm10, %v3015_v11, %v946_v15 }
 0xc2c   : > { %v955_v20 = vsel %vm952_vm11, %v954_v18, %v950_v17 }
 0xc2d   : > { %v958_v34 = vmul.f32 %v955_v20, %v900_v58 }
 0xc72   : > { %v961_v19 = vpop.permute.xlu2 %960 }
 0xc73   : > { %v963_v33 = vmul.f32 %v961_v19, %v955_v20 }
 0xc75   : > { %965 = vrot.lane.b32.xlu0 %v963_v33, %s3284_s25 }
 0xce7   : > { %v966_v35 = vpop.permute.xlu0 %965 }
 0xce8   : > { %v968_v36 = vadd.f32 %v966_v35, %v958_v34 }
 0xcea   : > { %3016 = vtanh.f32 %v968_v36 }
 0xcf0   : > { %v3017_v37 = vpop.eup %3016 }
 0xcf1   : > { %971 = vrot.lane.b32.xlu1 %v3017_v37, %s3283_s30 }
 0xd63   : > { %v972_v38 = vpop.permute.xlu1 %971 }
 0xd64   : > { %v974_v39 = vmul.f32 %v972_v38, %v955_v20 }
 0xd66   : > { %976 = vrot.lane.b32.xlu2 %v974_v39, %s3284_s25 }
 0xdc0   : > { %v977_v40 = vpop.permute.xlu2 %976 }
 0xdc1   : > { %980 = vst.msk [vmem:[#allocation3 + $0x28] sm:$0xff] %vm574_vm5, %v977_v40  ;;  %2833 = vmatmul.msk.f32.vlgmr.msrb.gmra.mxu1 %vm574_vm5, %v977_v40 }
 0xdc2   : > { %1405 = vmatpush.msrb.mxu1 %v3448_v0 }
 0xdc4   : > { %1406 = vmatpush.msrb.mxu1 %v3456_v2 }
 0xdc6   : > { %1407 = vmatpush.msrb.mxu1 %v3466_v5 }
 0xdc8   : > { %1408 = vmatpush.msrb.mxu1 %v3475_v6 }
 0xe3e   : > { %v1002_v42 = vpop.f32.mrf.mxu1 }
 0xe3f   : > { %v1005_v43 = vadd.f32 %v1002_v42, %v528_v41  ;;  %v534_v42 = vadd.f32 %v3508_v8, %v3569_v25 }
 0xe41   : > { %3018 = vtanh.f32 %v1005_v43  ;;  %v2834_v45 = vmul.f32 -1.442695, %v1005_v43 }
 0xe43   : > { %3020 = vpow2.f32 %v2834_v45 }
 0xe47   : > { %v3019_v44 = vpop.eup %3018 }
 0xe48   : > { %1028 = vrot.lane.b32.xlu0 %v3019_v44, %s3283_s30 }
 0xe49   : > { %v3021_v46 = vpop.eup %3020 }
 0xe4a   : > { %v1009_v47 = vadd.f32 1.0, %v3021_v46 }
 0xe4c   : > { %3022 = vrcp.f32 %v1009_v47  ;;  %v1021_v52 = vand.u32 2147483648, %v1009_v47  ;;  %vm1015_vm13 = vweird.f32 %v1009_v47  ;;  %v1019_v23 = vand.u32 2147483647, %v1009_v47 }
 0xe4e   : > { %v1022_v54 = vor.u32 1.1754944e-38, %v1021_v52  ;;  %vm1020_vm15 = vcmp.eq.f32.partialorder %v1019_v23, 8.507059e+37 }
 0xe52   : > { %v3023_v48 = vpop.eup %3022 }
 0xe53   : > { %v1011_v49 = vmul.f32 %v3023_v48, %v1009_v47  ;;  %vm1016_vm12 = vweird.f32 %v3023_v48 }
 0xe54   : > { %vm1017_vm14 = vmor %vm1015_vm13, %vm1016_vm12 }
 0xe55   : > { %v1012_v50 = vsub.f32 1.0, %v1011_v49 }
 0xe57   : > { %v1013_v21 = vmul.f32 %v3023_v48, %v1012_v50 }
 0xe59   : > { %v1014_v51 = vadd.f32 %v3023_v48, %v1013_v21 }
 0xe5b   : > { %v1018_v53 = vsel %vm1017_vm14, %v3023_v48, %v1014_v51 }
 0xe5c   : > { %v1023_v56 = vsel %vm1020_vm15, %v1022_v54, %v1018_v53 }
 0xe5d   : > { %v1026_v58 = vmul.f32 %v1023_v56, %v968_v36 }
 0xeba   : > { %v1029_v55 = vpop.permute.xlu0 %1028 }
 0xebb   : > { %v1031_v57 = vmul.f32 %v1029_v55, %v1023_v56 }
 0xebd   : > { %1033 = vrot.lane.b32.xlu1 %v1031_v57, %s3284_s25 }
 0xf2f   : > { %v1034_v59 = vpop.permute.xlu1 %1033 }
 0xf30   : > { %v1036_v60 = vadd.f32 %v1034_v59, %v1026_v58 }
 0xf32   : > { %3024 = vtanh.f32 %v1036_v60 }
 0xf38   : > { %v3025_v61 = vpop.eup %3024 }
 0xf39   : > { %1039 = vrot.lane.b32.xlu2 %v3025_v61, %s3283_s30 }
 0xf93   : > { %v1040_v62 = vpop.permute.xlu2 %1039 }
 0xf94   : > { %v1042_v63 = vmul.f32 %v1040_v62, %v1023_v56 }
 0xf96   : > { %1044 = vrot.lane.b32.xlu0 %v1042_v63, %s3284_s25 }
0x1008   : > { %v1045_v1 = vpop.permute.xlu0 %1044 }
0x1009   : > { %1048 = vst.msk [vmem:[#allocation3 + $0x30] sm:$0xff] %vm574_vm5, %v1045_v1  ;;  %2835 = vmatmul.msk.f32.vlgmr.msrb.gmra.mxu2 %vm574_vm5, %v1045_v1 }
0x100a   : > { %1473 = vmatpush.msrb.mxu2 %v3448_v0 }
0x100c   : > { %1474 = vmatpush.msrb.mxu2 %v3456_v2 }
0x100e   : > { %1475 = vmatpush.msrb.mxu2 %v3466_v5 }
0x1010   : > { %1476 = vmatpush.msrb.mxu2 %v3475_v6 }
0x108c   : > { %v1070_v4 = vpop.f32.mrf.mxu2 }
0x108d   : > { %v1073_v7 = vadd.f32 %v1070_v4, %v531_v3  ;;  %v537_v3 = vadd.f32 %v3508_v8, %v3571_v26 }
0x108f   : > { %3026 = vtanh.f32 %v1073_v7  ;;  %v2836_v10 = vmul.f32 -1.442695, %v1073_v7 }
0x1091   : > { %3028 = vpow2.f32 %v2836_v10 }
0x1095   : > { %v3027_v9 = vpop.eup %3026 }
0x1096   : > { %1096 = vrot.lane.b32.xlu1 %v3027_v9, %s3283_s30 }
0x1097   : > { %v3029_v11 = vpop.eup %3028 }
0x1098   : > { %v1077_v12 = vadd.f32 1.0, %v3029_v11 }
0x109a   : > { %3030 = vrcp.f32 %v1077_v12  ;;  %v1089_v17 = vand.u32 2147483648, %v1077_v12  ;;  %vm1083_vm2 = vweird.f32 %v1077_v12  ;;  %v1087_v24 = vand.u32 2147483647, %v1077_v12 }
0x109c   : > { %v1090_v19 = vor.u32 1.1754944e-38, %v1089_v17  ;;  %vm1088_vm4 = vcmp.eq.f32.partialorder %v1087_v24, 8.507059e+37 }
0x10a0   : > { %v3031_v13 = vpop.eup %3030 }
0x10a1   : > { %v1079_v14 = vmul.f32 %v3031_v13, %v1077_v12  ;;  %vm1084_vm1 = vweird.f32 %v3031_v13 }
0x10a2   : > { %vm1085_vm3 = vmor %vm1083_vm2, %vm1084_vm1 }
0x10a3   : > { %v1080_v15 = vsub.f32 1.0, %v1079_v14 }
0x10a5   : > { %v1081_v16 = vmul.f32 %v3031_v13, %v1080_v15 }
0x10a7   : > { %v1082_v22 = vadd.f32 %v3031_v13, %v1081_v16 }
0x10a9   : > { %v1086_v18 = vsel %vm1085_vm3, %v3031_v13, %v1082_v22 }
0x10aa   : > { %v1091_v33 = vsel %vm1088_vm4, %v1090_v19, %v1086_v18 }
0x10ab   : > { %v1094_v35 = vmul.f32 %v1091_v33, %v1036_v60 }
0x1108   : > { %v1097_v20 = vpop.permute.xlu1 %1096 }
0x1109   : > { %v1099_v34 = vmul.f32 %v1097_v20, %v1091_v33 }
0x110b   : > { %1101 = vrot.lane.b32.xlu2 %v1099_v34, %s3284_s25 }
0x1165   : > { %v1102_v36 = vpop.permute.xlu2 %1101 }
0x1166   : > { %v1104_v37 = vadd.f32 %v1102_v36, %v1094_v35 }
0x1168   : > { %3032 = vtanh.f32 %v1104_v37 }
0x116e   : > { %v3033_v38 = vpop.eup %3032 }
0x116f   : > { %1107 = vrot.lane.b32.xlu0 %v3033_v38, %s3283_s30 }
0x11e1   : > { %v1108_v39 = vpop.permute.xlu0 %1107 }
0x11e2   : > { %v1110_v40 = vmul.f32 %v1108_v39, %v1091_v33 }
0x11e4   : > { %1112 = vrot.lane.b32.xlu1 %v1110_v40, %s3284_s25 }
0x1256   : > { %v1113_v41 = vpop.permute.xlu1 %1112 }
0x1257   : > { %1116 = vst.msk [vmem:[#allocation3 + $0x38] sm:$0xff] %vm574_vm5, %v1113_v41  ;;  %2837 = vmatmul.msk.f32.vlgmr.msrb.gmra.mxu3 %vm574_vm5, %v1113_v41 }
0x1258   : > { %1541 = vmatpush.msrb.mxu3 %v3448_v0 }
0x125a   : > { %1542 = vmatpush.msrb.mxu3 %v3456_v2 }
0x125c   : > { %1543 = vmatpush.msrb.mxu3 %v3466_v5 }
0x125e   : > { %1544 = vmatpush.msrb.mxu3 %v3475_v6 }
0x12da   : > { %v1138_v43 = vpop.f32.mrf.mxu3 }
0x12db   : > { %v1141_v44 = vadd.f32 %v1138_v43, %v534_v42 }
0x12dd   : > { %3034 = vtanh.f32 %v1141_v44  ;;  %v2838_v46 = vmul.f32 -1.442695, %v1141_v44 }
0x12df   : > { %3036 = vpow2.f32 %v2838_v46 }
0x12e3   : > { %v3035_v45 = vpop.eup %3034 }
0x12e4   : > { %1164 = vrot.lane.b32.xlu2 %v3035_v45, %s3283_s30 }
0x12e5   : > { %v3037_v47 = vpop.eup %3036 }
0x12e6   : > { %v1145_v48 = vadd.f32 1.0, %v3037_v47 }
0x12e8   : > { %3038 = vrcp.f32 %v1145_v48  ;;  %v1157_v23 = vand.u32 2147483648, %v1145_v48  ;;  %vm1151_vm7 = vweird.f32 %v1145_v48  ;;  %v1155_v25 = vand.u32 2147483647, %v1145_v48 }
0x12ea   : > { %v1158_v54 = vor.u32 1.1754944e-38, %v1157_v23  ;;  %vm1156_vm9 = vcmp.eq.f32.partialorder %v1155_v25, 8.507059e+37 }
0x12ee   : > { %v3039_v49 = vpop.eup %3038 }
0x12ef   : > { %v1147_v50 = vmul.f32 %v3039_v49, %v1145_v48  ;;  %vm1152_vm6 = vweird.f32 %v3039_v49 }
0x12f0   : > { %vm1153_vm8 = vmor %vm1151_vm7, %vm1152_vm6 }
0x12f1   : > { %v1148_v21 = vsub.f32 1.0, %v1147_v50 }
0x12f3   : > { %v1149_v51 = vmul.f32 %v3039_v49, %v1148_v21 }
0x12f5   : > { %v1150_v52 = vadd.f32 %v3039_v49, %v1149_v51 }
0x12f7   : > { %v1154_v53 = vsel %vm1153_vm8, %v3039_v49, %v1150_v52 }
0x12f8   : > { %v1159_v56 = vsel %vm1156_vm9, %v1158_v54, %v1154_v53 }
0x12f9   : > { %v1162_v58 = vmul.f32 %v1159_v56, %v1104_v37  ;;  %v540_v37 = vadd.f32 %v3508_v8, %v3573_v27 }
0x133e   : > { %v1165_v55 = vpop.permute.xlu2 %1164 }
0x133f   : > { %v1167_v57 = vmul.f32 %v1165_v55, %v1159_v56 }
0x1341   : > { %1169 = vrot.lane.b32.xlu0 %v1167_v57, %s3284_s25 }
0x13b3   : > { %v1170_v59 = vpop.permute.xlu0 %1169 }
0x13b4   : > { %v1172_v60 = vadd.f32 %v1170_v59, %v1162_v58  ;;  %v3687_v58 = vld [vmem:[%s4341_s3] ss:$0 sm:$0xff] }
0x13b5   : > { %v543_v59 = vadd.f32 %v3687_v58, %v3575_v28 }
0x13b6   : > { %3040 = vtanh.f32 %v1172_v60 }
0x13bc   : > { %v3041_v61 = vpop.eup %3040 }
0x13bd   : > { %1175 = vrot.lane.b32.xlu1 %v3041_v61, %s3283_s30 }
0x142f   : > { %v1176_v62 = vpop.permute.xlu1 %1175 }
0x1430   : > { %v1178_v63 = vmul.f32 %v1176_v62, %v1159_v56 }
0x1432   : > { %1180 = vrot.lane.b32.xlu2 %v1178_v63, %s3284_s25 }
0x148c   : > { %v1181_v1 = vpop.permute.xlu2 %1180 }
0x148d   : > { %1184 = vst.msk [vmem:[#allocation3 + $0x40] sm:$0xff] %vm574_vm5, %v1181_v1  ;;  %2839 = vmatmul.msk.f32.vlgmr.msra.gmra.mxu1 %vm574_vm5, %v1181_v1 }
0x148e   : > { %1609 = vmatpush.msra.mxu1 %v3448_v0 }
0x1490   : > { %1610 = vmatpush.msra.mxu1 %v3456_v2 }
0x1492   : > { %1611 = vmatpush.msra.mxu1 %v3466_v5 }
0x1494   : > { %1612 = vmatpush.msra.mxu1 %v3475_v6 }
0x150a   : > { %v1206_v4 = vpop.f32.mrf.mxu1 }
0x150b   : > { %v1209_v7 = vadd.f32 %v1206_v4, %v537_v3 }
0x150d   : > { %3042 = vtanh.f32 %v1209_v7  ;;  %v2840_v10 = vmul.f32 -1.442695, %v1209_v7 }
0x150f   : > { %3044 = vpow2.f32 %v2840_v10 }
0x1513   : > { %v3043_v9 = vpop.eup %3042 }
0x1514   : > { %1232 = vrot.lane.b32.xlu0 %v3043_v9, %s3283_s30 }
0x1515   : > { %v3045_v11 = vpop.eup %3044 }
0x1516   : > { %v1213_v12 = vadd.f32 1.0, %v3045_v11 }
0x1518   : > { %3046 = vrcp.f32 %v1213_v12  ;;  %v1225_v6 = vand.u32 2147483648, %v1213_v12  ;;  %vm1219_vm11 = vweird.f32 %v1213_v12  ;;  %v1223_v26 = vand.u32 2147483647, %v1213_v12 }
0x151a   : > { %v1226_v16 = vor.u32 1.1754944e-38, %v1225_v6  ;;  %vm1224_vm13 = vcmp.eq.f32.partialorder %v1223_v26, 8.507059e+37 }
0x151e   : > { %v3047_v0 = vpop.eup %3046 }
0x151f   : > { %v1215_v2 = vmul.f32 %v3047_v0, %v1213_v12  ;;  %vm1220_vm10 = vweird.f32 %v3047_v0 }
0x1520   : > { %vm1221_vm12 = vmor %vm1219_vm11, %vm1220_vm10 }
0x1521   : > { %v1216_v13 = vsub.f32 1.0, %v1215_v2 }
0x1523   : > { %v1217_v5 = vmul.f32 %v3047_v0, %v1216_v13 }
0x1525   : > { %v1218_v14 = vadd.f32 %v3047_v0, %v1217_v5 }
0x1527   : > { %v1222_v15 = vsel %vm1221_vm12, %v3047_v0, %v1218_v14 }
0x1528   : > { %v1227_v17 = vsel %vm1224_vm13, %v1226_v16, %v1222_v15 }
0x1529   : > { %v1230_v18 = vmul.f32 %v1227_v17, %v1172_v60 }
0x1586   : > { %v1233_v22 = vpop.permute.xlu0 %1232 }
0x1587   : > { %v1235_v24 = vmul.f32 %v1233_v22, %v1227_v17 }
0x1589   : > { %1237 = vrot.lane.b32.xlu1 %v1235_v24, %s3284_s25 }
0x15fb   : > { %v1238_v19 = vpop.permute.xlu1 %1237 }
0x15fc   : > { %v1240_v20 = vadd.f32 %v1238_v19, %v1230_v18  ;;  %v546_v18 = vadd.f32 %v3687_v58, %v3577_v29 }
0x15fe   : > { %3048 = vtanh.f32 %v1240_v20 }
0x1604   : > { %v3049_v33 = vpop.eup %3048 }
0x1605   : > { %1243 = vrot.lane.b32.xlu2 %v3049_v33, %s3283_s30 }
0x165f   : > { %v1244_v34 = vpop.permute.xlu2 %1243 }
0x1660   : > { %v1246_v35 = vmul.f32 %v1244_v34, %v1227_v17 }
0x1662   : > { %1248 = vrot.lane.b32.xlu0 %v1246_v35, %s3284_s25 }
0x16d4   : > { %v1249_v36 = vpop.permute.xlu0 %1248 }
0x16d5   : > { %1252 = vst.msk [vmem:[#allocation3 + $0x48] sm:$0xff] %vm574_vm5, %v1249_v36  ;;  %2841 = vmatmul.msk.f32.vlgmr.msra.gmra.mxu2 %vm574_vm5, %v1249_v36 }
0x1758   : > { %v1274_v38 = vpop.f32.mrf.mxu2 }
0x1759   : > { %v1277_v39 = vadd.f32 %v1274_v38, %v540_v37 }
0x175b   : > { %3050 = vtanh.f32 %v1277_v39  ;;  %v2842_v41 = vmul.f32 -1.442695, %v1277_v39 }
0x175d   : > { %3052 = vpow2.f32 %v2842_v41 }
0x1761   : > { %v3051_v40 = vpop.eup %3050 }
0x1762   : > { %1300 = vrot.lane.b32.xlu1 %v3051_v40, %s3283_s30 }
0x1763   : > { %v3053_v42 = vpop.eup %3052 }
0x1764   : > { %v1281_v43 = vadd.f32 1.0, %v3053_v42 }
0x1766   : > { %3054 = vrcp.f32 %v1281_v43  ;;  %v1293_v49 = vand.u32 2147483648, %v1281_v43  ;;  %vm1287_vm15 = vweird.f32 %v1281_v43  ;;  %v1291_v8 = vand.u32 2147483647, %v1281_v43 }
0x1768   : > { %v1294_v50 = vor.u32 1.1754944e-38, %v1293_v49  ;;  %vm1292_vm2 = vcmp.eq.f32.partialorder %v1291_v8, 8.507059e+37 }
0x176c   : > { %v3055_v44 = vpop.eup %3054 }
0x176d   : > { %v1283_v45 = vmul.f32 %v3055_v44, %v1281_v43  ;;  %vm1288_vm14 = vweird.f32 %v3055_v44 }
0x176e   : > { %vm1289_vm1 = vmor %vm1287_vm15, %vm1288_vm14 }
0x176f   : > { %v1284_v46 = vsub.f32 1.0, %v1283_v45 }
0x1771   : > { %v1285_v47 = vmul.f32 %v3055_v44, %v1284_v46 }
0x1773   : > { %v1286_v48 = vadd.f32 %v3055_v44, %v1285_v47 }
0x1775   : > { %v1290_v27 = vsel %vm1289_vm1, %v3055_v44, %v1286_v48 }
0x1776   : > { %v1295_v51 = vsel %vm1292_vm2, %v1294_v50, %v1290_v27 }
0x1777   : > { %v1298_v23 = vmul.f32 %v1295_v51, %v1240_v20 }
0x17d4   : > { %v1301_v21 = vpop.permute.xlu1 %1300 }
0x17d5   : > { %v1303_v52 = vmul.f32 %v1301_v21, %v1295_v51 }
0x17d7   : > { %1305 = vrot.lane.b32.xlu2 %v1303_v52, %s3284_s25  ;;  %v1679_v52 = vld [vmem:[%s4342_s4 + $0x10] sm:$0xff] }
0x1831   : > { %v1306_v25 = vpop.permute.xlu2 %1305 }
0x1832   : > { %v1308_v53 = vadd.f32 %v1306_v25, %v1298_v23  ;;  %v1678_v23 = vld [vmem:[%s4342_s4 + $0x8] sm:$0xff]  ;;  %v1677_v25 = vld [vmem:[%s4342_s4] sm:$0xff] }
0x1834   : > { %3056 = vtanh.f32 %v1308_v53 }
0x183a   : > { %v3057_v54 = vpop.eup %3056 }
0x183b   : > { %1311 = vrot.lane.b32.xlu0 %v3057_v54, %s3283_s30  ;;  %v1665_v54 = vld [vmem:[#allocation3 + $0x20] sm:$0xff] }
0x18ad   : > { %v1312_v55 = vpop.permute.xlu0 %1311 }
0x18ae   : > { %v1314_v56 = vmul.f32 %v1312_v55, %v1295_v51  ;;  %v1680_v51 = vld [vmem:[%s4342_s4 + $0x18] sm:$0xff]  ;;  %v1666_v55 = vld [vmem:[#allocation3 + $0x28] sm:$0xff] }
0x18af   : > { %2890 = vmatpush.msra.mxu2 %v1680_v51 }
0x18b0   : > { %1316 = vrot.lane.b32.xlu1 %v1314_v56, %s3284_s25  ;;  %v1667_v56 = vld [vmem:[#allocation3 + $0x30] sm:$0xff] }
0x18b1   : > { %2891 = vmatpush.msra.mxu2 %v1679_v52 }
0x18b3   : > { %2892 = vmatpush.msra.mxu2 %v1678_v23 }
0x18b5   : > { %2893 = vmatpush.msra.mxu2 %v1677_v25 }
0x1922   : > { %v1317_v57 = vpop.permute.xlu1 %1316 }
0x1923   : > { %1320 = vst.msk [vmem:[#allocation3 + $0x50] sm:$0xff] %vm574_vm5, %v1317_v57  ;;  %2843 = vmatmul.msk.f32.vlgmr.msra.gmra.mxu3 %vm574_vm5, %v1317_v57  ;;  %v1668_v57 = vld [vmem:[#allocation3 + $0x38] sm:$0xff] }
0x19a6   : > { %v1342_v60 = vpop.f32.mrf.mxu3 }
0x19a7   : > { %v1345_v61 = vadd.f32 %v1342_v60, %v543_v59  ;;  %v1669_v59 = vld [vmem:[#allocation3 + $0x40] sm:$0xff]  ;;  %v1670_v60 = vld [vmem:[#allocation3 + $0x48] sm:$0xff] }
0x19a9   : > { %3058 = vtanh.f32 %v1345_v61  ;;  %v2844_v63 = vmul.f32 -1.442695, %v1345_v61  ;;  %v1671_v61 = vld [vmem:[#allocation3 + $0x50] sm:$0xff] }
0x19ab   : > { %3060 = vpow2.f32 %v2844_v63 }
0x19af   : > { %v3059_v62 = vpop.eup %3058 }
0x19b0   : > { %1368 = vrot.lane.b32.xlu2 %v3059_v62, %s3283_s30 }
0x19b1   : > { %v3061_v1 = vpop.eup %3060 }
0x19b2   : > { %v1349_v3 = vadd.f32 1.0, %v3061_v1  ;;  %v549_v1 = vadd.f32 %v3687_v58, %v3579_v30 }
0x19b4   : > { %3062 = vrcp.f32 %v1349_v3  ;;  %v1361_v12 = vand.u32 2147483648, %v1349_v3  ;;  %vm1355_vm4 = vweird.f32 %v1349_v3  ;;  %v1359_v28 = vand.u32 2147483647, %v1349_v3 }
0x19b6   : > { %v1362_v2 = vor.u32 1.1754944e-38, %v1361_v12  ;;  %vm1360_vm7 = vcmp.eq.f32.partialorder %v1359_v28, 8.507059e+37 }
0x19ba   : > { %v3063_v4 = vpop.eup %3062 }
0x19bb   : > { %v1351_v7 = vmul.f32 %v3063_v4, %v1349_v3  ;;  %vm1356_vm3 = vweird.f32 %v3063_v4 }
0x19bc   : > { %vm1357_vm6 = vmor %vm1355_vm4, %vm1356_vm3 }
0x19bd   : > { %v1352_v9 = vsub.f32 1.0, %v1351_v7 }
0x19bf   : > { %v1353_v10 = vmul.f32 %v3063_v4, %v1352_v9 }
0x19c1   : > { %v1354_v11 = vadd.f32 %v3063_v4, %v1353_v10 }
0x19c3   : > { %v1358_v0 = vsel %vm1357_vm6, %v3063_v4, %v1354_v11 }
0x19c4   : > { %v1363_v5 = vsel %vm1360_vm7, %v1362_v2, %v1358_v0 }
0x19c5   : > { %v1366_v6 = vmul.f32 %v1363_v5, %v1308_v53 }
0x1a0a   : > { %v1369_v13 = vpop.permute.xlu2 %1368 }
0x1a0b   : > { %v1371_v14 = vmul.f32 %v1369_v13, %v1363_v5 }
0x1a0d   : > { %1373 = vrot.lane.b32.xlu0 %v1371_v14, %s3284_s25 }
0x1a7f   : > { %v1374_v26 = vpop.permute.xlu0 %1373 }
0x1a80   : > { %v1376_v15 = vadd.f32 %v1374_v26, %v1366_v6 }
0x1a82   : > { %3064 = vtanh.f32 %v1376_v15 }
0x1a88   : > { %v3065_v16 = vpop.eup %3064 }
0x1a89   : > { %1379 = vrot.lane.b32.xlu1 %v3065_v16, %s3283_s30 }
0x1afb   : > { %v1380_v22 = vpop.permute.xlu1 %1379 }
0x1afc   : > { %v1382_v17 = vmul.f32 %v1380_v22, %v1363_v5 }
0x1afe   : > { %1384 = vrot.lane.b32.xlu2 %v1382_v17, %s3284_s25 }
0x1b58   : > { %v1385_v24 = vpop.permute.xlu2 %1384 }
0x1b59   : > { %1388 = vst.msk [vmem:[#allocation3 + $0x58] sm:$0xff] %vm574_vm5, %v1385_v24  ;;  %2845 = vmatmul.msk.f32.vlgmr.msrb.gmra.mxu1 %vm574_vm5, %v1385_v24 }
0x1b5a   : > { %1745 = vmatpush.msrb.mxu1 %v1680_v51 }
0x1b5c   : > { %1746 = vmatpush.msrb.mxu1 %v1679_v52 }
0x1b5e   : > { %1747 = vmatpush.msrb.mxu1 %v1678_v23 }
0x1b60   : > { %1748 = vmatpush.msrb.mxu1 %v1677_v25  ;;  %v1672_v62 = vld [vmem:[#allocation3 + $0x58] sm:$0xff] }
0x1bd6   : > { %v1410_v19 = vpop.f32.mrf.mxu1 }
0x1bd7   : > { %v1413_v20 = vadd.f32 %v1410_v19, %v546_v18 }
0x1bd9   : > { %3066 = vtanh.f32 %v1413_v20  ;;  %v2846_v34 = vmul.f32 -1.442695, %v1413_v20 }
0x1bdb   : > { %3068 = vpow2.f32 %v2846_v34  ;;  %v3747_v34 = vld [vmem:[%s4344_s6] sm:$0xff] }
0x1bdf   : > { %v3067_v33 = vpop.eup %3066 }
0x1be0   : > { %1436 = vrot.lane.b32.xlu0 %v3067_v33, %s3283_s30  ;;  %v3742_v33 = vld [vmem:[%s4344_s6 + $0x8] sm:$0xff] }
0x1be1   : > { %v3069_v35 = vpop.eup %3068  ;;  %2894 = vmatpush.msra.mxu3 %v3742_v33 }
0x1be2   : > { %v1417_v36 = vadd.f32 1.0, %v3069_v35 }
0x1be3   : > { %2895 = vmatpush.msra.mxu3 %v3747_v34 }
0x1be4   : > { %3070 = vrcp.f32 %v1417_v36  ;;  %v1429_v42 = vand.u32 2147483648, %v1417_v36  ;;  %vm1423_vm9 = vweird.f32 %v1417_v36  ;;  %v1427_v29 = vand.u32 2147483647, %v1417_v36 }
0x1be6   : > { %v1430_v44 = vor.u32 1.1754944e-38, %v1429_v42  ;;  %vm1428_vm11 = vcmp.eq.f32.partialorder %v1427_v29, 8.507059e+37 }
0x1bea   : > { %v3071_v37 = vpop.eup %3070 }
0x1beb   : > { %v1419_v38 = vmul.f32 %v3071_v37, %v1417_v36  ;;  %vm1424_vm8 = vweird.f32 %v3071_v37 }
0x1bec   : > { %vm1425_vm10 = vmor %vm1423_vm9, %vm1424_vm8 }
0x1bed   : > { %v1420_v39 = vsub.f32 1.0, %v1419_v38 }
0x1bef   : > { %v1421_v40 = vmul.f32 %v3071_v37, %v1420_v39 }
0x1bf1   : > { %v1422_v41 = vadd.f32 %v3071_v37, %v1421_v40 }
0x1bf3   : > { %v1426_v43 = vsel %vm1425_vm10, %v3071_v37, %v1422_v41  ;;  %v3754_v37 = vld [vmem:[%s4343_s5] ss:$0 sm:$0xff]  ;;  %vm1933_vm10 = vcmask 31744  }
0x1bf4   : > { %v1431_v46 = vsel %vm1428_vm11, %v1430_v44, %v1426_v43  ;;  %vm2143_vm11 = vcmask 1041409  }
0x1bf5   : > { %v1434_v48 = vmul.f32 %v1431_v46, %v1376_v15 }
0x1c52   : > { %v1437_v45 = vpop.permute.xlu0 %1436 }
0x1c53   : > { %v1439_v47 = vmul.f32 %v1437_v45, %v1431_v46 }
0x1c55   : > { %1441 = vrot.lane.b32.xlu1 %v1439_v47, %s3284_s25 }
0x1cc7   : > { %v1442_v49 = vpop.permute.xlu1 %1441 }
0x1cc8   : > { %v3701_v8 = vadd.f32 %v1442_v49, %v1434_v48 }
0x1cca   : > { %3072 = vtanh.f32 %v3701_v8 }
0x1cd0   : > { %v3073_v27 = vpop.eup %3072 }
0x1cd1   : > { %1447 = vrot.lane.b32.xlu2 %v3073_v27, %s3283_s30 }
0x1d2b   : > { %v1448_v50 = vpop.permute.xlu2 %1447 }
0x1d2c   : > { %v1450_v21 = vmul.f32 %v1448_v50, %v1431_v46 }
0x1d2e   : > { %1452 = vrot.lane.b32.xlu0 %v1450_v21, %s3284_s25 }
0x1da0   : > { %v1453_v53 = vpop.permute.xlu0 %1452 }
0x1da1   : > { %1456 = vst.msk [vmem:[#allocation3 + $0x60] sm:$0xff] %vm574_vm5, %v1453_v53  ;;  %2847 = vmatmul.msk.f32.vlgmr.msrb.gmra.mxu2 %vm574_vm5, %v1453_v53 }
0x1da8   : > { %v1673_v63 = vld [vmem:[#allocation3 + $0x60] sm:$0xff] }
0x1da9   : > { %2857 = vmatmul.msk.f32.vlgmr.msra.gmra.mxu2 %vm574_vm5, %v1665_v54 }
0x1db1   : > { %2858 = vmatmul.msk.f32.gmra.mxu2 %vm574_vm5, %v1666_v55 }
0x1db9   : > { %2859 = vmatmul.msk.f32.gmra.mxu2 %vm574_vm5, %v1667_v56 }
0x1dc1   : > { %2860 = vmatmul.msk.f32.gmra.mxu2 %vm574_vm5, %v1668_v57 }
0x1dc9   : > { %2861 = vmatmul.msk.f32.gmra.mxu2 %vm574_vm5, %v1669_v59 }
0x1dd1   : > { %2862 = vmatmul.msk.f32.gmra.mxu2 %vm574_vm5, %v1670_v60  ;;  %v552_v60 = vadd.f32 %v3687_v58, %v3581_v31 }
0x1dd9   : > { %2863 = vmatmul.msk.f32.gmra.mxu2 %vm574_vm5, %v1671_v61 }
0x1de1   : > { %2864 = vmatmul.msk.f32.gmra.mxu2 %vm574_vm5, %v1672_v62 }
0x1de9   : > { %2865 = vmatmul.msk.f32.gmra.mxu2 %vm574_vm5, %v1673_v63 }
0x1e24   : > { %v1478_v3 = vpop.f32.mrf.mxu2 }
0x1e25   : > { %v1481_v4 = vadd.f32 %v1478_v3, %v549_v1 }
0x1e27   : > { %3074 = vtanh.f32 %v1481_v4  ;;  %v2848_v9 = vmul.f32 -1.442695, %v1481_v4 }
0x1e29   : > { %3076 = vpow2.f32 %v2848_v9 }
0x1e2c   : > { %v1762_v35 = vpop.f32.mrf.mxu2 }
0x1e2d   : > { %v3075_v7 = vpop.eup %3074  ;;  %v1763_v38 = vadd.f32 %v3754_v37, %v1762_v35 }
0x1e2e   : > { %1504 = vrot.lane.b32.xlu1 %v3075_v7, %s3283_s30 }
0x1e2f   : > { %v3077_v10 = vpop.eup %3076 }
0x1e30   : > { %v1485_v11 = vadd.f32 1.0, %v3077_v10 }
0x1e32   : > { %3078 = vrcp.f32 %v1485_v11  ;;  %v1497_v5 = vand.u32 2147483648, %v1485_v11  ;;  %vm1491_vm13 = vweird.f32 %v1485_v11  ;;  %v1495_v30 = vand.u32 2147483647, %v1485_v11 }
0x1e34   : > { %v1498_v6 = vor.u32 1.1754944e-38, %v1497_v5  ;;  %vm1496_vm15 = vcmp.eq.f32.partialorder %v1495_v30, 8.507059e+37  ;;  %v1765_v36 = vpop.f32.mrf.mxu2 }
0x1e35   : > { %v1766_v41 = vadd.f32 %v3754_v37, %v1765_v36  ;;  %v1662_v36 = vld [vmem:[#allocation3 + $0x8] sm:$0xff] }
0x1e38   : > { %v3079_v12 = vpop.eup %3078 }
0x1e39   : > { %v1487_v28 = vmul.f32 %v3079_v12, %v1485_v11  ;;  %vm1492_vm12 = vweird.f32 %v3079_v12 }
0x1e3a   : > { %vm1493_vm14 = vmor %vm1491_vm13, %vm1492_vm12  ;;  %vm2145_vm12 = vcmask 1042434   ;;  %vm2147_vm13 = vcmask 1043459  }
0x1e3b   : > { %v1488_v0 = vsub.f32 1.0, %v1487_v28 }
0x1e3c   : > { %v1768_v39 = vpop.f32.mrf.mxu2 }
0x1e3d   : > { %v1489_v2 = vmul.f32 %v3079_v12, %v1488_v0  ;;  %v1769_v44 = vadd.f32 %v3754_v37, %v1768_v39  ;;  %v1664_v39 = vld [vmem:[#allocation3 + $0x18] sm:$0xff] }
0x1e3f   : > { %v1490_v13 = vadd.f32 %v3079_v12, %v1489_v2 }
0x1e41   : > { %v1494_v14 = vsel %vm1493_vm14, %v3079_v12, %v1490_v13  ;;  %vm2149_vm14 = vcmask 1044484  }
0x1e42   : > { %v1499_v15 = vsel %vm1496_vm15, %v1498_v6, %v1494_v14  ;;  %vm2151_vm15 = vcmask 1045509  }
0x1e43   : > { %v1502_v22 = vmul.f32 %v1499_v15, %v3701_v8 }
0x1e44   : > { %v1771_v43 = vpop.f32.mrf.mxu2 }
0x1e45   : > { %v1772_v47 = vadd.f32 %v3754_v37, %v1771_v43 }
0x1e4c   : > { %v1774_v46 = vpop.f32.mrf.mxu2 }
0x1e4d   : > { %v1775_v8 = vadd.f32 %v3754_v37, %v1774_v46 }
0x1e54   : > { %v1777_v49 = vpop.f32.mrf.mxu2 }
0x1e55   : > { %v1778_v50 = vadd.f32 %v3754_v37, %v1777_v49 }
0x1e5c   : > { %v1780_v21 = vpop.f32.mrf.mxu2 }
0x1e5d   : > { %v1781_v52 = vadd.f32 %v3754_v37, %v1780_v21 }
0x1e64   : > { %v1783_v25 = vpop.f32.mrf.mxu2 }
0x1e65   : > { %v1784_v53 = vadd.f32 %v3754_v37, %v1783_v25 }
0x1e6c   : > { %v1786_v55 = vpop.f32.mrf.mxu2 }
0x1e6d   : > { %v1787_v56 = vadd.f32 %v3754_v37, %v1786_v55 }
0x1ea0   : > { %v1505_v26 = vpop.permute.xlu1 %1504 }
0x1ea1   : > { %v1507_v16 = vmul.f32 %v1505_v26, %v1499_v15 }
0x1ea3   : > { %1509 = vrot.lane.b32.xlu2 %v1507_v16, %s3284_s25 }
0x1efd   : > { %v1510_v17 = vpop.permute.xlu2 %1509 }
0x1efe   : > { %v3734_v24 = vadd.f32 %v1510_v17, %v1502_v22 }
0x1f00   : > { %3080 = vtanh.f32 %v3734_v24 }
0x1f01   : > { %3082 = vtanh.f32 %v1763_v38  ;;  %v1663_v38 = vld [vmem:[#allocation3 + $0x10] sm:$0xff] }
0x1f02   : > { %3084 = vtanh.f32 %v1766_v41 }
0x1f03   : > { %3086 = vtanh.f32 %v1769_v44 }
0x1f04   : > { %3088 = vtanh.f32 %v1772_v47 }
0x1f05   : > { %3090 = vtanh.f32 %v1775_v8 }
0x1f06   : > { %v3081_v18 = vpop.eup %3080  ;;  %3092 = vtanh.f32 %v1778_v50 }
0x1f07   : > { %1515 = vrot.lane.b32.xlu0 %v3081_v18, %s3283_s30  ;;  %v3083_v42 = vpop.eup %3082  ;;  %3094 = vtanh.f32 %v1781_v52 }
0x1f08   : > { %v3085_v45 = vpop.eup %3084  ;;  %3096 = vtanh.f32 %v1784_v53 }
0x1f09   : > { %v3087_v48 = vpop.eup %3086  ;;  %3098 = vtanh.f32 %v1787_v56 }
0x1f0a   : > { %v3089_v27 = vpop.eup %3088 }
0x1f0b   : > { %v3091_v51 = vpop.eup %3090 }
0x1f0c   : > { %v3093_v23 = vpop.eup %3092 }
0x1f0d   : > { %v3095_v54 = vpop.eup %3094 }
0x1f0e   : > { %v3097_v57 = vpop.eup %3096 }
0x1f0f   : > { %v3099_v59 = vpop.eup %3098 }
0x1f79   : > { %v1516_v19 = vpop.permute.xlu0 %1515 }
0x1f7a   : > { %v1518_v20 = vmul.f32 %v1516_v19, %v1499_v15 }
0x1f7c   : > { %1520 = vrot.lane.b32.xlu1 %v1518_v20, %s3284_s25 }
0x1fee   : > { %v1521_v40 = vpop.permute.xlu1 %1520 }
0x1fef   : > { %1524 = vst.msk [vmem:[#allocation3 + $0x68] sm:$0xff] %vm574_vm5, %v1521_v40  ;;  %2849 = vmatmul.msk.f32.vlgmr.msrb.gmra.mxu3 %vm574_vm5, %v1521_v40 }
0x1ff6   : > { %v1674_v29 = vld [vmem:[#allocation3 + $0x68] sm:$0xff] }
0x1ff7   : > { %2866 = vmatmul.msk.f32.gmra.mxu2 %vm574_vm5, %v1674_v29  ;;  %2873 = vmatmul.msk.f32.vlgmr.msra.gmra.mxu3 %vm443_vm0, %v3083_v42 }
0x1fff   : > { %2874 = vmatmul.msk.f32.gmra.mxu3 %vm443_vm0, %v3085_v45 }
0x2007   : > { %2875 = vmatmul.msk.f32.gmra.mxu3 %vm443_vm0, %v3087_v48 }
0x200f   : > { %2876 = vmatmul.msk.f32.gmra.mxu3 %vm443_vm0, %v3089_v27 }
0x2017   : > { %2877 = vmatmul.msk.f32.gmra.mxu3 %vm443_vm0, %v3091_v51 }
0x201f   : > { %2878 = vmatmul.msk.f32.gmra.mxu3 %vm443_vm0, %v3093_v23 }
0x2027   : > { %2879 = vmatmul.msk.f32.gmra.mxu3 %vm443_vm0, %v3095_v54 }
0x202f   : > { %2880 = vmatmul.msk.f32.gmra.mxu3 %vm443_vm0, %v3097_v57 }
0x2037   : > { %2881 = vmatmul.msk.f32.gmra.mxu3 %vm443_vm0, %v3099_v59 }
0x2072   : > { %v1546_v61 = vpop.f32.mrf.mxu3 }
0x2073   : > { %v1549_v62 = vadd.f32 %v1546_v61, %v552_v60 }
0x2075   : > { %3100 = vtanh.f32 %v1549_v62  ;;  %v2850_v7 = vmul.f32 -1.442695, %v1549_v62 }
0x207a   : > { %v1789_v63 = vpop.f32.mrf.mxu2 }
0x207b   : > { %v3101_v1 = vpop.eup %3100  ;;  %v1790_v3 = vadd.f32 %v3754_v37, %v1789_v63 }
0x207c   : > { %1572 = vrot.lane.b32.xlu2 %v3101_v1, %s3283_s30 }
0x207d   : > { %3102 = vtanh.f32 %v1790_v3 }
0x207e   : > { %3104 = vpow2.f32 %v2850_v7 }
0x2083   : > { %v3103_v4 = vpop.eup %3102 }
0x2084   : > { %2882 = vmatmul.msk.f32.gmra.mxu3 %vm443_vm0, %v3103_v4  ;;  %v3105_v9 = vpop.eup %3104 }
0x2085   : > { %v1553_v10 = vadd.f32 1.0, %v3105_v9 }
0x2087   : > { %3106 = vrcp.f32 %v1553_v10  ;;  %v1565_v2 = vand.u32 2147483648, %v1553_v10  ;;  %vm1559_vm2 = vweird.f32 %v1553_v10  ;;  %v1563_v13 = vand.u32 2147483647, %v1553_v10 }
0x2089   : > { %v1566_v30 = vor.u32 1.1754944e-38, %v1565_v2  ;;  %vm1564_vm4 = vcmp.eq.f32.partialorder %v1563_v13, 8.507059e+37  ;;  %v1897_v13 = vpop.f32.mrf.mxu3 }
0x208d   : > { %v3107_v11 = vpop.eup %3106 }
0x208e   : > { %v1555_v31 = vmul.f32 %v3107_v11, %v1553_v10  ;;  %vm1560_vm1 = vweird.f32 %v3107_v11 }
0x208f   : > { %vm1561_vm3 = vmor %vm1559_vm2, %vm1560_vm1  ;;  %vm2153_vm1 = vcmask 1046534   ;;  %vm2155_vm2 = vcmask 1047559  }
0x2090   : > { %v1556_v12 = vsub.f32 1.0, %v1555_v31 }
0x2092   : > { %v1557_v28 = vmul.f32 %v3107_v11, %v1556_v12 }
0x2094   : > { %v1558_v0 = vadd.f32 %v3107_v11, %v1557_v28 }
0x2096   : > { %v1562_v5 = vsel %vm1561_vm3, %v3107_v11, %v1558_v0  ;;  %vm2678_vm3 = vcmask 64512  }
0x2097   : > { %v1567_v6 = vsel %vm1564_vm4, %v1566_v30, %v1562_v5  ;;  %v1900_v5 = vpop.f32.mrf.mxu3  ;;  %vm2548_vm4 = vcmask 392192  }
0x2098   : > { %v1570_v15 = vmul.f32 %v1567_v6, %v3734_v24  ;;  %v1661_v24 = vld [vmem:[#allocation3] sm:$0xff] }
0x209f   : > { %v1903_v30 = vpop.f32.mrf.mxu3 }
0x20d6   : > { %v1573_v14 = vpop.permute.xlu2 %1572 }
0x20d7   : > { %v1575_v26 = vmul.f32 %v1573_v14, %v1567_v6  ;;  %v1906_v14 = vpop.f32.mrf.mxu3 }
0x20d9   : > { %1577 = vrot.lane.b32.xlu0 %v1575_v26, %s3284_s25 }
0x214b   : > { %v1578_v16 = vpop.permute.xlu0 %1577 }
0x214c   : > { %v3784_v22 = vadd.f32 %v1578_v16, %v1570_v15 }
0x214e   : > { %3108 = vtanh.f32 %v3784_v22 }
0x2154   : > { %v3109_v17 = vpop.eup %3108 }
0x2155   : > { %1583 = vrot.lane.b32.xlu1 %v3109_v17, %s3283_s30  ;;  %v2968_v17 = vld [vmem:[%s4345_s7] ss:$0 sm:$0xff] }
0x21c7   : > { %v1584_v18 = vpop.permute.xlu1 %1583 }
0x21c8   : > { %v1586_v19 = vmul.f32 %v1584_v18, %v1567_v6  ;;  %v1909_v6 = vpop.f32.mrf.mxu3  ;;  %v3822_v18 = vadd.f32 %v2968_v17, %v1900_v5 }
0x21ca   : > { %1588 = vrot.lane.b32.xlu2 %v1586_v19, %s3284_s25  ;;  %v3826_v19 = vadd.f32 %v2968_v17, %v1903_v30 }
0x21d0   : > { %v1912_v26 = vpop.f32.mrf.mxu3 }
0x21d8   : > { %v1915_v15 = vpop.f32.mrf.mxu3 }
0x21e0   : > { %v1918_v16 = vpop.f32.mrf.mxu3 }
0x2224   : > { %v1589_v20 = vpop.permute.xlu2 %1588 }
0x2225   : > { %1592 = vst.msk [vmem:[#allocation3 + $0x70] sm:$0xff] %vm574_vm5, %v1589_v20  ;;  %2851 = vmatmul.msk.f32.vlgmr.msra.gmra.mxu1 %vm574_vm5, %v1589_v20  ;;  %v1921_v20 = vpop.f32.mrf.mxu3 }
0x2226   : > { %1882 = vmatpush.msra.mxu1 %v3742_v33  ;;  %v555_v33 = vadd.f32 %v3687_v58, %v3583_v32 }
0x2228   : > { %1883 = vmatpush.msra.mxu1 %v3747_v34 }
0x222c   : > { %v1675_v35 = vld [vmem:[#allocation3 + $0x70] sm:$0xff] }
0x222d   : > { %2853 = vmatmul.msk.f32.vlgmr.msrb.gmra.mxu1 %vm574_vm5, %v1661_v24  ;;  %2867 = vmatmul.msk.f32.gmra.mxu2 %vm574_vm5, %v1675_v35  ;;  %v1940_v35 = vsel %vm1933_vm10, %v3822_v18, -inf }
0x2235   : > { %2854 = vmatmul.msk.f32.gmra.mxu1 %vm574_vm5, %v1662_v36  ;;  %v3830_v36 = vadd.f32 %v2968_v17, %v1906_v14 }
0x223d   : > { %2855 = vmatmul.msk.f32.gmra.mxu1 %vm574_vm5, %v1663_v38 }
0x2245   : > { %2856 = vmatmul.msk.f32.gmra.mxu1 %vm574_vm5, %v1664_v39  ;;  %v1942_v39 = vsel %vm1933_vm10, %v3826_v19, -inf }
0x22a2   : > { %v1614_v40 = vpop.f32.mrf.mxu1 }
0x22a3   : > { %v1617_v34 = vadd.f32 %v1614_v40, %v555_v33  ;;  %v3836_v33 = vadd.f32 %v2968_v17, %v1909_v6 }
0x22a5   : > { %3110 = vtanh.f32 %v1617_v34  ;;  %v2852_v51 = vmul.f32 -1.442695, %v1617_v34  ;;  %v1944_v34 = vsel %vm1933_vm10, %v3830_v36, -inf }
0x22aa   : > { %v1750_v41 = vpop.f32.mrf.mxu1 }
0x22ab   : > { %v3111_v42 = vpop.eup %3110  ;;  %v1751_v29 = vadd.f32 %v3754_v37, %v1750_v41  ;;  %v3840_v41 = vadd.f32 %v2968_v17, %v1912_v26 }
0x22ac   : > { %1640 = vrot.lane.b32.xlu0 %v3111_v42, %s3283_s30 }
0x22ad   : > { %3112 = vtanh.f32 %v1751_v29  ;;  %v1946_v29 = vsel %vm1933_vm10, %v3836_v33, -inf }
0x22b0   : > { %v1792_v43 = vpop.f32.mrf.mxu2 }
0x22b1   : > { %v1793_v44 = vadd.f32 %v3754_v37, %v1792_v43  ;;  %v3844_v43 = vadd.f32 %v2968_v17, %v1915_v15 }
0x22b2   : > { %v1753_v45 = vpop.f32.mrf.mxu1 }
0x22b3   : > { %v3113_v46 = vpop.eup %3112  ;;  %3114 = vtanh.f32 %v1793_v44  ;;  %v1754_v47 = vadd.f32 %v3754_v37, %v1753_v45  ;;  %v1924_v45 = vpop.f32.mrf.mxu3 }
0x22b4   : > { %2869 = vmatmul.msk.f32.vlgmr.msra.gmra.mxu1 %vm443_vm0, %v3113_v46  ;;  %v1948_v46 = vsel %vm1933_vm10, %v3840_v41, -inf }
0x22b5   : > { %3116 = vtanh.f32 %v1754_v47  ;;  %v3848_v47 = vadd.f32 %v2968_v17, %v1918_v16 }
0x22b9   : > { %v3115_v32 = vpop.eup %3114 }
0x22ba   : > { %v1756_v58 = vpop.f32.mrf.mxu1  ;;  %2883 = vmatmul.msk.f32.gmra.mxu3 %vm443_vm0, %v3115_v32 }
0x22bb   : > { %v3117_v48 = vpop.eup %3116  ;;  %v1757_v49 = vadd.f32 %v3754_v37, %v1756_v58 }
0x22bc   : > { %2870 = vmatmul.msk.f32.gmra.mxu1 %vm443_vm0, %v3117_v48  ;;  %v1950_v48 = vsel %vm1933_vm10, %v3844_v43, -inf }
0x22bd   : > { %3118 = vtanh.f32 %v1757_v49  ;;  %v3852_v49 = vadd.f32 %v2968_v17, %v1921_v20 }
0x22c2   : > { %v1759_v8 = vpop.f32.mrf.mxu1 }
0x22c3   : > { %v3119_v27 = vpop.eup %3118  ;;  %v1760_v50 = vadd.f32 %v3754_v37, %v1759_v8 }
0x22c4   : > { %2871 = vmatmul.msk.f32.gmra.mxu1 %vm443_vm0, %v3119_v27  ;;  %v1952_v27 = vsel %vm1933_vm10, %v3848_v47, -inf }
0x22c5   : > { %3120 = vtanh.f32 %v1760_v50  ;;  %v3856_v50 = vadd.f32 %v2968_v17, %v1924_v45 }
0x22c6   : > { %3122 = vpow2.f32 %v2852_v51  ;;  %v1954_v51 = vsel %vm1933_vm10, %v3852_v49, -inf }
0x22cb   : > { %v3121_v21 = vpop.eup %3120 }
0x22cc   : > { %2872 = vmatmul.msk.f32.gmra.mxu1 %vm443_vm0, %v3121_v21  ;;  %v3123_v52 = vpop.eup %3122 }
0x22cd   : > { %v1621_v23 = vadd.f32 1.0, %v3123_v52 }
0x22cf   : > { %3124 = vrcp.f32 %v1621_v23  ;;  %v1633_v57 = vand.u32 2147483648, %v1621_v23  ;;  %vm1627_vm7 = vweird.f32 %v1621_v23  ;;  %v1631_v59 = vand.u32 2147483647, %v1621_v23 }
0x22d1   : > { %v1634_v61 = vor.u32 1.1754944e-38, %v1633_v57  ;;  %vm1632_vm9 = vcmp.eq.f32.partialorder %v1631_v59, 8.507059e+37 }
0x22d5   : > { %v3125_v25 = vpop.eup %3124 }
0x22d6   : > { %v1623_v53 = vmul.f32 %v3125_v25, %v1621_v23  ;;  %vm1628_vm6 = vweird.f32 %v3125_v25 }
0x22d7   : > { %vm1629_vm8 = vmor %vm1627_vm7, %vm1628_vm6  ;;  %vm2550_vm6 = vcmask 523264  }
0x22d8   : > { %v1624_v54 = vsub.f32 1.0, %v1623_v53  ;;  %v1956_v53 = vsel %vm1933_vm10, %v3856_v50, -inf }
0x22da   : > { %v1625_v55 = vmul.f32 %v3125_v25, %v1624_v54 }
0x22dc   : > { %v1626_v56 = vadd.f32 %v3125_v25, %v1625_v55 }
0x22de   : > { %v1630_v60 = vsel %vm1629_vm8, %v3125_v25, %v1626_v56 }
0x22df   : > { %v1635_v63 = vsel %vm1632_vm9, %v1634_v61, %v1630_v60 }
0x22e0   : > { %v1638_v3 = vmul.f32 %v1635_v63, %v3784_v22 }
0x231e   : > { %v1641_v62 = vpop.permute.xlu0 %1640 }
0x231f   : > { %v1643_v1 = vmul.f32 %v1641_v62, %v1635_v63 }
0x2321   : > { %1645 = vrot.lane.b32.xlu1 %v1643_v1, %s3284_s25 }
0x2331   : > { %v1885_v22 = vpop.f32.mrf.mxu1 }
0x2332   : > { %v1886_v52 = vadd.f32 %v2968_v17, %v1885_v22 }
0x2334   : > { %v1934_v56 = vsel %vm1933_vm10, %v1886_v52, -inf }
0x2339   : > { %v1888_v24 = vpop.f32.mrf.mxu1 }
0x233a   : > { %v1889_v54 = vadd.f32 %v2968_v17, %v1888_v24 }
0x233c   : > { %v1935_v61 = vsel %vm1933_vm10, %v1889_v54, -inf }
0x233d   : > { %v1927_v25 = vpop.f32.mrf.mxu3 }
0x233e   : > { %v3863_v57 = vadd.f32 %v2968_v17, %v1927_v25 }
0x2340   : > { %v1958_v1 = vsel %vm1933_vm10, %v3863_v57, -inf }
0x2341   : > { %v1891_v58 = vpop.f32.mrf.mxu1 }
0x2342   : > { %v1892_v62 = vadd.f32 %v2968_v17, %v1891_v58 }
0x2349   : > { %v1894_v60 = vpop.f32.mrf.mxu1 }
0x2393   : > { %v1646_v4 = vpop.permute.xlu1 %1645 }
0x2394   : > { %v1648_v7 = vadd.f32 %v1646_v4, %v1638_v3  ;;  %v1895_v3 = vadd.f32 %v2968_v17, %v1894_v60 }
0x2396   : > { %3126 = vtanh.f32 %v1648_v7  ;;  %v1936_v7 = vsel %vm1933_vm10, %v1892_v62, -inf }
0x239c   : > { %v3127_v9 = vpop.eup %3126 }
0x239d   : > { %1651 = vrot.lane.b32.xlu2 %v3127_v9, %s3283_s30  ;;  %s3225_s30 = sshra.s32 %s2703_s27, 4  ;;  %s3226_s30 = int_to_ptr.hbm [resolvable:$true] %s3225_s30 }
0x239e   : > { %s3227_s28 = scalar_lea.hbm %s3226_s30, 8  ;;  %p3232_p4 = scmp.lt.s32.totalorder %s3226_s30, %s4349_s11 }
0x239f   : > { %p3228_p13 = scmp.ne.s32.totalorder %s3226_s30, %s3227_s28 }
0x23a1   : > { %p3229_p0 = pnand %p3228_p13, %p3401_p11 }
0x23a3   : > { %p3230_p3 = pneg %p3229_p0 }
0x23f7   : > { %v1652_v10 = vpop.permute.xlu2 %1651 }
0x23f8   : > { %v1654_v11 = vmul.f32 %v1652_v10, %v1635_v63  ;;  %v1937_v10 = vsel %vm1933_vm10, %v1895_v3, -inf }
0x23fa   : > { %1656 = vrot.lane.b32.xlu0 %v1654_v11, %s3284_s25 }
0x246c   : > { %v1657_v31 = vpop.permute.xlu0 %1656 }
0x246d   : > { %1660 = vst.msk [vmem:[#allocation3 + $0x78] sm:$0xff] %vm574_vm5, %v1657_v31 }
0x2474   : > { %v1676_v12 = vld [vmem:[#allocation3 + $0x78] sm:$0xff] }
0x2475   : > { %2868 = vmatmul.msk.f32.gmra.mxu2 %vm574_vm5, %v1676_v12 }
0x24f8   : > { %v1795_v28 = vpop.f32.mrf.mxu2 }
0x24f9   : > { %v1796_v0 = vadd.f32 %v3754_v37, %v1795_v28  ;;  %v3824_v37 = vadd.f32 %v2968_v17, %v1897_v13 }
0x24fb   : > { %3128 = vtanh.f32 %v1796_v0  ;;  %v1938_v38 = vsel %vm1933_vm10, %v3824_v37, -inf }
0x24fc   : > { %v1939_v40 = vmax.f32 %v1940_v35, %v1938_v38 }
0x24fe   : > { %v1947_v42 = vmax.f32 %v1939_v40, %v1942_v39 }
0x2500   : > { %v1955_v44 = vmax.f32 %v1947_v42, %v1944_v34 }
0x2501   : > { %v3129_v2 = vpop.eup %3128 }
0x2502   : > { %2884 = vmatmul.msk.f32.gmra.mxu3 %vm443_vm0, %v3129_v2  ;;  %v1941_v32 = vmax.f32 %v1946_v29, %v1955_v44 }
0x2504   : > { %v1949_v8 = vmax.f32 %v1941_v32, %v1948_v46 }
0x2506   : > { %v1957_v21 = vmax.f32 %v1949_v8, %v1950_v48 }
0x2508   : > { %v1943_v23 = vmax.f32 %v1952_v27, %v1957_v21 }
0x250a   : > { %v1951_v55 = vmax.f32 %v1943_v23, %v1954_v51 }
0x250c   : > { %v1945_v59 = vmax.f32 %v1956_v53, %v1951_v55  ;;  %v3285_v55 = vmov 0  }
0x250d   : > { %2956 = vset.pattern.permute.xlu0 %v3285_v55  ;;  %2955 = vset.pattern.permute.xlu2 %v3285_v55 }
0x250e   : > { %v1953_v63 = vmax.f32 %v1945_v59, %v1934_v56  ;;  %2954 = vset.pattern.permute.xlu1 %v3285_v55 }
0x2510   : > { %v1959_v4 = vmax.f32 %v1935_v61, %v1953_v63 }
0x2512   : > { %v1961_v9 = vmax.f32 %v1958_v1, %v1959_v4 }
0x2514   : > { %v1962_v11 = vmax.f32 %v1936_v7, %v1961_v9 }
0x2516   : > { %v1963_v28 = vmax.f32 %v1937_v10, %v1962_v11 }
0x2585   : > { %v1930_v31 = vpop.f32.mrf.mxu3 }
0x2586   : > { %v3870_v12 = vadd.f32 %v2968_v17, %v1930_v31 }
0x2588   : > { %v1960_v0 = vsel %vm1933_vm10, %v3870_v12, -inf }
0x2589   : > { %v3874_v2 = vmax.f32 %v1960_v0, %v1963_v28 }
0x258b   : > { %v1965_v13 = vsub.f32 %v1886_v52, %v3874_v2  ;;  %v1966_v5 = vsub.f32 %v1889_v54, %v3874_v2  ;;  %v1967_v30 = vsub.f32 %v1892_v62, %v3874_v2  ;;  %v1968_v14 = vsub.f32 %v1895_v3, %v3874_v2 }
0x258c   : > { %v1969_v6 = vsub.f32 %v3824_v37, %v3874_v2  ;;  %v1970_v22 = vsub.f32 %v3822_v18, %v3874_v2  ;;  %v1971_v20 = vsub.f32 %v3826_v19, %v3874_v2  ;;  %v1972_v35 = vsub.f32 %v3830_v36, %v3874_v2 }
0x258d   : > { %v1981_v26 = vmul.f32 1.442695, %v1965_v13  ;;  %v1983_v15 = vmul.f32 1.442695, %v1966_v5  ;;  %v1985_v16 = vmul.f32 1.442695, %v1967_v30  ;;  %v1973_v37 = vsub.f32 %v3836_v33, %v3874_v2 }
0x258e   : > { %v1987_v17 = vmul.f32 1.442695, %v1968_v14  ;;  %v1989_v24 = vmul.f32 1.442695, %v1969_v6  ;;  %v1991_v38 = vmul.f32 1.442695, %v1970_v22  ;;  %v1974_v19 = vsub.f32 %v3840_v41, %v3874_v2 }
0x258f   : > { %3130 = vpow2.f32 %v1981_v26  ;;  %v1993_v39 = vmul.f32 1.442695, %v1971_v20  ;;  %v1995_v34 = vmul.f32 1.442695, %v1972_v35  ;;  %v1975_v44 = vsub.f32 %v3844_v43, %v3874_v2 }
0x2590   : > { %3132 = vpow2.f32 %v1983_v15  ;;  %v1997_v45 = vmul.f32 1.442695, %v1973_v37  ;;  %v1976_v58 = vsub.f32 %v3848_v47, %v3874_v2  ;;  %v1999_v48 = vmul.f32 1.442695, %v1974_v19 }
0x2591   : > { %3134 = vpow2.f32 %v1985_v16  ;;  %v1977_v43 = vsub.f32 %v3852_v49, %v3874_v2  ;;  %v2001_v51 = vmul.f32 1.442695, %v1975_v44  ;;  %v1978_v47 = vsub.f32 %v3856_v50, %v3874_v2 }
0x2592   : > { %3136 = vpow2.f32 %v1987_v17  ;;  %v2003_v53 = vmul.f32 1.442695, %v1976_v58  ;;  %v1979_v59 = vsub.f32 %v3863_v57, %v3874_v2  ;;  %v1980_v63 = vsub.f32 %v3870_v12, %v3874_v2 }
0x2593   : > { %3138 = vpow2.f32 %v1989_v24  ;;  %v2005_v60 = vmul.f32 1.442695, %v1977_v43  ;;  %v2007_v1 = vmul.f32 1.442695, %v1978_v47  ;;  %v3287_v43 = vmov 2  }
0x2594   : > { %3140 = vpow2.f32 %v1991_v38  ;;  %v2009_v9 = vmul.f32 1.442695, %v1979_v59  ;;  %v2011_v31 = vmul.f32 1.442695, %v1980_v63  ;;  %v2125_v47 = vlaneseq }
0x2595   : > { %v3890_v40 = vpop.eup %3130  ;;  %3142 = vpow2.f32 %v1993_v39 }
0x2596   : > { %v3892_v18 = vpop.eup %3132  ;;  %v2013_v42 = vsel %vm1933_vm10, %v3890_v40, 0.0  ;;  %3144 = vpow2.f32 %v1995_v34 }
0x2597   : > { %v3898_v36 = vpop.eup %3134  ;;  %v2014_v29 = vsel %vm1933_vm10, %v3892_v18, 0.0  ;;  %3146 = vpow2.f32 %v1997_v45 }
0x2598   : > { %v3902_v33 = vpop.eup %3136  ;;  %v2015_v46 = vadd.f32 %v2014_v29, %v2013_v42  ;;  %v2016_v41 = vsel %vm1933_vm10, %v3898_v36, 0.0  ;;  %3148 = vpow2.f32 %v1999_v48 }
0x2599   : > { %v3908_v32 = vpop.eup %3138  ;;  %v2018_v27 = vsel %vm1933_vm10, %v3902_v33, 0.0  ;;  %3150 = vpow2.f32 %v2001_v51  ;;  %v3288_v51 = vmov 3  }
0x259a   : > { %v2017_v8 = vadd.f32 %v2016_v41, %v2015_v46  ;;  %v3914_v21 = vpop.eup %3140  ;;  %v2020_v23 = vsel %vm1933_vm10, %v3908_v32, 0.0  ;;  %3152 = vpow2.f32 %v2003_v53  ;;  %v4021_v53 = vand.u32 127, %v2125_v47 }
0x259b   : > { %v3920_v25 = vpop.eup %3142  ;;  %v2022_v49 = vsel %vm1933_vm10, %v3914_v21, 0.0  ;;  %3154 = vpow2.f32 %v2005_v60 }
0x259c   : > { %v2019_v52 = vadd.f32 %v2018_v27, %v2017_v8  ;;  %v3145_v56 = vpop.eup %3144  ;;  %v2024_v50 = vsel %vm1933_vm10, %v3920_v25, 0.0  ;;  %3156 = vpow2.f32 %v2007_v1  ;;  %v3286_v8 = vmov 1  }
0x259d   : > { %v3147_v62 = vpop.eup %3146  ;;  %v2026_v4 = vsel %vm1933_vm10, %v3145_v56, 0.0  ;;  %3158 = vpow2.f32 %v2009_v9 }
0x259e   : > { %v2021_v54 = vadd.f32 %v2020_v23, %v2019_v52  ;;  %v3149_v7 = vpop.eup %3148  ;;  %v2028_v57 = vsel %vm1933_vm10, %v3147_v62, 0.0  ;;  %3160 = vpow2.f32 %v2011_v31 }
0x259f   : > { %v3151_v11 = vpop.eup %3150  ;;  %v2030_v0 = vsel %vm1933_vm10, %v3149_v7, 0.0 }
0x25a0   : > { %v2023_v61 = vadd.f32 %v2022_v49, %v2021_v54  ;;  %v3153_v13 = vpop.eup %3152  ;;  %v2032_v2 = vsel %vm1933_vm10, %v3151_v11, 0.0 }
0x25a1   : > { %v3155_v5 = vpop.eup %3154  ;;  %v2034_v14 = vsel %vm1933_vm10, %v3153_v13, 0.0 }
0x25a2   : > { %v2025_v3 = vadd.f32 %v2024_v50, %v2023_v61  ;;  %v3157_v6 = vpop.eup %3156  ;;  %v2036_v15 = vsel %vm1933_vm10, %v3155_v5, 0.0 }
0x25a3   : > { %v3159_v16 = vpop.eup %3158  ;;  %v2038_v17 = vsel %vm1933_vm10, %v3157_v6, 0.0 }
0x25a4   : > { %v2027_v10 = vadd.f32 %v2026_v4, %v2025_v3  ;;  %v3161_v20 = vpop.eup %3160  ;;  %v2040_v35 = vsel %vm1933_vm10, %v3159_v16, 0.0 }
0x25a5   : > { %v2042_v37 = vsel %vm1933_vm10, %v3161_v20, 0.0 }
0x25a6   : > { %v2029_v28 = vadd.f32 %v2028_v57, %v2027_v10 }
0x25a8   : > { %v2031_v12 = vadd.f32 %v2030_v0, %v2029_v28 }
0x25aa   : > { %v2033_v30 = vadd.f32 %v2032_v2, %v2031_v12 }
0x25ac   : > { %v2035_v26 = vadd.f32 %v2034_v14, %v2033_v30 }
0x25ae   : > { %v2037_v22 = vadd.f32 %v2036_v15, %v2035_v26 }
0x25b0   : > { %v2039_v24 = vadd.f32 %v2038_v17, %v2037_v22 }
0x25b2   : > { %v2041_v38 = vadd.f32 %v2040_v35, %v2039_v24 }
0x25b4   : > { %v2043_v39 = vadd.f32 %v2042_v37, %v2041_v38 }
0x25b6   : > { %3162 = vrcp.f32 %v2043_v39 }
0x25bc   : > { %v3163_v19 = vpop.eup %3162 }
0x25bd   : > { %v3942_v34 = vmul.f32 %v3163_v19, %v3898_v36  ;;  %v3945_v42 = vmul.f32 %v3163_v19, %v3892_v18  ;;  %v3948_v29 = vmul.f32 %v3163_v19, %v3890_v40  ;;  %v3953_v44 = vmul.f32 %v3163_v19, %v3145_v56 }
0x25be   : > { %v3956_v45 = vmul.f32 %v3163_v19, %v3908_v32  ;;  %v3959_v36 = vmul.f32 %v3163_v19, %v3902_v33  ;;  %v3964_v40 = vmul.f32 %v3163_v19, %v3151_v11  ;;  %v3967_v18 = vmul.f32 %v3163_v19, %v3920_v25 }
0x25bf   : > { %2084 = vperm.xlu0 %2956, %v3942_v34   ;;  %2081 = vperm.xlu2 %2955, %v3945_v42   ;;  %v3970_v46 = vmul.f32 %v3163_v19, %v3914_v21  ;;  %v3975_v33 = vmul.f32 %v3163_v19, %v3157_v6  ;;  %v3977_v41 = vmul.f32 %v3163_v19, %v3149_v7  ;;  %v2552_v31 = vsel %vm1933_vm10, %v3948_v29, 0.0 }
0x25c0   : > { %2078 = vperm.xlu1 %2954, %v3948_v29   ;;  %v3979_v32 = vmul.f32 %v3163_v19, %v3147_v62  ;;  %v3984_v58 = vmul.f32 %v3163_v19, %v3155_v5  ;;  %v3986_v48 = vmul.f32 %v3163_v19, %v3153_v13  ;;  %v3991_v27 = vmul.f32 %v3163_v19, %v3161_v20 }
0x25c1   : > { %v3993_v21 = vmul.f32 %v3163_v19, %v3159_v16  ;;  %v2561_v16 = vsel %vm1933_vm10, %v3959_v36, 0.0  ;;  %v2567_v39 = vsel %vm1933_vm10, %v3970_v46, 0.0 }
0x25c7   : > { %2099 = vperm.xlu0 %2956, %v3953_v44   ;;  %2090 = vperm.xlu2 %2955, %v3956_v45  }
0x25c8   : > { %2087 = vperm.xlu1 %2954, %v3959_v36  }
0x25cf   : > { %2108 = vperm.xlu0 %2956, %v3964_v40   ;;  %2096 = vperm.xlu2 %2955, %v3967_v18  }
0x25d0   : > { %2093 = vperm.xlu1 %2954, %v3970_v46  }
0x25d7   : > { %2117 = vperm.xlu0 %2956, %v3975_v33   ;;  %2105 = vperm.xlu2 %2955, %v3977_v41  }
0x25d8   : > { %2102 = vperm.xlu1 %2954, %v3979_v32  }
0x25df   : > { %2959 = vset.pattern.permute.xlu0 %v3286_v8  ;;  %2114 = vperm.xlu2 %2955, %v3984_v58  }
0x25e0   : > { %2111 = vperm.xlu1 %2954, %v3986_v48   ;;  %2235 = vperm.xlu0 %2959, %v3984_v58  }
0x25e7   : > { %2123 = vperm.xlu2 %2955, %v3991_v27  }
0x25e8   : > { %2120 = vperm.xlu1 %2954, %v3993_v21   ;;  %2962 = vset.pattern.permute.xlu0 %v3287_v43 }
0x25e9   : > { %2347 = vperm.xlu0 %2962, %v3984_v58  }
0x25ef   : > { %2958 = vset.pattern.permute.xlu2 %v3286_v8 }
0x25f0   : > { %2957 = vset.pattern.permute.xlu1 %v3286_v8  ;;  %2202 = vperm.xlu2 %2958, %v3945_v42  }
0x25f1   : > { %2199 = vperm.xlu1 %2957, %v3948_v29   ;;  %2356 = vperm.xlu0 %2962, %v3991_v27  }
0x25f8   : > { %2208 = vperm.xlu2 %2958, %v3959_v36  }
0x25f9   : > { %2205 = vperm.xlu1 %2957, %v3942_v34   ;;  %2963 = vset.pattern.permute.xlu0 %v3288_v51 }
0x25fa   : > { %2423 = vperm.xlu0 %2963, %v3948_v29  }
0x2600   : > { %2214 = vperm.xlu2 %2958, %v3970_v46  }
0x2601   : > { %2211 = vperm.xlu1 %2957, %v3956_v45  }
0x2602   : > { %2426 = vperm.xlu0 %2963, %v3945_v42  }
0x2608   : > { %2220 = vperm.xlu2 %2958, %v3953_v44  }
0x2609   : > { %2217 = vperm.xlu1 %2957, %v3967_v18  }
0x260a   : > { %2432 = vperm.xlu0 %2963, %v3959_v36  }
0x2610   : > { %2226 = vperm.xlu2 %2958, %v3977_v41  }
0x2611   : > { %2223 = vperm.xlu1 %2957, %v3979_v32  }
0x2612   : > { %2435 = vperm.xlu0 %2963, %v3956_v45  }
0x2618   : > { %2232 = vperm.xlu2 %2958, %v3986_v48  }
0x2619   : > { %2229 = vperm.xlu1 %2957, %v3964_v40   ;;  %v2082_v52 = vpop.permute.xlu2 %2081 }
0x261a   : > { %2447 = vperm.xlu0 %2963, %v3979_v32   ;;  %v2128_v59 = vperm.slane %v2082_v52, %v4021_v53 }
0x2620   : > { %2241 = vperm.xlu2 %2958, %v3993_v21  }
0x2621   : > { %2238 = vperm.xlu1 %2957, %v3975_v33   ;;  %v2091_v23 = vpop.permute.xlu2 %2090 }
0x2622   : > { %v2131_v10 = vperm.slane %v2091_v23, %v4021_v53 }
0x2628   : > { %2961 = vset.pattern.permute.xlu2 %v3287_v43 }
0x2629   : > { %2244 = vperm.xlu1 %2957, %v3991_v27   ;;  %2326 = vperm.xlu2 %2961, %v3970_v46   ;;  %v2097_v25 = vpop.permute.xlu2 %2096 }
0x262a   : > { %v2133_v28 = vperm.slane %v2097_v25, %v4021_v53 }
0x2631   : > { %2960 = vset.pattern.permute.xlu1 %v3287_v43  ;;  %v2085_v54 = vpop.permute.xlu0 %2084  ;;  %2964 = vset.pattern.permute.xlu2 %v3288_v51  ;;  %v2106_v55 = vpop.permute.xlu2 %2105 }
0x2632   : > { %v2129_v49 = vperm.slane %v2085_v54, %v4021_v53  ;;  %2311 = vperm.xlu1 %2960, %v3948_v29   ;;  %v2079_v56 = vpop.permute.xlu1 %2078  ;;  %2429 = vperm.xlu2 %2964, %v3942_v34   ;;  %v2136_v26 = vperm.slane %v2106_v55, %v4021_v53 }
0x2633   : > { %v2127_v60 = vperm.slane %v2079_v56, %v4021_v53  ;;  %v2579_v56 = vsel %vm1933_vm10, %v3977_v41, 0.0 }
0x2635   : > { %v2144_v61 = vsel %vm2143_vm11, %v2128_v59, %v2127_v60 }
0x2636   : > { %v2146_v50 = vsel %vm2145_vm12, %v2129_v49, %v2144_v61  ;;  %v2555_v61 = vsel %vm1933_vm10, %v3945_v42, 0.0 }
0x2639   : > { %v2100_v62 = vpop.permute.xlu0 %2099  ;;  %v2115_v63 = vpop.permute.xlu2 %2114 }
0x263a   : > { %2314 = vperm.xlu1 %2960, %v3945_v42   ;;  %v2088_v1 = vpop.permute.xlu1 %2087  ;;  %2438 = vperm.xlu2 %2964, %v3970_v46   ;;  %v2134_v13 = vperm.slane %v2100_v62, %v4021_v53  ;;  %v2139_v19 = vperm.slane %v2115_v63, %v4021_v53  ;;  %v2573_v46 = vsel %vm1933_vm10, %v3953_v44, 0.0  ;;  %v2564_v42 = vsel %vm1933_vm10, %v3956_v45, 0.0 }
0x263b   : > { %v2130_v3 = vperm.slane %v2088_v1, %v4021_v53  ;;  %v2585_v1 = vsel %vm1933_vm10, %v3986_v48, 0.0 }
0x263d   : > { %v2148_v4 = vsel %vm2147_vm13, %v2130_v3, %v2146_v50 }
0x263e   : > { %v2150_v0 = vsel %vm2149_vm14, %v2131_v10, %v2148_v4 }
0x2641   : > { %v2109_v7 = vpop.permute.xlu0 %2108  ;;  %v4035_v9 = vpop.permute.xlu2 %2123 }
0x2642   : > { %2317 = vperm.xlu1 %2960, %v3942_v34   ;;  %v2094_v57 = vpop.permute.xlu1 %2093  ;;  %2450 = vperm.xlu2 %2964, %v3977_v41   ;;  %v2137_v22 = vperm.slane %v2109_v7, %v4021_v53 }
0x2643   : > { %v2132_v11 = vperm.slane %v2094_v57, %v4021_v53 }
0x2644   : > { %2553 = vadd.xlane.f32.xlu0 %v2552_v31 }
0x2645   : > { %v2152_v12 = vsel %vm2151_vm15, %v2132_v11, %v2150_v0 }
0x2646   : > { %v2154_v2 = vsel %vm2153_vm1, %v2133_v28, %v2152_v12  ;;  %v2591_v28 = vsel %vm1933_vm10, %v3975_v33, 0.0 }
0x2647   : > { %v4049_v5 = vsel %vm2155_vm2, %v2134_v13, %v2154_v2 }
0x2649   : > { %v2118_v30 = vpop.permute.xlu0 %2117 }
0x264a   : > { %2320 = vperm.xlu1 %2960, %v3959_v36   ;;  %v2103_v14 = vpop.permute.xlu1 %2102  ;;  %v2203_v6 = vpop.permute.xlu2 %2202  ;;  %v2140_v29 = vperm.slane %v2118_v30, %v4021_v53 }
0x264b   : > { %v2135_v15 = vperm.slane %v2103_v14, %v4021_v53  ;;  %v2247_v50 = vperm.slane %v2203_v6, %v4021_v53  ;;  %v2570_v14 = vsel %vm1933_vm10, %v3967_v18, 0.0 }
0x264c   : > { %2562 = vadd.xlane.f32.xlu0 %v2561_v16  ;;  %v2597_v16 = vsel %vm1933_vm10, %v3991_v27, 0.0 }
0x264d   : > { %v2157_v17 = vsel %vm2143_vm11, %v2136_v26, %v2135_v15 }
0x264e   : > { %v2158_v20 = vsel %vm2145_vm12, %v2137_v22, %v2157_v17 }
0x2652   : > { %2323 = vperm.xlu1 %2960, %v3956_v45   ;;  %v2112_v24 = vpop.permute.xlu1 %2111  ;;  %v4060_v35 = vpop.permute.xlu0 %2235 }
0x2653   : > { %v2138_v38 = vperm.slane %v2112_v24, %v4021_v53  ;;  %v2209_v37 = vpop.permute.xlu2 %2208 }
0x2654   : > { %2568 = vadd.xlane.f32.xlu0 %v2567_v39  ;;  %v2249_v57 = vperm.slane %v2209_v37, %v4021_v53 }
0x2655   : > { %v2159_v36 = vsel %vm2147_vm13, %v2138_v38, %v2158_v20  ;;  %v2576_v38 = vsel %vm1933_vm10, %v3979_v32, 0.0 }
0x2656   : > { %v2160_v8 = vsel %vm2149_vm14, %v2139_v19, %v2159_v36 }
0x2657   : > { %v2161_v43 = vsel %vm2151_vm15, %v2140_v29, %v2160_v8  ;;  %v2582_v29 = vsel %vm1933_vm10, %v3964_v40, 0.0 }
0x265a   : > { %2329 = vperm.xlu1 %2960, %v3967_v18   ;;  %v2121_v52 = vpop.permute.xlu1 %2120 }
0x265b   : > { %v2141_v23 = vperm.slane %v2121_v52, %v4021_v53  ;;  %v2215_v25 = vpop.permute.xlu2 %2214  ;;  %v4072_v47 = vpop.permute.xlu0 %2347 }
0x265c   : > { %2574 = vadd.xlane.f32.xlu0 %v2573_v46  ;;  %v2251_v6 = vperm.slane %v2215_v25, %v4021_v53 }
0x265d   : > { %v4077_v54 = vsel %vm2153_vm1, %v2141_v23, %v2161_v43 }
0x2662   : > { %2332 = vperm.xlu1 %2960, %v3953_v44  }
0x2663   : > { %v4080_v55 = vpop.permute.xlu2 %2220  ;;  %v2200_v49 = vpop.permute.xlu1 %2199 }
0x2664   : > { %v4084_v59 = vpop.permute.xlu0 %2356  ;;  %2580 = vadd.xlane.f32.xlu0 %v2579_v56  ;;  %v2246_v60 = vperm.slane %v2200_v49, %v4021_v53  ;;  %v2258_v49 = vperm.slane %v4060_v35, %v4021_v53  ;;  %v2588_v35 = vsel %vm1933_vm10, %v3984_v58, 0.0 }
0x2666   : > { %v2262_v7 = vsel %vm2143_vm11, %v2247_v50, %v2246_v60 }
0x266a   : > { %2335 = vperm.xlu1 %2960, %v3979_v32  }
0x266b   : > { %v2227_v62 = vpop.permute.xlu2 %2226  ;;  %v2206_v63 = vpop.permute.xlu1 %2205  ;;  %2556 = vadd.xlane.f32.xlu2 %v2555_v61 }
0x266c   : > { %v2248_v3 = vperm.slane %v2206_v63, %v4021_v53  ;;  %v2424_v4 = vpop.permute.xlu0 %2423  ;;  %2586 = vadd.xlane.f32.xlu0 %v2585_v1  ;;  %v2255_v36 = vperm.slane %v2227_v62, %v4021_v53 }
0x266d   : > { %v2470_v12 = vperm.slane %v2424_v4, %v4021_v53 }
0x266e   : > { %v2263_v10 = vsel %vm2145_vm12, %v2248_v3, %v2262_v7 }
0x266f   : > { %v2264_v2 = vsel %vm2147_vm13, %v2249_v57, %v2263_v10 }
0x2672   : > { %2338 = vperm.xlu1 %2960, %v3977_v41  }
0x2673   : > { %v2233_v11 = vpop.permute.xlu2 %2232  ;;  %v2212_v31 = vpop.permute.xlu1 %2211  ;;  %2565 = vadd.xlane.f32.xlu2 %v2564_v42 }
0x2674   : > { %v2250_v0 = vperm.slane %v2212_v31, %v4021_v53  ;;  %v2427_v13 = vpop.permute.xlu0 %2426  ;;  %2592 = vadd.xlane.f32.xlu0 %v2591_v28  ;;  %v2257_v32 = vperm.slane %v2233_v11, %v4021_v53 }
0x2675   : > { %v2471_v41 = vperm.slane %v2427_v13, %v4021_v53 }
0x2676   : > { %v2265_v45 = vsel %vm2149_vm14, %v2250_v0, %v2264_v2 }
0x2677   : > { %v2486_v30 = vsel %vm2143_vm11, %v2471_v41, %v2470_v12  ;;  %v2266_v17 = vsel %vm2151_vm15, %v2251_v6, %v2265_v45 }
0x267a   : > { %2341 = vperm.xlu1 %2960, %v3964_v40  }
0x267b   : > { %v2242_v26 = vpop.permute.xlu2 %2241  ;;  %v2218_v15 = vpop.permute.xlu1 %2217  ;;  %2571 = vadd.xlane.f32.xlu2 %v2570_v14 }
0x267c   : > { %v2252_v22 = vperm.slane %v2218_v15, %v4021_v53  ;;  %2598 = vadd.xlane.f32.xlu0 %v2597_v16  ;;  %v2433_v24 = vpop.permute.xlu0 %2432  ;;  %v2260_v42 = vperm.slane %v2242_v26, %v4021_v53  ;;  %v2558_v15 = vsel %vm1933_vm10, %v3942_v34, 0.0 }
0x267d   : > { %v2473_v56 = vperm.slane %v2433_v24, %v4021_v53 }
0x267e   : > { %v4117_v20 = vsel %vm2153_vm1, %v2252_v22, %v2266_v17 }
0x2682   : > { %2344 = vperm.xlu1 %2960, %v3986_v48  }
0x2683   : > { %v2224_v37 = vpop.permute.xlu1 %2223  ;;  %v4122_v39 = vpop.permute.xlu2 %2326  ;;  %2577 = vadd.xlane.f32.xlu2 %v2576_v38 }
0x2684   : > { %v2254_v19 = vperm.slane %v2224_v37, %v4021_v53  ;;  %v2436_v43 = vpop.permute.xlu0 %2435 }
0x2685   : > { %v2474_v61 = vperm.slane %v2436_v43, %v4021_v53 }
0x2686   : > { %v2269_v25 = vsel %vm2143_vm11, %v2255_v36, %v2254_v19 }
0x268a   : > { %2350 = vperm.xlu1 %2960, %v3975_v33  }
0x268b   : > { %v2230_v8 = vpop.permute.xlu1 %2229  ;;  %2583 = vadd.xlane.f32.xlu2 %v2582_v29 }
0x268c   : > { %v2256_v52 = vperm.slane %v2230_v8, %v4021_v53  ;;  %v2430_v23 = vpop.permute.xlu2 %2429  ;;  %v4163_v12 = vpop.permute.xlu0 %2447 }
0x268d   : > { %v2472_v46 = vperm.slane %v2430_v23, %v4021_v53 }
0x268e   : > { %v2270_v60 = vsel %vm2145_vm12, %v2256_v52, %v2269_v25 }
0x268f   : > { %v2271_v50 = vsel %vm2147_vm13, %v2257_v32, %v2270_v60  ;;  %v2487_v62 = vsel %vm2145_vm12, %v2472_v46, %v2486_v30 }
0x2690   : > { %v2488_v63 = vsel %vm2147_vm13, %v2473_v56, %v2487_v62  ;;  %2453 = vperm.xlu0 %2963, %v3964_v40   ;;  %v2272_v1 = vsel %vm2149_vm14, %v2258_v49, %v2271_v50  ;;  %v2594_v40 = vsel %vm1933_vm10, %v3993_v21, 0.0 }
0x2691   : > { %v4144_v3 = vsel %vm2149_vm14, %v2474_v61, %v2488_v63 }
0x2692   : > { %2353 = vperm.xlu1 %2960, %v3993_v21  }
0x2693   : > { %v2239_v4 = vpop.permute.xlu1 %2238  ;;  %2589 = vadd.xlane.f32.xlu2 %v2588_v35  ;;  %v2478_v35 = vperm.slane %v4163_v12, %v4021_v53 }
0x2694   : > { %v2259_v7 = vperm.slane %v2239_v4, %v4021_v53 }
0x2696   : > { %v2273_v10 = vsel %vm2151_vm15, %v2259_v7, %v2272_v1 }
0x2697   : > { %v2274_v31 = vsel %vm2153_vm1, %v2260_v42, %v2273_v10 }
0x2698   : > { %2444 = vperm.xlu0 %2963, %v3953_v44  }
0x269a   : > { %2965 = vset.pattern.permute.xlu1 %v3288_v51 }
0x269b   : > { %2441 = vperm.xlu1 %2965, %v3967_v18   ;;  %v2245_v57 = vpop.permute.xlu1 %2244  ;;  %2595 = vadd.xlane.f32.xlu2 %v2594_v40  ;;  %v2370_v40 = vperm.slane %v4072_v47, %v4021_v53 }
0x269c   : > { %v2261_v11 = vperm.slane %v2245_v57, %v4021_v53 }
0x269e   : > { %v2275_v28 = vsel %vm2155_vm2, %v2261_v11, %v2274_v31 }
0x26a0   : > { %2462 = vperm.xlu0 %2963, %v3975_v33  }
0x26a4   : > { %v2312_v44 = vpop.permute.xlu1 %2311 }
0x26a5   : > { %v2358_v51 = vperm.slane %v2312_v44, %v4021_v53 }
0x26ac   : > { %v2315_v0 = vpop.permute.xlu1 %2314 }
0x26ad   : > { %v2359_v13 = vperm.slane %v2315_v0, %v4021_v53  ;;  %v2373_v0 = vperm.slane %v4084_v59, %v4021_v53 }
0x26af   : > { %v2374_v18 = vsel %vm2143_vm11, %v2359_v13, %v2358_v51 }
0x26b3   : > { %2456 = vperm.xlu2 %2964, %v3986_v48  }
0x26b4   : > { %v2318_v2 = vpop.permute.xlu1 %2317 }
0x26b5   : > { %v2360_v41 = vperm.slane %v2318_v2, %v4021_v53 }
0x26b7   : > { %v2375_v45 = vsel %vm2145_vm12, %v2360_v41, %v2374_v18  ;;  %v4169_v30 = vpop.xlane.xlu0 %2553 }
0x26bb   : > { %2459 = vperm.xlu2 %2964, %v3984_v58   ;;  %v2142_v58 = vperm.slane %v4035_v9, %v4021_v53 }
0x26bc   : > { %v2321_v33 = vpop.permute.xlu1 %2320 }
0x26bd   : > { %v2361_v14 = vperm.slane %v2321_v33, %v4021_v53  ;;  %v2163_v24 = vsel %vm2155_vm2, %v2142_v58, %v4077_v54  ;;  %v2439_v54 = vpop.permute.xlu2 %2438 }
0x26be   : > { %v2475_v18 = vperm.slane %v2439_v54, %v4021_v53  ;;  %v2647_v54 = vld [vmem:[%s4346_s8] sm:$0xff] }
0x26bf   : > { %v2376_v6 = vsel %vm2147_vm13, %v2361_v14, %v2375_v45  ;;  %v4174_v26 = vpop.xlane.xlu0 %2562 }
0x26c0   : > { %v2490_v14 = vsel %vm2151_vm15, %v2475_v18, %v4144_v3  ;;  %v2650_v3 = vld [vmem:[%s4346_s8 + $0x18] sm:$0xff]  ;;  %v3175_v18 = vld [vmem:[#allocation3 + $0x50] sm:$0xff] }
0x26c1   : > { %2670 = vmatpush.msrb.mxu1 %v2650_v3 }
0x26c2   : > { %2166 = vxpose.xlu0.b32.start [1/2] (short) (narrow) %v4049_v5, 8 }
0x26c3   : > { %2468 = vperm.xlu2 %2964, %v3991_v27   ;;  %v2363_v27 = vperm.slane %v4122_v39, %v4021_v53  ;;  %v2253_v39 = vperm.slane %v4080_v55, %v4021_v53 }
0x26c4   : > { %v2324_v48 = vpop.permute.xlu1 %2323 }
0x26c5   : > { %v2362_v16 = vperm.slane %v2324_v48, %v4021_v53  ;;  %2559 = vadd.xlane.f32.xlu1 %v2558_v15  ;;  %v2268_v52 = vsel %vm2155_vm2, %v2253_v39, %v4117_v20  ;;  %v2451_v32 = vpop.permute.xlu2 %2450 }
0x26c6   : > { %v2479_v62 = vperm.slane %v2451_v32, %v4021_v53  ;;  %v3168_v32 = vld [vmem:[#allocation3 + $0x10] sm:$0xff] }
0x26c7   : > { %v2377_v22 = vsel %vm2149_vm14, %v2362_v16, %v2376_v6  ;;  %v4184_v17 = vpop.xlane.xlu0 %2568 }
0x26c8   : > { %v2378_v38 = vsel %vm2151_vm15, %v2363_v27, %v2377_v22  ;;  %v2493_v57 = vsel %vm2143_vm11, %v2479_v62, %v2478_v35  ;;  %v3165_v27 = vld [vmem:[#allocation3 + $0x8] sm:$0xff] }
0x26c9   : > { %v3170_v62 = vld [vmem:[#allocation3 + $0x28] sm:$0xff] }
0x26ca   : > { %2167 = vxpose.xlu0.b32.end [2/2] (short) (narrow) %v2163_v24, 8 }
0x26cc   : > { %v2330_v5 = vpop.permute.xlu1 %2329 }
0x26cd   : > { %v2364_v34 = vperm.slane %v2330_v5, %v4021_v53 }
0x26cf   : > { %v2379_v37 = vsel %vm2153_vm1, %v2364_v34, %v2378_v38  ;;  %v4193_v19 = vpop.xlane.xlu0 %2574  ;;  %v2649_v34 = vld [vmem:[%s4346_s8 + $0x10] sm:$0xff]  ;;  %v3166_v38 = vld [vmem:[#allocation3] sm:$0xff] }
0x26d0   : > { %2671 = vmatpush.msrb.mxu1 %v2649_v34 }
0x26d4   : > { %v2333_v9 = vpop.permute.xlu1 %2332 }
0x26d5   : > { %v2365_v45 = vperm.slane %v2333_v9, %v4021_v53  ;;  %v2648_v9 = vld [vmem:[%s4346_s8 + $0x8] sm:$0xff] }
0x26d6   : > { %2672 = vmatpush.msrb.mxu1 %v2648_v9 }
0x26d7   : > { %v4195_v29 = vpop.xlane.xlu0 %2580  ;;  %v2380_v15 = vsel %vm2155_vm2, %v2365_v45, %v2379_v37  ;;  %v2600_v37 = vmul.f32 %v3166_v38, %v4169_v30  ;;  %v3176_v45 = vld [vmem:[#allocation3 + $0x58] sm:$0xff] }
0x26d8   : > { %2673 = vmatpush.msrb.mxu1 %v2647_v54 }
0x26d9   : > { %v2616_v39 = vsel %vm574_vm5, %v2600_v37, 0.0  ;;  %v3179_v37 = vld [vmem:[#allocation3 + $0x70] sm:$0xff] }
0x26dc   : > { %v2336_v36 = vpop.permute.xlu1 %2335 }
0x26dd   : > { %v2366_v61 = vperm.slane %v2336_v36, %v4021_v53 }
0x26de   : > { %2465 = vperm.xlu1 %2965, %v3993_v21   ;;  %v2557_v49 = vpop.xlane.xlu2 %2556 }
0x26df   : > { %v4200_v43 = vpop.xlane.xlu0 %2586  ;;  %v2601_v5 = vmul.f32 %v3165_v27, %v2557_v49  ;;  %v3169_v49 = vld [vmem:[#allocation3 + $0x20] sm:$0xff] }
0x26e1   : > { %v2617_v36 = vsel %vm574_vm5, %v2601_v5, 0.0  ;;  %v3178_v5 = vld [vmem:[#allocation3 + $0x68] sm:$0xff] }
0x26e4   : > { %v2339_v8 = vpop.permute.xlu1 %2338 }
0x26e5   : > { %v2367_v21 = vperm.slane %v2339_v8, %v4021_v53 }
0x26e6   : > { %v2566_v20 = vpop.xlane.xlu2 %2565 }
0x26e7   : > { %v4204_v25 = vpop.xlane.xlu0 %2592  ;;  %v2381_v63 = vsel %vm2143_vm11, %v2367_v21, %v2366_v61  ;;  %v2604_v21 = vmul.f32 %v3169_v49, %v2566_v20 }
0x26e9   : > { %2278 = vxpose.xlu2.b32.start [1/2] (short) (narrow) %v2268_v52, 8  ;;  %v3167_v52 = vld [vmem:[#allocation3 + $0x18] sm:$0xff]  ;;  %v2623_v35 = vsel %vm574_vm5, %v2604_v21, 0.0 }
0x26ec   : > { %v2342_v23 = vpop.permute.xlu1 %2341 }
0x26ed   : > { %v2368_v55 = vperm.slane %v2342_v23, %v4021_v53  ;;  %v2603_v23 = vmul.f32 %v3167_v52, %v4174_v26 }
0x26ee   : > { %v2572_v12 = vpop.xlane.xlu2 %2571 }
0x26ef   : > { %v4206_v56 = vpop.xlane.xlu0 %2598  ;;  %v2382_v1 = vsel %vm2145_vm12, %v2368_v55, %v2381_v63  ;;  %v2605_v63 = vmul.f32 %v3170_v62, %v4184_v17  ;;  %v3174_v17 = vld [vmem:[#allocation3 + $0x48] sm:$0xff] }
0x26f1   : > { %2279 = vxpose.xlu2.b32.end [2/2] (short) (narrow) %v2275_v28, 8 }
0x26f4   : > { %v2345_v46 = vpop.permute.xlu1 %2344 }
0x26f5   : > { %v2369_v50 = vperm.slane %v2345_v46, %v4021_v53  ;;  %v2618_v46 = vadd.f32 %v2617_v36, %v2616_v39 }
0x26f6   : > { %v2578_v16 = vpop.xlane.xlu2 %2577 }
0x26f7   : > { %v2383_v4 = vsel %vm2147_vm13, %v2369_v50, %v2382_v1  ;;  %v2621_v50 = vsel %vm574_vm5, %v2603_v23, 0.0 }
0x26f8   : > { %v2384_v31 = vsel %vm2149_vm14, %v2370_v40, %v2383_v4  ;;  %v3171_v4 = vld [vmem:[#allocation3 + $0x30] sm:$0xff]  ;;  %v3172_v40 = vld [vmem:[#allocation3 + $0x38] sm:$0xff] }
0x26f9   : > { %v2606_v26 = vmul.f32 %v3171_v4, %v2572_v12  ;;  %v2607_v20 = vmul.f32 %v3172_v40, %v4193_v19 }
0x26fc   : > { %v2351_v60 = vpop.permute.xlu1 %2350 }
0x26fd   : > { %v2371_v7 = vperm.slane %v2351_v60, %v4021_v53 }
0x26fe   : > { %v2584_v58 = vpop.xlane.xlu2 %2583 }
0x26ff   : > { %v2385_v51 = vsel %vm2151_vm15, %v2371_v7, %v2384_v31 }
0x2702   : > { %v2454_v10 = vpop.permute.xlu0 %2453 }
0x2703   : > { %v2480_v42 = vperm.slane %v2454_v10, %v4021_v53  ;;  %v2625_v10 = vsel %vm574_vm5, %v2605_v63, 0.0 }
0x2704   : > { %v2354_v11 = vpop.permute.xlu1 %2353 }
0x2705   : > { %v4225_v28 = vsel %vm2145_vm12, %v2480_v42, %v2493_v57  ;;  %v2372_v44 = vperm.slane %v2354_v11, %v4021_v53  ;;  %v2627_v57 = vsel %vm574_vm5, %v2606_v26, 0.0  ;;  %v3173_v11 = vld [vmem:[#allocation3 + $0x40] sm:$0xff] }
0x2706   : > { %v2590_v22 = vpop.xlane.xlu2 %2589  ;;  %v2608_v31 = vmul.f32 %v3173_v11, %v2578_v16 }
0x2707   : > { %v2386_v13 = vsel %vm2153_vm1, %v2372_v44, %v2385_v51  ;;  %v2609_v51 = vmul.f32 %v3174_v17, %v4195_v29 }
0x2708   : > { %v2387_v47 = vsel %vm2155_vm2, %v2373_v0, %v2386_v13  ;;  %v2629_v0 = vsel %vm574_vm5, %v2607_v20, 0.0  ;;  %v2631_v12 = vsel %vm574_vm5, %v2608_v31, 0.0 }
0x2709   : > { %v2633_v19 = vsel %vm574_vm5, %v2609_v51, 0.0 }
0x270a   : > { %v2445_v2 = vpop.permute.xlu0 %2444 }
0x270b   : > { %v2477_v59 = vperm.slane %v2445_v2, %v4021_v53  ;;  %v2610_v2 = vmul.f32 %v3175_v18, %v2584_v58  ;;  %v2613_v58 = vmul.f32 %v3178_v5, %v4204_v25  ;;  %v3180_v25 = vld [vmem:[#allocation3 + $0x78] sm:$0xff] }
0x270c   : > { %v2615_v23 = vmul.f32 %v3180_v25, %v4206_v56 }
0x270d   : > { %v2442_v41 = vpop.permute.xlu1 %2441  ;;  %v2641_v52 = vsel %vm574_vm5, %v2613_v58, 0.0 }
0x270e   : > { %v2476_v33 = vperm.slane %v2442_v41, %v4021_v53  ;;  %v4242_v24 = vpop.xlane.xlu2 %2595 }
0x270f   : > { %v2614_v9 = vmul.f32 %v3179_v37, %v4242_v24 }
0x2710   : > { %v2491_v6 = vsel %vm2153_vm1, %v2476_v33, %v2490_v14  ;;  %v2611_v33 = vmul.f32 %v3176_v45, %v4200_v43 }
0x2711   : > { %v2492_v48 = vsel %vm2155_vm2, %v2477_v59, %v2491_v6  ;;  %v2635_v6 = vsel %vm574_vm5, %v2610_v2, 0.0 }
0x2712   : > { %2502 = vxpose.xlu0.b32.start [1/2] (short) (narrow) %v2492_v48, 8  ;;  %v3177_v48 = vld [vmem:[#allocation3 + $0x60] sm:$0xff]  ;;  %v2637_v27 = vsel %vm574_vm5, %v2611_v33, 0.0  ;;  %v2463_v3 = vpop.permute.xlu0 %2462 }
0x2713   : > { %2390 = vxpose.xlu1.b32.start [1/2] (short) (narrow) %v2380_v15, 8  ;;  %v2612_v15 = vmul.f32 %v3177_v48, %v2590_v22  ;;  %v2483_v54 = vperm.slane %v2463_v3, %v4021_v53 }
0x2715   : > { %v2639_v38 = vsel %vm574_vm5, %v2612_v15, 0.0 }
0x2716   : > { %v2457_v60 = vpop.permute.xlu2 %2456 }
0x2717   : > { %v2481_v14 = vperm.slane %v2457_v60, %v4021_v53 }
0x2719   : > { %v2495_v34 = vsel %vm2147_vm13, %v2481_v14, %v4225_v28 }
0x271b   : > { %2391 = vxpose.xlu1.b32.end [2/2] (short) (narrow) %v2387_v47, 8 }
0x271e   : > { %v2460_v13 = vpop.permute.xlu2 %2459 }
0x271f   : > { %v2482_v29 = vperm.slane %v2460_v13, %v4021_v53 }
0x2721   : > { %v2496_v22 = vsel %vm2149_vm14, %v2482_v29, %v2495_v34 }
0x2726   : > { %v2469_v36 = vpop.permute.xlu2 %2468 }
0x2738   : > { %v2560_v8 = vpop.xlane.xlu1 %2559 }
0x2739   : > { %v2602_v30 = vmul.f32 %v3168_v32, %v2560_v8  ;;  %v2485_v32 = vperm.slane %v2469_v36, %v4021_v53 }
0x273b   : > { %v2619_v55 = vsel %vm574_vm5, %v2602_v30, 0.0  ;;  %v2497_v30 = vsel %vm2151_vm15, %v2483_v54, %v2496_v22 }
0x273c   : > { %v2620_v61 = vadd.f32 %v2619_v55, %v2618_v46  ;;  %v2643_v46 = vsel %vm574_vm5, %v2614_v9, 0.0  ;;  %v2645_v55 = vsel %vm574_vm5, %v2615_v23, 0.0 }
0x273e   : > { %v2622_v1 = vadd.f32 %v2621_v50, %v2620_v61  ;;  %v2969_v50 = vld [vmem:[%s4347_s9] ss:$0 sm:$0xff] }
0x2740   : > { %v2624_v7 = vadd.f32 %v2623_v35, %v2622_v1 }
0x2742   : > { %v2626_v42 = vadd.f32 %v2625_v10, %v2624_v7 }
0x2744   : > { %v2628_v44 = vadd.f32 %v2627_v57, %v2626_v42 }
0x2746   : > { %v2630_v47 = vadd.f32 %v2629_v0, %v2628_v44 }
0x2748   : > { %v2632_v41 = vadd.f32 %v2631_v12, %v2630_v47 }
0x274a   : > { %v2634_v59 = vadd.f32 %v2633_v19, %v2632_v41 }
0x274c   : > { %v2636_v16 = vadd.f32 %v2635_v6, %v2634_v59 }
0x274e   : > { %v2638_v43 = vadd.f32 %v2637_v27, %v2636_v16 }
0x2750   : > { %v2466_v8 = vpop.permute.xlu1 %2465  ;;  %v2640_v39 = vadd.f32 %v2639_v38, %v2638_v43 }
0x2751   : > { %v2484_v28 = vperm.slane %v2466_v8, %v4021_v53 }
0x2752   : > { %v2642_v24 = vadd.f32 %v2641_v52, %v2640_v39 }
0x2753   : > { %v2498_v49 = vsel %vm2153_vm1, %v2484_v28, %v2497_v30 }
0x2754   : > { %v2499_v21 = vsel %vm2155_vm2, %v2485_v32, %v2498_v49  ;;  %v2644_v60 = vadd.f32 %v2643_v46, %v2642_v24 }
0x2755   : > { %2503 = vxpose.xlu0.b32.end [2/2] (short) (narrow) %v2499_v21, 8 }
0x2756   : > { %v2646_v56 = vadd.f32 %v2645_v55, %v2644_v60 }
0x2758   : > { %2885 = vmatmul.msk.f32.vlgmr.msrb.gmra.mxu1 %vm574_vm5, %v2646_v56 }
0x2766   : > { %v2182_v1 = vpop.trf.xlu0 }
0x2782   : > { %v2294_v61 = vpop.trf.xlu2 }
0x2783   : > { %2535 = vrot.lane.b32.xlu1 %v2294_v61, %s3289_s22 }
0x27b7   : > { %v2406_v53 = vpop.trf.xlu1 }
0x27b8   : > { %2539 = vrot.lane.b32.xlu2 %v2406_v53, %s3284_s25  ;;  %s2804_s25 = sshll.u32 %s3435_s13, 3 }
0x27b9   : > { %s412_s22 = scalar_lea.vmem [#allocation7], %s2804_s25 }
0x27ba   : > { %s2700_s14 = sshll.u32 %s412_s22, 4  ;;  %s2701_s14 = int_to_ptr.vmem [resolvable:$true] %s2700_s14 }
0x27d5   : > { %v2675_v62 = vpop.f32.mrf.mxu1 }
0x27d6   : > { %v2676_v63 = vadd.f32 %v2969_v50, %v2675_v62 }
0x27d8   : > { %2679 = vst.msk [vmem:[%s416_s16] sm:$0xff] %vm2678_vm3, %v2676_v63  ;;  %s3231_s16 = scalar_lea.hbm %s4349_s11, 16 }
0x27d9   : > { %p3233_p5 = scmp.lt.s32.totalorder %s3231_s16, %s3227_s28 }
0x27db   : > { %p3234_p7 = por %p3233_p5, %p3232_p4 }
0x27dd   : > { %p3235_p8 = pnand %p3234_p7, %p3230_p3 }
0x27f1   : > { %v2518_v35 = vpop.trf.xlu0 }
0x27f2   : > { %2543 = vrot.lane.b32.xlu1 %v2518_v35, %s3290_s24 }
0x27f5   : > { %v2536_v4 = vpop.permute.xlu1 %2535 }
0x27f6   : > { %v2546_v7 = vsel %vm443_vm0, %v2182_v1, %v2536_v4 }
0x2812   : > { %v2540_v26 = vpop.permute.xlu2 %2539 }
0x2813   : > { %v2547_v10 = vsel %vm574_vm5, %v2546_v7, %v2540_v26 }
0x2864   : > { %v2544_v40 = vpop.permute.xlu1 %2543 }
0x2865   : > { %v2549_v20 = vsel %vm2548_vm4, %v2547_v10, %v2544_v40 }
0x2866   : > { %2551 = vst.msk [vmem:[%s412_s22] sm:$0xff] %vm2550_vm6, %v2549_v20 }
0x2867   : > { %3238 = shalt.err (!%p3235_p8)
}
0x2868   : > { %2898 = dma.vmem_to_hbm [thread:$0]  (%p3401_p11), %s2701_s14, 128, %s2703_s27, %s2685_s21  }
0x2869 PF: > { %s4365_s13 = sld [smem:[#allocation10_spill]]  ;;  %p2905_p10 = pnand %p2799_p9, %p3405_p12 }
0x286b   : > { %p2906_p1 = pneg %p2905_p10 }
0x286f   : > { %s2721_s19 = sand.u32 1, %s4365_s13  }
0x2870   : > { %s2722_s23 = scalar_lea.sflag [#allocation6], %s2721_s19 }
0x2871   : > { %3260 = dma.done.wait (%p2906_p1), %s2722_s23, 128  }
0x2872   : > { %3262 = vsyncadd (%p2906_p1), %s2722_s23, 4294967168  ;;  %s4367_s20 = sld [smem:[#allocation12_spill]]  ;;  %s4370_s17 = smov %s3269_s18 }
0x2873   : > { %s4368_s26 = sld [smem:[#allocation11_spill]] }
0x2874   : > { %s4369_s19 = sld [smem:[#allocation13_spill]] }
0x2878   : > { %p25_p2 = scmp.ge.s32.totalorder %s4367_s20, 4  }
0x2879   : > { %s4371_s18 = smov %s4368_s26 }
0x287a   :  { %27 = sbr.rel (!%p25_p2) target bundleno = 5 (0x5), region = 147 }
0x287f   :  { %2728 = vsyncpa [#allocation5], 1 }
0x2880   :  { %2730 = vsyncpa [#allocation5 + $0x1], 1 }
0x2881   :  { %2731 = vsyncpa [#allocation6], 1 }
0x2882   :  { %2733 = vsyncpa [#allocation6 + $0x1], 1 }

</bundles_post_ra>
